<compile_context>
chip_gen: v5e
topology: v5e:2x2
jax: 0.10.0
libtpu: 0.0.40
codegen_flags: <defaults>
</compile_context>

<pallas_src>
import functools

import jax
import jax.numpy as jnp
from jax.experimental import pallas as pl
from jax.experimental.pallas import tpu as pltpu

LANE = 128  # TPU lane width; stored channel dims are padded to this
_VMEM = pl.BlockSpec(memory_space=pltpu.MemorySpace.VMEM)


def _cparams(**kw):
    return pltpu.CompilerParams(vmem_limit_bytes=32 * 1024 * 1024, **kw)


# ---------------------------------------------------------------------------
# Fused feature extractor: conv3x3+relu -> 2x2 maxpool -> conv3x3+relu
# ---------------------------------------------------------------------------

def features_kernel(x_ref, w1_ref, b1_ref, w2_ref, b2_ref, o_ref,
                    pad1_ref, pad2_ref):
    # x_ref : (H, W, Cin)       raw image (halo handled in-kernel)
    # w1_ref: (9, Cin, LANE)    conv1 taps, Cout zero-padded to LANE
    # b1_ref: (1, LANE)
    # w2_ref: (9*LANE, LANE)    conv2 tap-packed weights (Cin & Cout padded)
    # b2_ref: (1, LANE)
    # o_ref : (HF, WF, LANE)    lane-dense feature map
    H, W, CIN = x_ref.shape
    HF, WF, CP = o_ref.shape

    # zero-pad the input into VMEM scratch (1-pixel halo), no XLA-side pad
    pad1_ref[...] = jnp.zeros(pad1_ref.shape, jnp.float32)
    pad1_ref[1:H + 1, 1:W + 1, :] = x_ref[...]

    # ---- conv1 + relu (Cin=3: per-tap MXU dots, accumulated in f32) ----
    acc = jnp.zeros((H * W, CP), jnp.float32)
    for ky in range(3):
        for kx in range(3):
            t = ky * 3 + kx
            patch = pad1_ref[ky:ky + H, kx:kx + W, :].reshape(H * W, CIN)
            acc = acc + jnp.dot(patch, w1_ref[t],
                                preferred_element_type=jnp.float32)
    h1 = jnp.maximum(acc + b1_ref[...], 0.0)            # (H*W, LANE)

    # ---- 2x2 / stride-2 max pool (stays in registers/VMEM) ----
    h1 = h1.reshape(H, W, CP)
    h1 = jnp.max(h1.reshape(HF, 2, W, CP), axis=1)
    h1 = jnp.max(h1.reshape(HF, WF, 2, CP), axis=2)     # (HF, WF, LANE)

    # ---- conv2 + relu: tap-packed im2col -> ONE MXU dot (K = 9*LANE) ----
    pad2_ref[...] = jnp.zeros(pad2_ref.shape, jnp.float32)
    pad2_ref[1:HF + 1, 1:WF + 1, :] = h1
    cols = []
    for ky in range(3):
        for kx in range(3):
            cols.append(pad2_ref[ky:ky + HF, kx:kx + WF, :].reshape(HF * WF, CP))
    col = jnp.concatenate(cols, axis=-1)                # (HF*WF, 9*LANE) aligned
    h2 = jnp.dot(col, w2_ref[...], preferred_element_type=jnp.float32)
    h2 = jnp.maximum(h2 + b2_ref[...], 0.0)             # (HF*WF, LANE)
    o_ref[...] = h2.reshape(HF, WF, CP)


def feature_extractor(x_hwc, p):
    H, W, CIN = x_hwc.shape
    HF, WF = H // 2, W // 2
    flops = 2 * (H * W * 9 * CIN * LANE + HF * WF * 9 * LANE * LANE)
    bytes_acc = 4 * (H * W * CIN + 9 * CIN * LANE + 9 * LANE * LANE
                     + HF * WF * LANE)
    return pl.pallas_call(
        features_kernel,
        out_shape=jax.ShapeDtypeStruct((HF, WF, LANE), jnp.float32),
        in_specs=[_VMEM] * 5,
        out_specs=_VMEM,
        scratch_shapes=[pltpu.VMEM((H + 2, W + 2, CIN), jnp.float32),
                        pltpu.VMEM((HF + 2, WF + 2, LANE), jnp.float32)],
        compiler_params=_cparams(),
        cost_estimate=pl.CostEstimate(flops=flops, transcendentals=0,
                                      bytes_accessed=bytes_acc),
    )(x_hwc, p["conv1_w_p"], p["conv1_b_p"], p["conv2_w_p"], p["conv2_b_p"])


# ---------------------------------------------------------------------------
# RoI adaptive max-pool (two-stage reduction, one wide store per RoI)
# ---------------------------------------------------------------------------

def roi_pool_kernel(rois_ref, f_ref, o_ref, *, pool_size):
    # rois_ref: (R_pad, 4) int32 in SMEM (scalar prefetch), roi = (x1,y1,x2,y2)
    # f_ref   : (HF, WF, LANE) feature map
    # o_ref   : (P*P, LANE)    pooled slab for roi `pl.program_id(0)`
    P = pool_size
    HF, WF, CP = f_ref.shape
    r = pl.program_id(0)
    x1 = rois_ref[r, 0]
    y1 = rois_ref[r, 1]
    x2 = rois_ref[r, 2]
    y2 = rois_ref[r, 3]
    # clamp degenerate / out-of-range RoIs to at least 1x1 inside the map
    y1 = jnp.clip(y1, 0, HF - 1)
    x1 = jnp.clip(x1, 0, WF - 1)
    h = jnp.clip(y2 - y1, 1, HF - y1)
    w = jnp.clip(x2 - x1, 1, WF - x1)

    fmap = f_ref[...]
    neg = jnp.float32(-jnp.inf)
    rows = jax.lax.broadcasted_iota(jnp.int32, (HF, WF, 1), 0)
    colw = jax.lax.broadcasted_iota(jnp.int32, (WF, 1), 0)

    # stage 1: reduce H into P row bins (P full-map passes instead of P*P)
    row_bins = []
    for oy in range(P):
        ys = y1 + (oy * h) // P
        ye = y1 + ((oy + 1) * h + (P - 1)) // P
        rb = jnp.max(jnp.where((rows >= ys) & (rows < ye), fmap, neg), axis=0)
        row_bins.append(rb)                              # (WF, LANE)

    # stage 2: reduce each row bin along W; select into a (P*P, LANE) slab
    bin_rows = jax.lax.broadcasted_iota(jnp.int32, (P * P, 1), 0)
    pooled = jnp.zeros((P * P, CP), jnp.float32)
    for oy in range(P):
        for ox in range(P):
            xs = x1 + (ox * w) // P
            xe = x1 + ((ox + 1) * w + (P - 1)) // P
            cm = (colw >= xs) & (colw < xe)
            v = jnp.max(jnp.where(cm, row_bins[oy], neg),
                        axis=0, keepdims=True)           # (1, LANE)
            pooled = jnp.where(bin_rows == (oy * P + ox), v, pooled)
    o_ref[...] = pooled                                  # single wide store


def roi_pool(fmap, rois_padded, pool_size):
    HF, WF, CP = fmap.shape
    Rp = rois_padded.shape[0]
    kernel = functools.partial(roi_pool_kernel, pool_size=pool_size)
    grid_spec = pltpu.PrefetchScalarGridSpec(
        num_scalar_prefetch=1,
        grid=(Rp,),
        in_specs=[pl.BlockSpec((HF, WF, CP), lambda r, rois: (0, 0, 0))],
        out_specs=pl.BlockSpec((None, pool_size * pool_size, CP),
                               lambda r, rois: (r, 0, 0)),
    )
    return pl.pallas_call(
        kernel,
        out_shape=jax.ShapeDtypeStruct((Rp, pool_size * pool_size, CP),
                                       jnp.float32),
        grid_spec=grid_spec,
        compiler_params=_cparams(dimension_semantics=("parallel",)),
    )(rois_padded, fmap)


# ---------------------------------------------------------------------------
# FC head: relu(x @ W1 + b1) @ [W_cls | W_bbox] (merged, lane-dense output)
# ---------------------------------------------------------------------------

def rcnn_head_kernel(x_ref, w1_ref, b1_ref, w23_ref, b23_ref, o_ref):
    h = jnp.dot(x_ref[...], w1_ref[...], preferred_element_type=jnp.float32)
    h = jnp.maximum(h + b1_ref[...], 0.0)
    o_ref[...] = (jnp.dot(h, w23_ref[...], preferred_element_type=jnp.float32)
                  + b23_ref[...])


def rcnn_head(x_flat, p):
    Rp, D = x_flat.shape
    H1 = p["fc1_w_p"].shape[1]
    flops = 2 * Rp * (D * H1 + H1 * LANE)
    bytes_acc = 4 * (Rp * D + D * H1 + H1 * LANE + Rp * LANE)
    return pl.pallas_call(
        rcnn_head_kernel,
        out_shape=jax.ShapeDtypeStruct((Rp, LANE), jnp.float32),
        in_specs=[_VMEM] * 5,
        out_specs=_VMEM,
        compiler_params=_cparams(),
        cost_estimate=pl.CostEstimate(flops=flops, transcendentals=0,
                                      bytes_accessed=bytes_acc),
    )(x_flat, p["fc1_w_p"], p["fc1_b_p"], p["head_w_p"], p["head_b_p"])


# ---------------------------------------------------------------------------
# One-time weight re-layout (done at init, not per forward)
# ---------------------------------------------------------------------------

def prepare_params(params, pool_size):
    """Pad channel dims to LANE, pack conv2 taps, permute fc1 rows to the
    kernels' native (py, px, c) flatten order, merge cls/bbox heads."""
    P = pool_size
    c1w, c1b = params["conv1_w"], params["conv1_b"]      # (3,3,Cin,C1), (C1,)
    c2w, c2b = params["conv2_w"], params["conv2_b"]      # (3,3,C1,C2), (C2,)
    C1, C2 = c1w.shape[-1], c2w.shape[-1]

    w1p = jnp.pad(c1w, ((0, 0), (0, 0), (0, 0), (0, LANE - C1)))
    w1p = w1p.reshape(9, c1w.shape[2], LANE)
    b1p = jnp.pad(c1b, (0, LANE - C1)).reshape(1, LANE)

    w2p = jnp.pad(c2w, ((0, 0), (0, 0), (0, LANE - C1), (0, LANE - C2)))
    w2p = w2p.reshape(9 * LANE, LANE)
    b2p = jnp.pad(c2b, (0, LANE - C2)).reshape(1, LANE)

    fc1 = params["fc1_w"]                                # (C2*P*P, H1) torch (c,py,px) order
    H1 = fc1.shape[1]
    fc1 = jnp.transpose(fc1.reshape(C2, P, P, H1), (1, 2, 0, 3))  # (P,P,C2,H1)
    fc1 = jnp.pad(fc1, ((0, 0), (0, 0), (0, LANE - C2), (0, 0)))
    fc1p = fc1.reshape(P * P * LANE, H1)
    fc1b = params["fc1_b"].reshape(1, H1)

    hw = jnp.concatenate([params["fc2_w"], params["bbox_w"]], axis=1)
    hb = jnp.concatenate([params["fc2_b"], params["bbox_b"]], axis=0)
    hw = jnp.pad(hw, ((0, 0), (0, LANE - hw.shape[1])))
    hb = jnp.pad(hb, (0, LANE - hb.shape[0])).reshape(1, LANE)

    return dict(conv1_w_p=w1p, conv1_b_p=b1p, conv2_w_p=w2p, conv2_b_p=b2p,
                fc1_w_p=fc1p, fc1_b_p=fc1b, head_w_p=hw, head_b_p=hb)


# ---------------------------------------------------------------------------
# Forward pass
# ---------------------------------------------------------------------------

def r_cnn_forward(images_nchw, rois, prepped, pool_size=7, num_classes=21):
    # images: (1, Cin, H, W) float32; rois: (R, 4) int32 (x1, y1, x2, y2) in
    # feature-map coordinates, as in the torch RoIPoolLayer.
    x = jnp.transpose(images_nchw, (0, 2, 3, 1))[0]          # (H, W, Cin)
    fmap = feature_extractor(x, prepped)                     # (HF, WF, LANE)

    R = rois.shape[0]
    Rp = max(8, ((R + 7) // 8) * 8)                          # sublane-pad RoI count
    rois_p = jnp.pad(rois, ((0, Rp - R), (0, 0)))            # dummies clamped in-kernel

    pooled = roi_pool(fmap, rois_p, pool_size)               # (Rp, P*P, LANE)
    flat = pooled.reshape(Rp, pool_size * pool_size * LANE)  # contiguous, no transpose
    out = rcnn_head(flat, prepped)                           # (Rp, LANE)
    cls_scores = out[:R, :num_classes]
    bbox_preds = out[:R, num_classes:num_classes + 4]
    return cls_scores, bbox_preds


# ---------------------------------------------------------------------------
# Pure-JAX reference (for correctness check)
# ---------------------------------------------------------------------------

def _reference(images, rois, params, P):
    hi = jax.lax.Precision.HIGHEST
    x = jnp.transpose(images, (0, 2, 3, 1))

    def conv(x, w, b):
        y = jax.lax.conv_general_dilated(
            x, w, window_strides=(1, 1), padding="SAME",
            dimension_numbers=("NHWC", "HWIO", "NHWC"), precision=hi)
        return jnp.maximum(y + b, 0.0)

    x = conv(x, params["conv1_w"], params["conv1_b"])
    x = jax.lax.reduce_window(x, -jnp.inf, jax.lax.max,
                              (1, 2, 2, 1), (1, 2, 2, 1), "VALID")
    f = conv(x, params["conv2_w"], params["conv2_b"])[0]     # (HF, WF, C2)

    outs = []
    for i in range(rois.shape[0]):
        x1, y1, x2, y2 = (int(rois[i, 0]), int(rois[i, 1]),
                          int(rois[i, 2]), int(rois[i, 3]))
        region = f[y1:y2, x1:x2, :]
        h, w = region.shape[0], region.shape[1]
        bins = []
        for oy in range(P):
            ys, ye = (oy * h) // P, -((-(oy + 1) * h) // P)
            for ox in range(P):
                xs, xe = (ox * w) // P, -((-(ox + 1) * w) // P)
                bins.append(jnp.max(region[ys:ye, xs:xe, :], axis=(0, 1)))
        outs.append(jnp.stack(bins).reshape(P, P, -1))
    pooled = jnp.stack(outs)                                  # (R, P, P, C2)
    flat = jnp.transpose(pooled, (0, 3, 1, 2)).reshape(len(outs), -1)
    hdd = jnp.maximum(
        jnp.dot(flat, params["fc1_w"], precision=hi) + params["fc1_b"], 0.0)
    cls = jnp.dot(hdd, params["fc2_w"], precision=hi) + params["fc2_b"]
    bbox = jnp.dot(hdd, params["bbox_w"], precision=hi) + params["bbox_b"]
    return cls, bbox


# ---------------------------------------------------------------------------
# Main
# ---------------------------------------------------------------------------

if __name__ == "__main__":
    key = jax.random.PRNGKey(0)
    ks = jax.random.split(key, 12)

    N, Cin, Himg, Wimg = 1, 3, 16, 16          # small synthetic image
    C1, C2 = 16, 32                            # reduced VGG channels
    P = 7                                      # roi_pool_size = (7, 7)
    H1 = 64                                    # reduced fc1 width
    num_classes = 21
    D = C2 * P * P

    images = jax.random.normal(ks[0], (N, Cin, Himg, Wimg), jnp.float32)
    # rois in feature-map coordinates (feature map is 8x8 after one 2x2 pool)
    rois = jnp.array([[0, 0, 8, 8],
                      [2, 1, 7, 6],
                      [1, 3, 5, 8]], dtype=jnp.int32)

    params = {
        "conv1_w": 0.10 * jax.random.normal(ks[1], (3, 3, Cin, C1), jnp.float32),
        "conv1_b": 0.10 * jax.random.normal(ks[2], (C1,), jnp.float32),
        "conv2_w": 0.10 * jax.random.normal(ks[3], (3, 3, C1, C2), jnp.float32),
        "conv2_b": 0.10 * jax.random.normal(ks[4], (C2,), jnp.float32),
        "fc1_w": 0.05 * jax.random.normal(ks[5], (D, H1), jnp.float32),
        "fc1_b": 0.05 * jax.random.normal(ks[6], (H1,), jnp.float32),
        "fc2_w": 0.05 * jax.random.normal(ks[7], (H1, num_classes), jnp.float32),
        "fc2_b": 0.05 * jax.random.normal(ks[8], (num_classes,), jnp.float32),
        "bbox_w": 0.05 * jax.random.normal(ks[9], (H1, 4), jnp.float32),
        "bbox_b": 0.05 * jax.random.normal(ks[10], (4,), jnp.float32),
    }

    prepped = prepare_params(params, P)        # one-time weight re-layout
    cls_scores, bbox_preds = r_cnn_forward(images, rois, prepped,
                                           pool_size=P, num_classes=num_classes)
    jax.block_until_ready((cls_scores, bbox_preds))

    assert cls_scores.shape == (rois.shape[0], num_classes), cls_scores.shape
    assert bbox_preds.shape == (rois.shape[0], 4), bbox_preds.shape
    assert jnp.all(jnp.isfinite(cls_scores)) and jnp.all(jnp.isfinite(bbox_preds))

    ref_cls, ref_bbox = _reference(images, rois, params, P)
    assert jnp.allclose(cls_scores, ref_cls, atol=2e-3, rtol=2e-3), \
        float(jnp.max(jnp.abs(cls_scores - ref_cls)))
    assert jnp.allclose(bbox_preds, ref_bbox, atol=2e-3, rtol=2e-3), \
        float(jnp.max(jnp.abs(bbox_preds - ref_bbox)))

    print("KERNEL_OK")
</pallas_src>

<mosaic_0001>
module attributes {stable_mosaic.version = 11 : i64} {
  func.func @features_kernel(%arg0: memref<16x16x3xf32, #tpu.memory_space<vmem>>, %arg1: memref<9x3x128xf32, #tpu.memory_space<vmem>>, %arg2: memref<1x128xf32, #tpu.memory_space<vmem>>, %arg3: memref<1152x128xf32, #tpu.memory_space<vmem>>, %arg4: memref<1x128xf32, #tpu.memory_space<vmem>>, %arg5: memref<8x8x128xf32, #tpu.memory_space<vmem>>, %arg6: memref<18x18x3xf32, #tpu.memory_space<vmem>>, %arg7: memref<10x10x128xf32, #tpu.memory_space<vmem>>) attributes {dimension_semantics = [], scalar_prefetch = 0 : i64, scratch_operands = 2 : i64, tpu.core_type = #tpu.core_type<tc>} {
    %cst = arith.constant 0.000000e+00 : f32
    %0 = vector.broadcast %cst : f32 to vector<18x18x3xf32>
    %c0 = arith.constant 0 : index
    %c0_0 = arith.constant 0 : index
    %c0_1 = arith.constant 0 : index
    %1 = vector.load %arg6[%c0, %c0_0, %c0_1] : memref<18x18x3xf32, #tpu.memory_space<vmem>>, vector<18x18x3xf32>
    tpu.vector_store %arg6[%c0, %c0_0, %c0_1], %0 {strides = array<i32>} : memref<18x18x3xf32, #tpu.memory_space<vmem>>, vector<18x18x3xf32>,
    %c0_2 = arith.constant 0 : index
    %c0_3 = arith.constant 0 : index
    %c0_4 = arith.constant 0 : index
    %2 = vector.load %arg0[%c0_2, %c0_3, %c0_4] : memref<16x16x3xf32, #tpu.memory_space<vmem>>, vector<16x16x3xf32>
    %c1 = arith.constant 1 : index
    %c1_5 = arith.constant 1 : index
    %c0_6 = arith.constant 0 : index
    %3 = vector.load %arg6[%c1, %c1_5, %c0_6] : memref<18x18x3xf32, #tpu.memory_space<vmem>>, vector<16x16x3xf32>
    tpu.vector_store %arg6[%c1, %c1_5, %c0_6], %2 {strides = array<i32>} : memref<18x18x3xf32, #tpu.memory_space<vmem>>, vector<16x16x3xf32>,
    %cst_7 = arith.constant 0.000000e+00 : f32
    %4 = vector.broadcast %cst_7 : f32 to vector<256x128xf32>
    %c0_8 = arith.constant 0 : index
    %c0_9 = arith.constant 0 : index
    %c0_10 = arith.constant 0 : index
    %5 = vector.load %arg6[%c0_8, %c0_9, %c0_10] : memref<18x18x3xf32, #tpu.memory_space<vmem>>, vector<16x16x3xf32>
    %6 = vector.shape_cast %5 : vector<16x16x3xf32> to vector<256x3xf32>
    %c0_11 = arith.constant 0 : index
    %c0_12 = arith.constant 0 : index
    %c0_13 = arith.constant 0 : index
    %7 = vector.load %arg1[%c0_11, %c0_12, %c0_13] : memref<9x3x128xf32, #tpu.memory_space<vmem>>, vector<1x3x128xf32>
    %8 = vector.shape_cast %7 : vector<1x3x128xf32> to vector<3x128xf32>
    %cst_14 = arith.constant dense<0.000000e+00> : vector<256x128xf32>
    %9 = tpu.matmul %6, %8, %cst_14 {dimension_numbers = #tpu.dot_dimension_numbers<[1], [0], [0], [1], [0, 0, 1, 1], [], []>} : vector<256x3xf32>, vector<3x128xf32>, vector<256x128xf32> -> vector<256x128xf32>
    %10 = arith.addf %4, %9 : vector<256x128xf32>
    %c0_15 = arith.constant 0 : index
    %c1_16 = arith.constant 1 : index
    %c0_17 = arith.constant 0 : index
    %11 = vector.load %arg6[%c0_15, %c1_16, %c0_17] : memref<18x18x3xf32, #tpu.memory_space<vmem>>, vector<16x16x3xf32>
    %12 = vector.shape_cast %11 : vector<16x16x3xf32> to vector<256x3xf32>
    %c1_18 = arith.constant 1 : index
    %c0_19 = arith.constant 0 : index
    %c0_20 = arith.constant 0 : index
    %13 = vector.load %arg1[%c1_18, %c0_19, %c0_20] : memref<9x3x128xf32, #tpu.memory_space<vmem>>, vector<1x3x128xf32>
    %14 = vector.shape_cast %13 : vector<1x3x128xf32> to vector<3x128xf32>
    %cst_21 = arith.constant dense<0.000000e+00> : vector<256x128xf32>
    %15 = tpu.matmul %12, %14, %cst_21 {dimension_numbers = #tpu.dot_dimension_numbers<[1], [0], [0], [1], [0, 0, 1, 1], [], []>} : vector<256x3xf32>, vector<3x128xf32>, vector<256x128xf32> -> vector<256x128xf32>
    %16 = arith.addf %10, %15 : vector<256x128xf32>
    %c0_22 = arith.constant 0 : index
    %c2 = arith.constant 2 : index
    %c0_23 = arith.constant 0 : index
    %17 = vector.load %arg6[%c0_22, %c2, %c0_23] : memref<18x18x3xf32, #tpu.memory_space<vmem>>, vector<16x16x3xf32>
    %18 = vector.shape_cast %17 : vector<16x16x3xf32> to vector<256x3xf32>
    %c2_24 = arith.constant 2 : index
    %c0_25 = arith.constant 0 : index
    %c0_26 = arith.constant 0 : index
    %19 = vector.load %arg1[%c2_24, %c0_25, %c0_26] : memref<9x3x128xf32, #tpu.memory_space<vmem>>, vector<1x3x128xf32>
    %20 = vector.shape_cast %19 : vector<1x3x128xf32> to vector<3x128xf32>
    %cst_27 = arith.constant dense<0.000000e+00> : vector<256x128xf32>
    %21 = tpu.matmul %18, %20, %cst_27 {dimension_numbers = #tpu.dot_dimension_numbers<[1], [0], [0], [1], [0, 0, 1, 1], [], []>} : vector<256x3xf32>, vector<3x128xf32>, vector<256x128xf32> -> vector<256x128xf32>
    %22 = arith.addf %16, %21 : vector<256x128xf32>
    %c1_28 = arith.constant 1 : index
    %c0_29 = arith.constant 0 : index
    %c0_30 = arith.constant 0 : index
    %23 = vector.load %arg6[%c1_28, %c0_29, %c0_30] : memref<18x18x3xf32, #tpu.memory_space<vmem>>, vector<16x16x3xf32>
    %24 = vector.shape_cast %23 : vector<16x16x3xf32> to vector<256x3xf32>
    %c3 = arith.constant 3 : index
    %c0_31 = arith.constant 0 : index
    %c0_32 = arith.constant 0 : index
    %25 = vector.load %arg1[%c3, %c0_31, %c0_32] : memref<9x3x128xf32, #tpu.memory_space<vmem>>, vector<1x3x128xf32>
    %26 = vector.shape_cast %25 : vector<1x3x128xf32> to vector<3x128xf32>
    %cst_33 = arith.constant dense<0.000000e+00> : vector<256x128xf32>
    %27 = tpu.matmul %24, %26, %cst_33 {dimension_numbers = #tpu.dot_dimension_numbers<[1], [0], [0], [1], [0, 0, 1, 1], [], []>} : vector<256x3xf32>, vector<3x128xf32>, vector<256x128xf32> -> vector<256x128xf32>
    %28 = arith.addf %22, %27 : vector<256x128xf32>
    %c1_34 = arith.constant 1 : index
    %c1_35 = arith.constant 1 : index
    %c0_36 = arith.constant 0 : index
    %29 = vector.load %arg6[%c1_34, %c1_35, %c0_36] : memref<18x18x3xf32, #tpu.memory_space<vmem>>, vector<16x16x3xf32>
    %30 = vector.shape_cast %29 : vector<16x16x3xf32> to vector<256x3xf32>
    %c4 = arith.constant 4 : index
    %c0_37 = arith.constant 0 : index
    %c0_38 = arith.constant 0 : index
    %31 = vector.load %arg1[%c4, %c0_37, %c0_38] : memref<9x3x128xf32, #tpu.memory_space<vmem>>, vector<1x3x128xf32>
    %32 = vector.shape_cast %31 : vector<1x3x128xf32> to vector<3x128xf32>
    %cst_39 = arith.constant dense<0.000000e+00> : vector<256x128xf32>
    %33 = tpu.matmul %30, %32, %cst_39 {dimension_numbers = #tpu.dot_dimension_numbers<[1], [0], [0], [1], [0, 0, 1, 1], [], []>} : vector<256x3xf32>, vector<3x128xf32>, vector<256x128xf32> -> vector<256x128xf32>
    %34 = arith.addf %28, %33 : vector<256x128xf32>
    %c1_40 = arith.constant 1 : index
    %c2_41 = arith.constant 2 : index
    %c0_42 = arith.constant 0 : index
    %35 = vector.load %arg6[%c1_40, %c2_41, %c0_42] : memref<18x18x3xf32, #tpu.memory_space<vmem>>, vector<16x16x3xf32>
    %36 = vector.shape_cast %35 : vector<16x16x3xf32> to vector<256x3xf32>
    %c5 = arith.constant 5 : index
    %c0_43 = arith.constant 0 : index
    %c0_44 = arith.constant 0 : index
    %37 = vector.load %arg1[%c5, %c0_43, %c0_44] : memref<9x3x128xf32, #tpu.memory_space<vmem>>, vector<1x3x128xf32>
    %38 = vector.shape_cast %37 : vector<1x3x128xf32> to vector<3x128xf32>
    %cst_45 = arith.constant dense<0.000000e+00> : vector<256x128xf32>
    %39 = tpu.matmul %36, %38, %cst_45 {dimension_numbers = #tpu.dot_dimension_numbers<[1], [0], [0], [1], [0, 0, 1, 1], [], []>} : vector<256x3xf32>, vector<3x128xf32>, vector<256x128xf32> -> vector<256x128xf32>
    %40 = arith.addf %34, %39 : vector<256x128xf32>
    %c2_46 = arith.constant 2 : index
    %c0_47 = arith.constant 0 : index
    %c0_48 = arith.constant 0 : index
    %41 = vector.load %arg6[%c2_46, %c0_47, %c0_48] : memref<18x18x3xf32, #tpu.memory_space<vmem>>, vector<16x16x3xf32>
    %42 = vector.shape_cast %41 : vector<16x16x3xf32> to vector<256x3xf32>
    %c6 = arith.constant 6 : index
    %c0_49 = arith.constant 0 : index
    %c0_50 = arith.constant 0 : index
    %43 = vector.load %arg1[%c6, %c0_49, %c0_50] : memref<9x3x128xf32, #tpu.memory_space<vmem>>, vector<1x3x128xf32>
    %44 = vector.shape_cast %43 : vector<1x3x128xf32> to vector<3x128xf32>
    %cst_51 = arith.constant dense<0.000000e+00> : vector<256x128xf32>
    %45 = tpu.matmul %42, %44, %cst_51 {dimension_numbers = #tpu.dot_dimension_numbers<[1], [0], [0], [1], [0, 0, 1, 1], [], []>} : vector<256x3xf32>, vector<3x128xf32>, vector<256x128xf32> -> vector<256x128xf32>
    %46 = arith.addf %40, %45 : vector<256x128xf32>
    %c2_52 = arith.constant 2 : index
    %c1_53 = arith.constant 1 : index
    %c0_54 = arith.constant 0 : index
    %47 = vector.load %arg6[%c2_52, %c1_53, %c0_54] : memref<18x18x3xf32, #tpu.memory_space<vmem>>, vector<16x16x3xf32>
    %48 = vector.shape_cast %47 : vector<16x16x3xf32> to vector<256x3xf32>
    %c7 = arith.constant 7 : index
    %c0_55 = arith.constant 0 : index
    %c0_56 = arith.constant 0 : index
    %49 = vector.load %arg1[%c7, %c0_55, %c0_56] : memref<9x3x128xf32, #tpu.memory_space<vmem>>, vector<1x3x128xf32>
    %50 = vector.shape_cast %49 : vector<1x3x128xf32> to vector<3x128xf32>
    %cst_57 = arith.constant dense<0.000000e+00> : vector<256x128xf32>
    %51 = tpu.matmul %48, %50, %cst_57 {dimension_numbers = #tpu.dot_dimension_numbers<[1], [0], [0], [1], [0, 0, 1, 1], [], []>} : vector<256x3xf32>, vector<3x128xf32>, vector<256x128xf32> -> vector<256x128xf32>
    %52 = arith.addf %46, %51 : vector<256x128xf32>
    %c2_58 = arith.constant 2 : index
    %c2_59 = arith.constant 2 : index
    %c0_60 = arith.constant 0 : index
    %53 = vector.load %arg6[%c2_58, %c2_59, %c0_60] : memref<18x18x3xf32, #tpu.memory_space<vmem>>, vector<16x16x3xf32>
    %54 = vector.shape_cast %53 : vector<16x16x3xf32> to vector<256x3xf32>
    %c8 = arith.constant 8 : index
    %c0_61 = arith.constant 0 : index
    %c0_62 = arith.constant 0 : index
    %55 = vector.load %arg1[%c8, %c0_61, %c0_62] : memref<9x3x128xf32, #tpu.memory_space<vmem>>, vector<1x3x128xf32>
    %56 = vector.shape_cast %55 : vector<1x3x128xf32> to vector<3x128xf32>
    %cst_63 = arith.constant dense<0.000000e+00> : vector<256x128xf32>
    %57 = tpu.matmul %54, %56, %cst_63 {dimension_numbers = #tpu.dot_dimension_numbers<[1], [0], [0], [1], [0, 0, 1, 1], [], []>} : vector<256x3xf32>, vector<3x128xf32>, vector<256x128xf32> -> vector<256x128xf32>
    %58 = arith.addf %52, %57 : vector<256x128xf32>
    %c0_64 = arith.constant 0 : index
    %c0_65 = arith.constant 0 : index
    %59 = vector.load %arg2[%c0_64, %c0_65] : memref<1x128xf32, #tpu.memory_space<vmem>>, vector<1x128xf32>
    %60 = vector.broadcast %59 : vector<1x128xf32> to vector<256x128xf32>
    %61 = arith.addf %58, %60 : vector<256x128xf32>
    %cst_66 = arith.constant 0.000000e+00 : f32
    %62 = vector.broadcast %cst_66 : f32 to vector<256x128xf32>
    %63 = arith.maximumf %61, %62 : vector<256x128xf32>
    %64 = vector.shape_cast %63 : vector<256x128xf32> to vector<16x16x128xf32>
    %65 = vector.shape_cast %64 : vector<16x16x128xf32> to vector<8x2x16x128xf32>
    %cst_67 = arith.constant dense<0xFF800000> : vector<8x16x128xf32>
    %66 = vector.multi_reduction <maximumf>, %65, %cst_67 [1] : vector<8x2x16x128xf32> to vector<8x16x128xf32>
    %67 = vector.shape_cast %66 : vector<8x16x128xf32> to vector<8x8x2x128xf32>
    %cst_68 = arith.constant dense<0xFF800000> : vector<8x8x128xf32>
    %68 = vector.multi_reduction <maximumf>, %67, %cst_68 [2] : vector<8x8x2x128xf32> to vector<8x8x128xf32>
    %cst_69 = arith.constant 0.000000e+00 : f32
    %69 = vector.broadcast %cst_69 : f32 to vector<10x10x128xf32>
    %c0_70 = arith.constant 0 : index
    %c0_71 = arith.constant 0 : index
    %c0_72 = arith.constant 0 : index
    %70 = vector.load %arg7[%c0_70, %c0_71, %c0_72] : memref<10x10x128xf32, #tpu.memory_space<vmem>>, vector<10x10x128xf32>
    tpu.vector_store %arg7[%c0_70, %c0_71, %c0_72], %69 {strides = array<i32>} : memref<10x10x128xf32, #tpu.memory_space<vmem>>, vector<10x10x128xf32>,
    %c1_73 = arith.constant 1 : index
    %c1_74 = arith.constant 1 : index
    %c0_75 = arith.constant 0 : index
    %71 = vector.load %arg7[%c1_73, %c1_74, %c0_75] : memref<10x10x128xf32, #tpu.memory_space<vmem>>, vector<8x8x128xf32>
    tpu.vector_store %arg7[%c1_73, %c1_74, %c0_75], %68 {strides = array<i32>} : memref<10x10x128xf32, #tpu.memory_space<vmem>>, vector<8x8x128xf32>,
    %c0_76 = arith.constant 0 : index
    %c0_77 = arith.constant 0 : index
    %c0_78 = arith.constant 0 : index
    %72 = vector.load %arg7[%c0_76, %c0_77, %c0_78] : memref<10x10x128xf32, #tpu.memory_space<vmem>>, vector<8x8x128xf32>
    %73 = vector.shape_cast %72 : vector<8x8x128xf32> to vector<64x128xf32>
    %c0_79 = arith.constant 0 : index
    %c1_80 = arith.constant 1 : index
    %c0_81 = arith.constant 0 : index
    %74 = vector.load %arg7[%c0_79, %c1_80, %c0_81] : memref<10x10x128xf32, #tpu.memory_space<vmem>>, vector<8x8x128xf32>
    %75 = vector.shape_cast %74 : vector<8x8x128xf32> to vector<64x128xf32>
    %c0_82 = arith.constant 0 : index
    %c2_83 = arith.constant 2 : index
    %c0_84 = arith.constant 0 : index
    %76 = vector.load %arg7[%c0_82, %c2_83, %c0_84] : memref<10x10x128xf32, #tpu.memory_space<vmem>>, vector<8x8x128xf32>
    %77 = vector.shape_cast %76 : vector<8x8x128xf32> to vector<64x128xf32>
    %c1_85 = arith.constant 1 : index
    %c0_86 = arith.constant 0 : index
    %c0_87 = arith.constant 0 : index
    %78 = vector.load %arg7[%c1_85, %c0_86, %c0_87] : memref<10x10x128xf32, #tpu.memory_space<vmem>>, vector<8x8x128xf32>
    %79 = vector.shape_cast %78 : vector<8x8x128xf32> to vector<64x128xf32>
    %c1_88 = arith.constant 1 : index
    %c1_89 = arith.constant 1 : index
    %c0_90 = arith.constant 0 : index
    %80 = vector.load %arg7[%c1_88, %c1_89, %c0_90] : memref<10x10x128xf32, #tpu.memory_space<vmem>>, vector<8x8x128xf32>
    %81 = vector.shape_cast %80 : vector<8x8x128xf32> to vector<64x128xf32>
    %c1_91 = arith.constant 1 : index
    %c2_92 = arith.constant 2 : index
    %c0_93 = arith.constant 0 : index
    %82 = vector.load %arg7[%c1_91, %c2_92, %c0_93] : memref<10x10x128xf32, #tpu.memory_space<vmem>>, vector<8x8x128xf32>
    %83 = vector.shape_cast %82 : vector<8x8x128xf32> to vector<64x128xf32>
    %c2_94 = arith.constant 2 : index
    %c0_95 = arith.constant 0 : index
    %c0_96 = arith.constant 0 : index
    %84 = vector.load %arg7[%c2_94, %c0_95, %c0_96] : memref<10x10x128xf32, #tpu.memory_space<vmem>>, vector<8x8x128xf32>
    %85 = vector.shape_cast %84 : vector<8x8x128xf32> to vector<64x128xf32>
    %c2_97 = arith.constant 2 : index
    %c1_98 = arith.constant 1 : index
    %c0_99 = arith.constant 0 : index
    %86 = vector.load %arg7[%c2_97, %c1_98, %c0_99] : memref<10x10x128xf32, #tpu.memory_space<vmem>>, vector<8x8x128xf32>
    %87 = vector.shape_cast %86 : vector<8x8x128xf32> to vector<64x128xf32>
    %c2_100 = arith.constant 2 : index
    %c2_101 = arith.constant 2 : index
    %c0_102 = arith.constant 0 : index
    %88 = vector.load %arg7[%c2_100, %c2_101, %c0_102] : memref<10x10x128xf32, #tpu.memory_space<vmem>>, vector<8x8x128xf32>
    %89 = vector.shape_cast %88 : vector<8x8x128xf32> to vector<64x128xf32>
    %90 = tpu.concatenate %73, %75, %77, %79, %81, %83, %85, %87, %89 in 1 : vector<64x128xf32>, vector<64x128xf32>, vector<64x128xf32>, vector<64x128xf32>, vector<64x128xf32>, vector<64x128xf32>, vector<64x128xf32>, vector<64x128xf32>, vector<64x128xf32> -> vector<64x1152xf32>
    %c0_103 = arith.constant 0 : index
    %c0_104 = arith.constant 0 : index
    %91 = vector.load %arg3[%c0_103, %c0_104] : memref<1152x128xf32, #tpu.memory_space<vmem>>, vector<1152x128xf32>
    %cst_105 = arith.constant dense<0.000000e+00> : vector<64x128xf32>
    %92 = tpu.matmul %90, %91, %cst_105 {dimension_numbers = #tpu.dot_dimension_numbers<[1], [0], [0], [1], [0, 0, 1, 1], [], []>} : vector<64x1152xf32>, vector<1152x128xf32>, vector<64x128xf32> -> vector<64x128xf32>
    %c0_106 = arith.constant 0 : index
    %c0_107 = arith.constant 0 : index
    %93 = vector.load %arg4[%c0_106, %c0_107] : memref<1x128xf32, #tpu.memory_space<vmem>>, vector<1x128xf32>
    %94 = vector.broadcast %93 : vector<1x128xf32> to vector<64x128xf32>
    %95 = arith.addf %92, %94 : vector<64x128xf32>
    %cst_108 = arith.constant 0.000000e+00 : f32
    %96 = vector.broadcast %cst_108 : f32 to vector<64x128xf32>
    %97 = arith.maximumf %95, %96 : vector<64x128xf32>
    %98 = vector.shape_cast %97 : vector<64x128xf32> to vector<8x8x128xf32>
    %c0_109 = arith.constant 0 : index
    %c0_110 = arith.constant 0 : index
    %c0_111 = arith.constant 0 : index
    %99 = vector.load %arg5[%c0_109, %c0_110, %c0_111] : memref<8x8x128xf32, #tpu.memory_space<vmem>>, vector<8x8x128xf32>
    tpu.vector_store %arg5[%c0_109, %c0_110, %c0_111], %98 {strides = array<i32>} : memref<8x8x128xf32, #tpu.memory_space<vmem>>, vector<8x8x128xf32>,
    return
  }
}

</mosaic_0001>

<bundles_post_ra>
// kernel: tpu_custom_call.1
= control target key start
LH: loop header
LB: loop body
LE: loop exit
PB: predicated region body
PF: predicated region fallthrough
CT: control target
= control target key end

     0   :  { %10 = vsyncpa [#allocation5], 0  ;;  %s6206_s0 = inlined_call_operand.vmem [shape: f32[16,16,3], index: 0, kind: input, shape index: {}]   ;;  %s6207_s1 = inlined_call_operand.vmem [shape: f32[9,3,128], index: 1, kind: input, shape index: {}]   ;;  %s6208_s2 = inlined_call_operand.vmem [shape: f32[1,128], index: 2, kind: input, shape index: {}]   ;;  %s6209_s3 = inlined_call_operand.hbm [shape: f32[1152,128], index: 3, kind: input, shape index: {}]   ;;  %s6210_s4 = inlined_call_operand.vmem [shape: f32[1,128], index: 4, kind: input, shape index: {}]   ;;  %s6211_s5 = inlined_call_operand.hbm [shape: f32[8,8,128], index: 5, kind: output, shape index: {}]  }
   0x1   :  { %11 = vsyncpa [#allocation6], 0  ;;  %s22_s20 = sshll.u32 %s6209_s3, 4  ;;  %s4407_s21 = smov [#allocation4]   ;;  %s23_s20 = int_to_ptr.hbm [resolvable:$true] %s22_s20 }
   0x2   :  { %s24_s22 = sshll.u32 %s4407_s21, 4  ;;  %s4408_s23 = smov 128   ;;  %s25_s22 = int_to_ptr.vmem [resolvable:$true] %s24_s22 }
   0x3   :  { %s4409_s24 = smov 8  }
   0x4   :  { %30 = dma.hbm_to_vmem [thread:$0]  %s23_s20, 18432, %s25_s22, [#allocation5], %s4408_s23, %s4408_s23, %s4409_s24  }
   0x5   :  { %4403 = dma.done.wait [#allocation5], 18432  }
   0x6   :  { %4404 = vsyncadd [#allocation5], 4294948864  ;;  %vm37_vm0 = vcmask 23552   ;;  %v4410_v0 = vmov 0.0   ;;  %vm321_vm1 = vcmask 1042432   ;;  %v117_v4 = vld [vmem:[%s6206_s0 + $0xc0] sm:$0xff] }
   0x7   :  { %38 = vst.msk [vmem:[#allocation2] sm:$0xff] %vm37_vm0, %v4410_v0  ;;  %v4031_v1 = vld [vmem:[%s6207_s1 + $0x4] sm:$0x7]  ;;  %v4166_v3 = vld [vmem:[%s6207_s1 + $0x10] sm:$0x7]  ;;  %vm40_vm2 = vcmask 17408  }
   0x8   :  { %39 = vst.msk [vmem:[#allocation2 + $0x8] sm:$0xff] %vm37_vm0, %v4410_v0  ;;  %4032 = vmatpush.msk.msra.mxu0 %vm321_vm1, %v4031_v1  ;;  %4336 = vmatpush.msk.msra.mxu1 %vm321_vm1, %v4031_v1  ;;  %v119_v5 = vld [vmem:[%s6206_s0 + $0xd0] sm:$0xff]  ;;  %v190_v6 = vld [vmem:[%s6207_s1] sm:$0x7]  ;;  %v4098_v7 = vld [vmem:[%s6207_s1 + $0x8] sm:$0x7] }
   0x9   :  { %42 = vst.msk [vmem:[#allocation2 + $0x18] sm:$0xff] %vm37_vm0, %v4410_v0  ;;  %4337 = vmatpush.msk.msra.mxu2 %vm321_vm1, %v4031_v1  ;;  %4338 = vmatpush.msk.msra.mxu3 %vm321_vm1, %v4031_v1  ;;  %v4132_v9 = vld [vmem:[%s6207_s1 + $0xc] sm:$0x7]  ;;  %v121_v12 = vld [vmem:[%s6206_s0 + $0xe0] sm:$0xff]  ;;  %v120_v14 = vld [vmem:[%s6206_s0 + $0xd8] sm:$0xff]  ;;  %vm2793_vm3 = vcmask 1041408  }
   0xa   :  { %43 = vst.msk [vmem:[#allocation2 + $0x20] sm:$0xff] %vm37_vm0, %v4410_v0  ;;  %4167 = vmatpush.msk.msrb.mxu0 %vm321_vm1, %v4166_v3  ;;  %4065 = vmatpush.msk.msrb.mxu1 %vm321_vm1, %v190_v6  ;;  %v118_v13 = vld [vmem:[%s6206_s0 + $0xc8] sm:$0xff]  ;;  %v93_v15 = vld [vmem:[%s6206_s0] sm:$0xff]  ;;  %v95_v18 = vld [vmem:[%s6206_s0 + $0x10] sm:$0xff]  ;;  %vm3326_vm4 = vcmask 1041409   ;;  %vm3328_vm5 = vcmask 1042434  }
   0xb   :  { %45 = vst.msk [vmem:[#allocation2 + $0x30] sm:$0xff] %vm37_vm0, %v4410_v0  ;;  %4099 = vmatpush.msk.msrb.mxu2 %vm321_vm1, %v4098_v7  ;;  %4133 = vmatpush.msk.msrb.mxu3 %vm321_vm1, %v4132_v9  ;;  %v122_v16 = vld [vmem:[%s6206_s0 + $0xe8] sm:$0xff]  ;;  %v96_v19 = vld [vmem:[%s6206_s0 + $0x18] sm:$0xff]  ;;  %v97_v20 = vld [vmem:[%s6206_s0 + $0x20] sm:$0xff]  ;;  %vm3330_vm6 = vcmask 1043459   ;;  %vm3332_vm7 = vcmask 1044484  }
   0xc   :  { %46 = vst.msk [vmem:[#allocation2 + $0x38] sm:$0xff] %vm37_vm0, %v4410_v0  ;;  %v94_v17 = vld [vmem:[%s6206_s0 + $0x8] sm:$0xff]  ;;  %v99_v32 = vld [vmem:[%s6206_s0 + $0x30] sm:$0xff]  ;;  %v100_v36 = vld [vmem:[%s6206_s0 + $0x38] sm:$0xff]  ;;  %vm3334_vm8 = vcmask 1045509   ;;  %vm3336_vm9 = vcmask 1046534  }
   0xd   :  { %48 = vst.msk [vmem:[#allocation2 + $0x48] sm:$0xff] %vm37_vm0, %v4410_v0  ;;  %v98_v27 = vld [vmem:[%s6206_s0 + $0x28] sm:$0xff]  ;;  %v101_v40 = vld [vmem:[%s6206_s0 + $0x40] sm:$0xff]  ;;  %v103_v48 = vld [vmem:[%s6206_s0 + $0x50] sm:$0xff]  ;;  %vm3338_vm10 = vcmask 1047559   ;;  %s4018_s17 = sshll.u32 %s6211_s5, 4  ;;  %s4019_s17 = int_to_ptr.hbm [resolvable:$true] %s4018_s17 }
   0xe   :  { %49 = vst.msk [vmem:[#allocation2 + $0x50] sm:$0xff] %vm37_vm0, %v4410_v0  ;;  %v158_v26 = vld [vmem:[#allocation2] sm:$0xff]  ;;  %v102_v44 = vld [vmem:[%s6206_s0 + $0x48] sm:$0xff]  ;;  %v104_v52 = vld [vmem:[%s6206_s0 + $0x58] sm:$0xff] }
   0xf   :  { %v191_v2 = vld [vmem:[#allocation2 + $0x1] sm:$0xff]  ;;  %51 = vst.msk [vmem:[#allocation2 + $0x60] sm:$0xff] %vm37_vm0, %v4410_v0 }
  0x10   :  { %4033 = vmatmul.msk.f32.vlgmr.msra.gmra.mxu0 %vm37_vm0, %v191_v2  ;;  %52 = vst.msk [vmem:[#allocation2 + $0x68] sm:$0xff] %vm37_vm0, %v4410_v0  ;;  %v650_v28 = vld [vmem:[#allocation2 + $0x2] sm:$0xff] }
  0x11   :  { %54 = vst.msk [vmem:[#allocation2 + $0x78] sm:$0xff] %vm37_vm0, %v4410_v0  ;;  %v159_v31 = vld [vmem:[#allocation2 + $0x8] sm:$0xff]  ;;  %v105_v56 = vld [vmem:[%s6206_s0 + $0x60] sm:$0xff] }
  0x12   :  { %55 = vst.msk [vmem:[#allocation2 + $0x80] sm:$0xff] %vm37_vm0, %v4410_v0  ;;  %v106_v60 = vld [vmem:[%s6206_s0 + $0x68] sm:$0xff] }
  0x13   :  { %57 = vst.msk [vmem:[#allocation2 + $0x90] sm:$0xff] %vm37_vm0, %v4410_v0 }
  0x14   :  { %58 = vst.msk [vmem:[#allocation2 + $0x98] sm:$0xff] %vm37_vm0, %v4410_v0 }
  0x15   :  { %60 = vst.msk [vmem:[#allocation2 + $0xa8] sm:$0xff] %vm37_vm0, %v4410_v0 }
  0x16   :  { %61 = vst.msk [vmem:[#allocation2 + $0xb0] sm:$0xff] %vm37_vm0, %v4410_v0 }
  0x17   :  { %63 = vst.msk [vmem:[#allocation2 + $0xc0] sm:$0xff] %vm37_vm0, %v4410_v0 }
  0x18   :  { %64 = vst.msk [vmem:[#allocation2 + $0xc8] sm:$0xff] %vm37_vm0, %v4410_v0 }
  0x19   :  { %66 = vst.msk [vmem:[#allocation2 + $0xd8] sm:$0xff] %vm37_vm0, %v4410_v0 }
  0x1a   :  { %67 = vst.msk [vmem:[#allocation2 + $0xe0] sm:$0xff] %vm37_vm0, %v4410_v0 }
  0x1b   :  { %69 = vst.msk [vmem:[#allocation2 + $0xf0] sm:$0xff] %vm37_vm0, %v4410_v0 }
  0x1c   :  { %70 = vst.msk [vmem:[#allocation2 + $0xf8] sm:$0xff] %vm37_vm0, %v4410_v0 }
  0x1d   :  { %72 = vst.msk [vmem:[#allocation2 + $0x108] sm:$0xff] %vm37_vm0, %v4410_v0 }
  0x1e   :  { %73 = vst.msk [vmem:[#allocation2 + $0x110] sm:$0xff] %vm37_vm0, %v4410_v0 }
  0x1f   :  { %75 = vst.msk [vmem:[#allocation2 + $0x120] sm:$0xff] %vm37_vm0, %v4410_v0 }
  0x20   :  { %76 = vst.msk [vmem:[#allocation2 + $0x128] sm:$0xff] %vm37_vm0, %v4410_v0 }
  0x21   :  { %78 = vst.msk [vmem:[#allocation2 + $0x138] sm:$0xff] %vm37_vm0, %v4410_v0 }
  0x22   :  { %79 = vst.msk [vmem:[#allocation2 + $0x140] sm:$0xff] %vm37_vm0, %v4410_v0 }
  0x23   :  { %81 = vst.msk [vmem:[#allocation2 + $0x150] sm:$0xff] %vm37_vm0, %v4410_v0 }
  0x24   :  { %82 = vst.msk [vmem:[#allocation2 + $0x158] sm:$0xff] %vm37_vm0, %v4410_v0 }
  0x25   :  { %84 = vst.msk [vmem:[#allocation2 + $0x168] sm:$0xff] %vm37_vm0, %v4410_v0 }
  0x26   :  { %85 = vst.msk [vmem:[#allocation2 + $0x170] sm:$0xff] %vm37_vm0, %v4410_v0 }
  0x27   :  { %87 = vst.msk [vmem:[#allocation2 + $0x180] sm:$0xff] %vm37_vm0, %v4410_v0 }
  0x28   :  { %88 = vst.msk [vmem:[#allocation2 + $0x188] sm:$0xff] %vm37_vm0, %v4410_v0 }
  0x29   :  { %90 = vst.msk [vmem:[#allocation2 + $0x198] sm:$0xff] %vm37_vm0, %v4410_v0 }
  0x2a   :  { %91 = vst.msk [vmem:[#allocation2 + $0x1a0] sm:$0xff] %vm37_vm0, %v4410_v0 }
  0x2b   :  { %3242 = vst [vmem:[#allocation3] sm:$0xff] %v4410_v0 }
  0x2c   :  { %3243 = vst [vmem:[#allocation3 + $0x8] sm:$0x3] %v4410_v0 }
  0x2d   :  { %3244 = vst [vmem:[#allocation3 + $0x10] sm:$0xff] %v4410_v0 }
  0x2e   :  { %3245 = vst [vmem:[#allocation3 + $0x18] sm:$0x3] %v4410_v0 }
  0x2f   :  { %3246 = vst [vmem:[#allocation3 + $0x20] sm:$0xff] %v4410_v0 }
  0x30   :  { %3247 = vst [vmem:[#allocation3 + $0x28] sm:$0x3] %v4410_v0 }
  0x31   :  { %3248 = vst [vmem:[#allocation3 + $0x30] sm:$0xff] %v4410_v0 }
  0x32   :  { %3249 = vst [vmem:[#allocation3 + $0x38] sm:$0x3] %v4410_v0 }
  0x33   :  { %3250 = vst [vmem:[#allocation3 + $0x40] sm:$0xff] %v4410_v0 }
  0x34   :  { %3251 = vst [vmem:[#allocation3 + $0x48] sm:$0x3] %v4410_v0 }
  0x35   :  { %3252 = vst [vmem:[#allocation3 + $0x50] sm:$0xff] %v4410_v0 }
  0x36   :  { %3253 = vst [vmem:[#allocation3 + $0x58] sm:$0x3] %v4410_v0 }
  0x37   :  { %3254 = vst [vmem:[#allocation3 + $0x60] sm:$0xff] %v4410_v0 }
  0x38   :  { %3255 = vst [vmem:[#allocation3 + $0x68] sm:$0x3] %v4410_v0 }
  0x39   :  { %3256 = vst [vmem:[#allocation3 + $0x70] sm:$0xff] %v4410_v0 }
  0x3a   :  { %3257 = vst [vmem:[#allocation3 + $0x78] sm:$0x3] %v4410_v0 }
  0x3b   :  { %3258 = vst [vmem:[#allocation3 + $0x80] sm:$0xff] %v4410_v0 }
  0x3c   :  { %3259 = vst [vmem:[#allocation3 + $0x88] sm:$0x3] %v4410_v0 }
  0x3d   :  { %3260 = vst [vmem:[#allocation3 + $0x90] sm:$0xff] %v4410_v0 }
  0x3e   :  { %3261 = vst [vmem:[#allocation3 + $0x98] sm:$0x3] %v4410_v0 }
  0x3f   :  { %150 = vst.msk [vmem:[#allocation2 + $0x139] sm:$0xff] %vm37_vm0, %v117_v4  ;;  %v108_v4 = vld [vmem:[%s6206_s0 + $0x78] sm:$0xff] }
  0x40   :  { %152 = vst.msk [vmem:[#allocation2 + $0x151] sm:$0xff] %vm37_vm0, %v119_v5 }
  0x41   :  { %41 = vst.msk [vmem:[#allocation2 + $0x10] sm:$0x3] %vm40_vm2, %v4410_v0 }
  0x42   :  { %44 = vst.msk [vmem:[#allocation2 + $0x28] sm:$0x3] %vm40_vm2, %v4410_v0 }
  0x43   :  { %47 = vst.msk [vmem:[#allocation2 + $0x40] sm:$0x3] %vm40_vm2, %v4410_v0 }
  0x44   :  { %50 = vst.msk [vmem:[#allocation2 + $0x58] sm:$0x3] %vm40_vm2, %v4410_v0 }
  0x45   :  { %53 = vst.msk [vmem:[#allocation2 + $0x70] sm:$0x3] %vm40_vm2, %v4410_v0 }
  0x46   :  { %v217_v8 = vld [vmem:[#allocation2 + $0x139] sm:$0xff]  ;;  %56 = vst.msk [vmem:[#allocation2 + $0x88] sm:$0x3] %vm40_vm2, %v4410_v0 }
  0x47   :  { %4059 = vmatmul.msk.f32.vlgmr.msra.gmra.mxu1 %vm37_vm0, %v217_v8  ;;  %v219_v10 = vld [vmem:[#allocation2 + $0x151] sm:$0xff]  ;;  %59 = vst.msk [vmem:[#allocation2 + $0xa0] sm:$0x3] %vm40_vm2, %v4410_v0  ;;  %v109_v8 = vld [vmem:[%s6206_s0 + $0x80] sm:$0xff] }
  0x48   :  { %4061 = vmatmul.msk.f32.vlgmr.msra.gmra.mxu2 %vm37_vm0, %v219_v10  ;;  %v192_v11 = vld [vmem:[#allocation2 + $0x9] sm:$0xff]  ;;  %62 = vst.msk [vmem:[#allocation2 + $0xb8] sm:$0x3] %vm40_vm2, %v4410_v0 }
  0x49   :  { %4034 = vmatmul.msk.f32.gmra.mxu0 %vm37_vm0, %v192_v11  ;;  %65 = vst.msk [vmem:[#allocation2 + $0xd0] sm:$0x3] %vm40_vm2, %v4410_v0  ;;  %v651_v33 = vld [vmem:[#allocation2 + $0xa] sm:$0xff] }
  0x4a   :  { %68 = vst.msk [vmem:[#allocation2 + $0xe8] sm:$0x3] %vm40_vm2, %v4410_v0 }
  0x4b   :  { %71 = vst.msk [vmem:[#allocation2 + $0x100] sm:$0x3] %vm40_vm2, %v4410_v0 }
  0x4c   :  { %74 = vst.msk [vmem:[#allocation2 + $0x118] sm:$0x3] %vm40_vm2, %v4410_v0 }
  0x4d   :  { %77 = vst.msk [vmem:[#allocation2 + $0x130] sm:$0x3] %vm40_vm2, %v4410_v0 }
  0x4e   :  { %80 = vst.msk [vmem:[#allocation2 + $0x148] sm:$0x3] %vm40_vm2, %v4410_v0 }
  0x4f   :  { %83 = vst.msk [vmem:[#allocation2 + $0x160] sm:$0x3] %vm40_vm2, %v4410_v0 }
  0x50   :  { %86 = vst.msk [vmem:[#allocation2 + $0x178] sm:$0x3] %vm40_vm2, %v4410_v0 }
  0x51   :  { %89 = vst.msk [vmem:[#allocation2 + $0x190] sm:$0x3] %vm40_vm2, %v4410_v0 }
  0x52   :  { %92 = vst.msk [vmem:[#allocation2 + $0x1a8] sm:$0x3] %vm40_vm2, %v4410_v0  ;;  %v107_v0 = vld [vmem:[%s6206_s0 + $0x70] sm:$0xff] }
  0x53   :  { %154 = vst.msk [vmem:[#allocation2 + $0x169] sm:$0xff] %vm37_vm0, %v121_v12  ;;  %v110_v12 = vld [vmem:[%s6206_s0 + $0x88] sm:$0xff] }
  0x54   :  { %151 = vst.msk [vmem:[#allocation2 + $0x141] sm:$0xff] %vm37_vm0, %v118_v13 }
  0x55   :  { %153 = vst.msk [vmem:[#allocation2 + $0x159] sm:$0xff] %vm37_vm0, %v120_v14 }
  0x56   :  { %126 = vst.msk [vmem:[#allocation2 + $0x19] sm:$0xff] %vm37_vm0, %v93_v15 }
  0x57   :  { %155 = vst.msk [vmem:[#allocation2 + $0x171] sm:$0xff] %vm37_vm0, %v122_v16 }
  0x58   :  { %127 = vst.msk [vmem:[#allocation2 + $0x21] sm:$0xff] %vm37_vm0, %v94_v17  ;;  %v111_v17 = vld [vmem:[%s6206_s0 + $0x90] sm:$0xff] }
  0x59   :  { %128 = vst.msk [vmem:[#allocation2 + $0x31] sm:$0xff] %vm37_vm0, %v95_v18 }
  0x5a   :  { %v221_v21 = vld [vmem:[#allocation2 + $0x169] sm:$0xff]  ;;  %129 = vst.msk [vmem:[#allocation2 + $0x39] sm:$0xff] %vm37_vm0, %v96_v19 }
  0x5b   :  { %4063 = vmatmul.msk.f32.vlgmr.msra.gmra.mxu3 %vm37_vm0, %v221_v21  ;;  %v218_v22 = vld [vmem:[#allocation2 + $0x141] sm:$0xff]  ;;  %130 = vst.msk [vmem:[#allocation2 + $0x49] sm:$0xff] %vm37_vm0, %v97_v20 }
  0x5c   :  { %4060 = vmatmul.msk.f32.gmra.mxu1 %vm37_vm0, %v218_v22  ;;  %v220_v23 = vld [vmem:[#allocation2 + $0x159] sm:$0xff]  ;;  %131 = vst.msk [vmem:[#allocation2 + $0x51] sm:$0xff] %vm37_vm0, %v98_v27 }
  0x5d   :  { %4062 = vmatmul.msk.f32.gmra.mxu2 %vm37_vm0, %v220_v23  ;;  %v4650_v24 = vld [vmem:[#allocation2 + $0x19] sm:$0xff]  ;;  %132 = vst.msk [vmem:[#allocation2 + $0x61] sm:$0xff] %vm37_vm0, %v99_v32 }
  0x5e   :  { %4035 = vmatmul.msk.f32.gmra.mxu0 %vm37_vm0, %v4650_v24  ;;  %v222_v25 = vld [vmem:[#allocation2 + $0x171] sm:$0xff]  ;;  %133 = vst.msk [vmem:[#allocation2 + $0x69] sm:$0xff] %vm37_vm0, %v100_v36 }
  0x5f   :  { %v4659_v29 = vld [vmem:[#allocation2 + $0x21] sm:$0xff]  ;;  %v928_v30 = vld [vmem:[#allocation2 + $0x18] sm:$0xff]  ;;  %134 = vst.msk [vmem:[#allocation2 + $0x79] sm:$0xff] %vm37_vm0, %v101_v40 }
  0x60   :  { %v4670_v34 = vld [vmem:[#allocation2 + $0x31] sm:$0xff]  ;;  %v929_v35 = vld [vmem:[#allocation2 + $0x20] sm:$0xff]  ;;  %135 = vst.msk [vmem:[#allocation2 + $0x81] sm:$0xff] %vm37_vm0, %v102_v44 }
  0x61   :  { %v4679_v37 = vld [vmem:[#allocation2 + $0x1a] sm:$0xff]  ;;  %v4690_v39 = vld [vmem:[#allocation2 + $0x30] sm:$0xff]  ;;  %v4695_v41 = vld [vmem:[#allocation2 + $0x22] sm:$0xff]  ;;  %136 = vst.msk [vmem:[#allocation2 + $0x91] sm:$0xff] %vm37_vm0, %v103_v48 }
  0x62   :  { %v4683_v38 = vld [vmem:[#allocation2 + $0x39] sm:$0xff]  ;;  %v4700_v42 = vld [vmem:[#allocation2 + $0x49] sm:$0xff]  ;;  %137 = vst.msk [vmem:[#allocation2 + $0x99] sm:$0xff] %vm37_vm0, %v104_v52 }
  0x63   :  { %4064 = vmatmul.msk.f32.gmra.mxu3 %vm37_vm0, %v222_v25  ;;  %v4707_v43 = vld [vmem:[#allocation2 + $0x38] sm:$0xff]  ;;  %v4725_v47 = vld [vmem:[#allocation2 + $0x48] sm:$0xff]  ;;  %v4743_v51 = vld [vmem:[#allocation2 + $0x50] sm:$0xff]  ;;  %138 = vst.msk [vmem:[#allocation2 + $0xa9] sm:$0xff] %vm37_vm0, %v105_v56 }
  0x64   :  { %4066 = vmatmul.msk.f32.vlgmr.msrb.gmra.mxu1 %vm37_vm0, %v158_v26  ;;  %v4712_v45 = vld [vmem:[#allocation2 + $0x32] sm:$0xff]  ;;  %v4730_v49 = vld [vmem:[#allocation2 + $0x3a] sm:$0xff]  ;;  %v4748_v53 = vld [vmem:[#allocation2 + $0x4a] sm:$0xff]  ;;  %139 = vst.msk [vmem:[#allocation2 + $0xb1] sm:$0xff] %vm37_vm0, %v106_v60 }
  0x65   :  { %4100 = vmatmul.msk.f32.vlgmr.msrb.gmra.mxu2 %vm37_vm0, %v650_v28  ;;  %v4717_v46 = vld [vmem:[#allocation2 + $0x51] sm:$0xff]  ;;  %v4735_v50 = vld [vmem:[#allocation2 + $0x61] sm:$0xff]  ;;  %v4753_v54 = vld [vmem:[#allocation2 + $0x69] sm:$0xff]  ;;  %140 = vst.msk [vmem:[#allocation2 + $0xc1] sm:$0xff] %vm37_vm0, %v107_v0 }
  0x66   :  { %4036 = vmatmul.msk.f32.gmra.mxu0 %vm37_vm0, %v4659_v29  ;;  %v4761_v55 = vld [vmem:[#allocation2 + $0x60] sm:$0xff]  ;;  %v4766_v57 = vld [vmem:[#allocation2 + $0x52] sm:$0xff]  ;;  %v4779_v59 = vld [vmem:[#allocation2 + $0x68] sm:$0xff]  ;;  %141 = vst.msk [vmem:[#allocation2 + $0xc9] sm:$0xff] %vm37_vm0, %v108_v4 }
  0x67   :  { %v4771_v58 = vld [vmem:[#allocation2 + $0x79] sm:$0xff]  ;;  %v4784_v61 = vld [vmem:[#allocation2 + $0x62] sm:$0xff]  ;;  %v4802_v1 = vld [vmem:[#allocation2 + $0x6a] sm:$0xff]  ;;  %142 = vst.msk [vmem:[#allocation2 + $0xd9] sm:$0xff] %vm37_vm0, %v109_v8 }
  0x68   :  { %v4789_v62 = vld [vmem:[#allocation2 + $0x81] sm:$0xff]  ;;  %v4797_v63 = vld [vmem:[#allocation2 + $0x78] sm:$0xff]  ;;  %v4833_v7 = vld [vmem:[#allocation2 + $0x90] sm:$0xff]  ;;  %143 = vst.msk [vmem:[#allocation2 + $0xe1] sm:$0xff] %vm37_vm0, %v110_v12 }
  0x69   :  { %v4807_v2 = vld [vmem:[#allocation2 + $0x91] sm:$0xff]  ;;  %v4815_v3 = vld [vmem:[#allocation2 + $0x80] sm:$0xff]  ;;  %144 = vst.msk [vmem:[#allocation2 + $0xf1] sm:$0xff] %vm37_vm0, %v111_v17  ;;  %v114_v52 = vld [vmem:[%s6206_s0 + $0xa8] sm:$0xff] }
  0x6a   :  { %v4820_v5 = vld [vmem:[#allocation2 + $0x7a] sm:$0xff]  ;;  %v4838_v9 = vld [vmem:[#allocation2 + $0x82] sm:$0xff]  ;;  %v4856_v13 = vld [vmem:[#allocation2 + $0x92] sm:$0xff]  ;;  %147 = vst.msk [vmem:[#allocation2 + $0x111] sm:$0xff] %vm37_vm0, %v114_v52 }
  0x6b   :  { %4134 = vmatmul.msk.f32.vlgmr.msrb.gmra.mxu3 %vm37_vm0, %v928_v30  ;;  %v4825_v6 = vld [vmem:[#allocation2 + $0x99] sm:$0xff]  ;;  %v4843_v10 = vld [vmem:[#allocation2 + $0xa9] sm:$0xff]  ;;  %v4861_v14 = vld [vmem:[#allocation2 + $0xb1] sm:$0xff] }
  0x6c   :  { %4067 = vmatmul.msk.f32.gmra.mxu1 %vm37_vm0, %v159_v31  ;;  %v4851_v11 = vld [vmem:[#allocation2 + $0x98] sm:$0xff]  ;;  %v4869_v16 = vld [vmem:[#allocation2 + $0xa8] sm:$0xff]  ;;  %v4889_v21 = vld [vmem:[#allocation2 + $0xb0] sm:$0xff] }
  0x6d   :  { %4101 = vmatmul.msk.f32.gmra.mxu2 %vm37_vm0, %v651_v33  ;;  %v4874_v18 = vld [vmem:[#allocation2 + $0x9a] sm:$0xff]  ;;  %v4894_v25 = vld [vmem:[#allocation2 + $0xaa] sm:$0xff]  ;;  %v4916_v32 = vld [vmem:[#allocation2 + $0xb2] sm:$0xff] }
  0x6e   :  { %4037 = vmatmul.msk.f32.gmra.mxu0 %vm37_vm0, %v4670_v34  ;;  %v4879_v19 = vld [vmem:[#allocation2 + $0xc1] sm:$0xff]  ;;  %v112_v23 = vld [vmem:[%s6206_s0 + $0x98] sm:$0xff]  ;;  %6247 = vst [vmem:[#allocation10_spill] sm:$0xff] %v4894_v25  ;;  %v4899_v26 = vld [vmem:[#allocation2 + $0xc9] sm:$0xff] }
  0x6f   :  { %145 = vst.msk [vmem:[#allocation2 + $0xf9] sm:$0xff] %vm37_vm0, %v112_v23  ;;  %v4909_v28 = vld [vmem:[#allocation2 + $0xc0] sm:$0xff]  ;;  %v4931_v40 = vld [vmem:[#allocation2 + $0xc8] sm:$0xff]  ;;  %v4953_v8 = vld [vmem:[#allocation2 + $0xd8] sm:$0xff] }
  0x70   :  { %6249 = vst [vmem:[#allocation12_spill] sm:$0xff] %v4909_v28  ;;  %v113_v31 = vld [vmem:[%s6206_s0 + $0xa0] sm:$0xff]  ;;  %v4958_v52 = vld [vmem:[#allocation2 + $0xca] sm:$0xff] }
  0x71   :  { %6251 = vst [vmem:[#allocation14_spill] sm:$0xff] %v4916_v32  ;;  %v4938_v56 = vld [vmem:[#allocation2 + $0xc2] sm:$0xff] }
  0x72   :  { %146 = vst.msk [vmem:[#allocation2 + $0x109] sm:$0xff] %vm37_vm0, %v113_v31  ;;  %v4943_v0 = vld [vmem:[#allocation2 + $0xe1] sm:$0xff]  ;;  %v115_v31 = vld [vmem:[%s6206_s0 + $0xb0] sm:$0xff] }
  0x73   :  { %4135 = vmatmul.msk.f32.gmra.mxu3 %vm37_vm0, %v929_v35  ;;  %6253 = vst [vmem:[#allocation16_spill] sm:$0xff] %v4931_v40 }
  0x74   :  { %4068 = vmatmul.msk.f32.gmra.mxu1 %vm37_vm0, %v928_v30  ;;  %6255 = vst [vmem:[#allocation18_spill] sm:$0xff] %v4938_v56 }
  0x75   :  { %4102 = vmatmul.msk.f32.gmra.mxu2 %vm37_vm0, %v4679_v37  ;;  %6257 = vst [vmem:[#allocation20_spill] sm:$0xff] %v4953_v8 }
  0x76   :  { %4038 = vmatmul.msk.f32.gmra.mxu0 %vm37_vm0, %v4683_v38  ;;  %6258 = vst [vmem:[#allocation21_spill] sm:$0xff] %v4958_v52 }
  0x77   :  { %148 = vst.msk [vmem:[#allocation2 + $0x121] sm:$0xff] %vm37_vm0, %v115_v31  ;;  %v4973_v31 = vld [vmem:[#allocation2 + $0xe0] sm:$0xff] }
  0x78   :  { %6260 = vst [vmem:[#allocation23_spill] sm:$0xff] %v4973_v31 }
  0x7b   :  { %4136 = vmatmul.msk.f32.gmra.mxu3 %vm37_vm0, %v4690_v39 }
  0x7c   :  { %4069 = vmatmul.msk.f32.gmra.mxu1 %vm37_vm0, %v929_v35  ;;  %v4921_v35 = vld [vmem:[#allocation2 + $0xd9] sm:$0xff] }
  0x7d   :  { %4103 = vmatmul.msk.f32.gmra.mxu2 %vm37_vm0, %v4695_v41 }
  0x7e   :  { %4039 = vmatmul.msk.f32.gmra.mxu0 %vm37_vm0, %v4700_v42 }
  0x83   :  { %4137 = vmatmul.msk.f32.gmra.mxu3 %vm37_vm0, %v4707_v43 }
  0x84   :  { %4070 = vmatmul.msk.f32.gmra.mxu1 %vm37_vm0, %v4690_v39 }
  0x85   :  { %4104 = vmatmul.msk.f32.gmra.mxu2 %vm37_vm0, %v4712_v45 }
  0x86   :  { %4040 = vmatmul.msk.f32.gmra.mxu0 %vm37_vm0, %v4717_v46 }
  0x8b   :  { %4138 = vmatmul.msk.f32.gmra.mxu3 %vm37_vm0, %v4725_v47 }
  0x8c   :  { %4071 = vmatmul.msk.f32.gmra.mxu1 %vm37_vm0, %v4707_v43 }
  0x8d   :  { %4105 = vmatmul.msk.f32.gmra.mxu2 %vm37_vm0, %v4730_v49  ;;  %v342_v15 = vpop.f32.mrf.mxu0 }
  0x8e   :  { %4041 = vmatmul.msk.f32.gmra.mxu0 %vm37_vm0, %v4735_v50 }
  0x93   :  { %4139 = vmatmul.msk.f32.gmra.mxu3 %vm37_vm0, %v4743_v51 }
  0x94   :  { %4072 = vmatmul.msk.f32.gmra.mxu1 %vm37_vm0, %v4725_v47 }
  0x95   :  { %4106 = vmatmul.msk.f32.gmra.mxu2 %vm37_vm0, %v4748_v53 }
  0x96   :  { %4042 = vmatmul.msk.f32.gmra.mxu0 %vm37_vm0, %v4753_v54 }
  0x9b   :  { %4140 = vmatmul.msk.f32.gmra.mxu3 %vm37_vm0, %v4761_v55 }
  0x9c   :  { %4073 = vmatmul.msk.f32.gmra.mxu1 %vm37_vm0, %v4743_v51 }
  0x9d   :  { %4107 = vmatmul.msk.f32.gmra.mxu2 %vm37_vm0, %v4766_v57 }
  0x9e   :  { %4043 = vmatmul.msk.f32.gmra.mxu0 %vm37_vm0, %v4771_v58 }
  0xa3   :  { %4141 = vmatmul.msk.f32.gmra.mxu3 %vm37_vm0, %v4779_v59 }
  0xa4   :  { %4074 = vmatmul.msk.f32.gmra.mxu1 %vm37_vm0, %v4761_v55 }
  0xa5   :  { %4108 = vmatmul.msk.f32.gmra.mxu2 %vm37_vm0, %v4784_v61 }
  0xa6   :  { %4044 = vmatmul.msk.f32.gmra.mxu0 %vm37_vm0, %v4789_v62 }
  0xab   :  { %4142 = vmatmul.msk.f32.gmra.mxu3 %vm37_vm0, %v4797_v63 }
  0xac   :  { %4075 = vmatmul.msk.f32.gmra.mxu1 %vm37_vm0, %v4779_v59 }
  0xad   :  { %4109 = vmatmul.msk.f32.gmra.mxu2 %vm37_vm0, %v4802_v1 }
  0xae   :  { %4045 = vmatmul.msk.f32.gmra.mxu0 %vm37_vm0, %v4807_v2 }
  0xb3   :  { %4143 = vmatmul.msk.f32.gmra.mxu3 %vm37_vm0, %v4815_v3 }
  0xb4   :  { %4076 = vmatmul.msk.f32.gmra.mxu1 %vm37_vm0, %v4797_v63 }
  0xb5   :  { %4110 = vmatmul.msk.f32.gmra.mxu2 %vm37_vm0, %v4820_v5 }
  0xb6   :  { %4046 = vmatmul.msk.f32.gmra.mxu0 %vm37_vm0, %v4825_v6 }
  0xbb   :  { %4144 = vmatmul.msk.f32.gmra.mxu3 %vm37_vm0, %v4833_v7 }
  0xbc   :  { %4077 = vmatmul.msk.f32.gmra.mxu1 %vm37_vm0, %v4815_v3 }
  0xbd   :  { %4111 = vmatmul.msk.f32.gmra.mxu2 %vm37_vm0, %v4838_v9 }
  0xbe   :  { %4047 = vmatmul.msk.f32.gmra.mxu0 %vm37_vm0, %v4843_v10 }
  0xc3   :  { %4145 = vmatmul.msk.f32.gmra.mxu3 %vm37_vm0, %v4851_v11 }
  0xc4   :  { %4078 = vmatmul.msk.f32.gmra.mxu1 %vm37_vm0, %v4833_v7  ;;  %v4887_v20 = vpop.f32.mrf.mxu1 }
  0xc5   :  { %4112 = vmatmul.msk.f32.gmra.mxu2 %vm37_vm0, %v4856_v13 }
  0xc6   :  { %4048 = vmatmul.msk.f32.gmra.mxu0 %vm37_vm0, %v4861_v14  ;;  %v345_v22 = vpop.f32.mrf.mxu0 }
  0xcb   :  { %4146 = vmatmul.msk.f32.gmra.mxu3 %vm37_vm0, %v4869_v16  ;;  %v4907_v27 = vpop.f32.mrf.mxu2 }
  0xcc   :  { %4079 = vmatmul.msk.f32.gmra.mxu1 %vm37_vm0, %v4851_v11  ;;  %6248 = vst [vmem:[#allocation11_spill] sm:$0xff] %v4907_v27  ;;  %v116_v27 = vld [vmem:[%s6206_s0 + $0xb8] sm:$0xff] }
  0xcd   :  { %4113 = vmatmul.msk.f32.gmra.mxu2 %vm37_vm0, %v4874_v18  ;;  %149 = vst.msk [vmem:[#allocation2 + $0x129] sm:$0xff] %vm37_vm0, %v116_v27  ;;  %v4234_v27 = vld [vmem:[%s6207_s1 + $0x18] sm:$0x7] }
  0xce   :  { %4049 = vmatmul.msk.f32.gmra.mxu0 %vm37_vm0, %v4879_v19  ;;  %4235 = vmatpush.msk.msra.mxu2 %vm321_vm1, %v4234_v27 }
  0xd3   :  { %4147 = vmatmul.msk.f32.gmra.mxu3 %vm37_vm0, %v4889_v21 }
  0xd4   :  { %4080 = vmatmul.msk.f32.gmra.mxu1 %vm37_vm0, %v4869_v16 }
  0xd5   :  { %4114 = vmatmul.msk.f32.gmra.mxu2 %vm37_vm0, %v4894_v25  ;;  %v5027_v25 = vld [vmem:[#allocation2 + $0xf2] sm:$0xff] }
  0xd6   :  { %4050 = vmatmul.msk.f32.gmra.mxu0 %vm37_vm0, %v4899_v26  ;;  %6268 = vst [vmem:[#allocation31_spill] sm:$0xff] %v5027_v25 }
  0xd9   :  { %v4911_v30 = vpop.f32.mrf.mxu1 }
  0xda   :  { %6250 = vst [vmem:[#allocation13_spill] sm:$0xff] %v4911_v30  ;;  %v5043_v30 = vld [vmem:[#allocation2 + $0xfa] sm:$0xff] }
  0xdb   :  { %4148 = vmatmul.msk.f32.gmra.mxu3 %vm37_vm0, %v4909_v28  ;;  %v348_v33 = vpop.f32.mrf.mxu0  ;;  %6272 = vst [vmem:[#allocation35_spill] sm:$0xff] %v5043_v30 }
  0xdc   :  { %4081 = vmatmul.msk.f32.gmra.mxu1 %vm37_vm0, %v4889_v21 }
  0xdd   :  { %4115 = vmatmul.msk.f32.gmra.mxu2 %vm37_vm0, %v4916_v32 }
  0xde   :  { %v4927_v36 = vpop.f32.mrf.mxu3  ;;  %4051 = vmatmul.msk.f32.gmra.mxu0 %vm37_vm0, %v4921_v35 }
  0xdf   :  { %6252 = vst [vmem:[#allocation15_spill] sm:$0xff] %v4927_v36 }
  0xe0   :  { %v4933_v44 = vpop.f32.mrf.mxu2 }
  0xe1   :  { %6254 = vst [vmem:[#allocation17_spill] sm:$0xff] %v4933_v44  ;;  %v554_v48 = vpop.f32.mrf.mxu1 }
  0xe2   :  { %v555_v17 = vadd.f32 %v554_v48, %v342_v15 }
  0xe3   :  { %4149 = vmatmul.msk.f32.gmra.mxu3 %vm37_vm0, %v4931_v40  ;;  %v351_v60 = vpop.f32.mrf.mxu0 }
  0xe4   :  { %4082 = vmatmul.msk.f32.gmra.mxu1 %vm37_vm0, %v4909_v28 }
  0xe5   :  { %4116 = vmatmul.msk.f32.gmra.mxu2 %vm37_vm0, %v4938_v56  ;;  %v4963_v56 = vld [vmem:[#allocation2 + $0xf1] sm:$0xff] }
  0xe6   :  { %v4949_v4 = vpop.f32.mrf.mxu3  ;;  %4052 = vmatmul.msk.f32.gmra.mxu0 %vm37_vm0, %v4943_v0 }
  0xe7   :  { %6256 = vst [vmem:[#allocation19_spill] sm:$0xff] %v4949_v4 }
  0xe8   :  { %v800_v12 = vpop.f32.mrf.mxu2 }
  0xe9   :  { %v557_v23 = vpop.f32.mrf.mxu1  ;;  %v896_v4 = vadd.f32 %v800_v12, %v555_v17 }
  0xea   :  { %v558_v48 = vadd.f32 %v557_v23, %v345_v22  ;;  %v4983_v22 = vld [vmem:[#allocation2 + $0xf9] sm:$0xff] }
  0xeb   :  { %4150 = vmatmul.msk.f32.gmra.mxu3 %vm37_vm0, %v4953_v8  ;;  %v354_v36 = vpop.f32.mrf.mxu0 }
  0xec   :  { %4083 = vmatmul.msk.f32.gmra.mxu1 %vm37_vm0, %v4931_v40  ;;  %v4978_v40 = vld [vmem:[#allocation2 + $0xda] sm:$0xff] }
  0xed   :  { %4117 = vmatmul.msk.f32.gmra.mxu2 %vm37_vm0, %v4958_v52  ;;  %6261 = vst [vmem:[#allocation24_spill] sm:$0xff] %v4978_v40 }
  0xee   :  { %v1078_v15 = vpop.f32.mrf.mxu3  ;;  %4053 = vmatmul.msk.f32.gmra.mxu0 %vm37_vm0, %v4963_v56 }
  0xef   :  { %v4971_v44 = vadd.f32 %v1078_v15, %v896_v4  ;;  %v4268_v15 = vld [vmem:[%s6207_s1 + $0x1c] sm:$0x7] }
  0xf0   :  { %v803_v32 = vpop.f32.mrf.mxu2  ;;  %4269 = vmatpush.msk.msra.mxu3 %vm321_vm1, %v4268_v15  ;;  %v4302_v15 = vld [vmem:[%s6207_s1 + $0x20] sm:$0x7] }
  0xf1   :  { %6259 = vst [vmem:[#allocation22_spill] sm:$0xff] %v4971_v44  ;;  %v897_v12 = vadd.f32 %v803_v32, %v558_v48  ;;  %v560_v17 = vpop.f32.mrf.mxu1  ;;  %v4999_v48 = vld [vmem:[#allocation2 + $0xf0] sm:$0xff]  ;;  %4303 = vmatpush.msk.msra.mxu0 %vm321_vm1, %v4302_v15 }
  0xf2   :  { %v561_v4 = vadd.f32 %v560_v17, %v348_v33  ;;  %6263 = vst [vmem:[#allocation26_spill] sm:$0xff] %v4999_v48  ;;  %v5003_v33 = vld [vmem:[#allocation2 + $0xe2] sm:$0xff] }
  0xf3   :  { %4151 = vmatmul.msk.f32.gmra.mxu3 %vm37_vm0, %v4973_v31  ;;  %v357_v52 = vpop.f32.mrf.mxu0  ;;  %6264 = vst [vmem:[#allocation27_spill] sm:$0xff] %v5003_v33  ;;  %v5007_v17 = vld [vmem:[#allocation2 + $0x109] sm:$0xff] }
  0xf4   :  { %4084 = vmatmul.msk.f32.gmra.mxu1 %vm37_vm0, %v4953_v8  ;;  %6265 = vst [vmem:[#allocation28_spill] sm:$0xff] %v5007_v17 }
  0xf5   :  { %4118 = vmatmul.msk.f32.gmra.mxu2 %vm37_vm0, %v4978_v40 }
  0xf6   :  { %v1081_v32 = vpop.f32.mrf.mxu3  ;;  %4054 = vmatmul.msk.f32.gmra.mxu0 %vm37_vm0, %v4983_v22 }
  0xf7   :  { %v4991_v23 = vadd.f32 %v1081_v32, %v897_v12  ;;  %v4200_v32 = vld [vmem:[%s6207_s1 + $0x14] sm:$0x7] }
  0xf8   :  { %v806_v44 = vpop.f32.mrf.mxu2  ;;  %4201 = vmatpush.msk.msra.mxu1 %vm321_vm1, %v4200_v32 }
  0xf9   :  { %6262 = vst [vmem:[#allocation25_spill] sm:$0xff] %v4991_v23  ;;  %v898_v40 = vadd.f32 %v806_v44, %v561_v4  ;;  %v563_v8 = vpop.f32.mrf.mxu1  ;;  %v5024_v23 = vld [vmem:[#allocation2 + $0xf8] sm:$0xff] }
  0xfa   :  { %v564_v4 = vadd.f32 %v563_v8, %v351_v60  ;;  %6267 = vst [vmem:[#allocation30_spill] sm:$0xff] %v5024_v23  ;;  %v5031_v60 = vld [vmem:[#allocation2 + $0x111] sm:$0xff] }
  0xfb   :  { %4152 = vmatmul.msk.f32.gmra.mxu3 %vm37_vm0, %v4999_v48  ;;  %v360_v12 = vpop.f32.mrf.mxu0  ;;  %6269 = vst [vmem:[#allocation32_spill] sm:$0xff] %v5031_v60 }
  0xfc   :  { %4085 = vmatmul.msk.f32.gmra.mxu1 %vm37_vm0, %v4973_v31 }
  0xfd   :  { %4119 = vmatmul.msk.f32.gmra.mxu2 %vm37_vm0, %v5003_v33 }
  0xfe   :  { %v1084_v44 = vpop.f32.mrf.mxu3  ;;  %4055 = vmatmul.msk.f32.gmra.mxu0 %vm37_vm0, %v5007_v17  ;;  %v5047_v17 = vld [vmem:[#allocation2 + $0x121] sm:$0xff] }
  0xff   :  { %v5019_v27 = vadd.f32 %v1084_v44, %v898_v40  ;;  %v5041_v44 = vld [vmem:[#allocation2 + $0x108] sm:$0xff] }
 0x100   :  { %v809_v28 = vpop.f32.mrf.mxu2  ;;  %6271 = vst [vmem:[#allocation34_spill] sm:$0xff] %v5041_v44 }
 0x101   :  { %6266 = vst [vmem:[#allocation29_spill] sm:$0xff] %v5019_v27  ;;  %v899_v31 = vadd.f32 %v809_v28, %v564_v4  ;;  %v566_v33 = vpop.f32.mrf.mxu1 }
 0x102   :  { %v567_v28 = vadd.f32 %v566_v33, %v354_v36 }
 0x103   :  { %4153 = vmatmul.msk.f32.gmra.mxu3 %vm37_vm0, %v5024_v23  ;;  %v363_v32 = vpop.f32.mrf.mxu0 }
 0x104   :  { %4086 = vmatmul.msk.f32.gmra.mxu1 %vm37_vm0, %v4999_v48 }
 0x105   :  { %4120 = vmatmul.msk.f32.gmra.mxu2 %vm37_vm0, %v5027_v25  ;;  %v5059_v25 = vld [vmem:[#allocation2 + $0x10a] sm:$0xff] }
 0x106   :  { %v1087_v40 = vpop.f32.mrf.mxu3  ;;  %4056 = vmatmul.msk.f32.gmra.mxu0 %vm37_vm0, %v5031_v60  ;;  %6275 = vst [vmem:[#allocation38_spill] sm:$0xff] %v5059_v25  ;;  %v5063_v60 = vld [vmem:[#allocation2 + $0x129] sm:$0xff] }
 0x107   :  { %v5039_v8 = vadd.f32 %v1087_v40, %v899_v31  ;;  %v5057_v40 = vld [vmem:[#allocation2 + $0x110] sm:$0xff] }
 0x108   :  { %v812_v4 = vpop.f32.mrf.mxu2  ;;  %6274 = vst [vmem:[#allocation37_spill] sm:$0xff] %v5057_v40 }
 0x109   :  { %6270 = vst [vmem:[#allocation33_spill] sm:$0xff] %v5039_v8  ;;  %v900_v15 = vadd.f32 %v812_v4, %v567_v28  ;;  %v569_v27 = vpop.f32.mrf.mxu1 }
 0x10a   :  { %v570_v31 = vadd.f32 %v569_v27, %v357_v52 }
 0x10b   :  { %4154 = vmatmul.msk.f32.gmra.mxu3 %vm37_vm0, %v5041_v44  ;;  %v366_v48 = vpop.f32.mrf.mxu0 }
 0x10c   :  { %4087 = vmatmul.msk.f32.gmra.mxu1 %vm37_vm0, %v5024_v23 }
 0x10d   :  { %4121 = vmatmul.msk.f32.gmra.mxu2 %vm37_vm0, %v5043_v30  ;;  %v5075_v30 = vld [vmem:[#allocation2 + $0x112] sm:$0xff] }
 0x10e   :  { %v1090_v36 = vpop.f32.mrf.mxu3  ;;  %4057 = vmatmul.msk.f32.gmra.mxu0 %vm37_vm0, %v5047_v17  ;;  %6277 = vst [vmem:[#allocation40_spill] sm:$0xff] %v5075_v30 }
 0x10f   :  { %v5055_v33 = vadd.f32 %v1090_v36, %v900_v15  ;;  %v5073_v36 = vld [vmem:[#allocation2 + $0x120] sm:$0xff] }
 0x110   :  { %v815_v28 = vpop.f32.mrf.mxu2 }
 0x111   :  { %6273 = vst [vmem:[#allocation36_spill] sm:$0xff] %v5055_v33  ;;  %v901_v4 = vadd.f32 %v815_v28, %v570_v31  ;;  %v572_v8 = vpop.f32.mrf.mxu1 }
 0x112   :  { %v573_v27 = vadd.f32 %v572_v8, %v360_v12 }
 0x113   :  { %4155 = vmatmul.msk.f32.gmra.mxu3 %vm37_vm0, %v5057_v40  ;;  %v369_v23 = vpop.f32.mrf.mxu0 }
 0x114   :  { %4088 = vmatmul.msk.f32.gmra.mxu1 %vm37_vm0, %v5041_v44 }
 0x115   :  { %4122 = vmatmul.msk.f32.gmra.mxu2 %vm37_vm0, %v5059_v25  ;;  %v5089_v25 = vld [vmem:[#allocation2 + $0x122] sm:$0xff] }
 0x116   :  { %v1093_v52 = vpop.f32.mrf.mxu3  ;;  %4058 = vmatmul.msk.f32.gmra.mxu0 %vm37_vm0, %v5063_v60  ;;  %6280 = vst [vmem:[#allocation43_spill] sm:$0xff] %v5089_v25 }
 0x117   :  { %v5071_v15 = vadd.f32 %v1093_v52, %v901_v4  ;;  %v5087_v52 = vld [vmem:[#allocation2 + $0x128] sm:$0xff] }
 0x118   :  { %v818_v31 = vpop.f32.mrf.mxu2  ;;  %6279 = vst [vmem:[#allocation42_spill] sm:$0xff] %v5087_v52 }
 0x119   :  { %6276 = vst [vmem:[#allocation39_spill] sm:$0xff] %v5071_v15  ;;  %v902_v28 = vadd.f32 %v818_v31, %v573_v27  ;;  %v575_v33 = vpop.f32.mrf.mxu1 }
 0x11a   :  { %v576_v8 = vadd.f32 %v575_v33, %v363_v32 }
 0x11b   :  { %4156 = vmatmul.msk.f32.gmra.mxu3 %vm37_vm0, %v5073_v36  ;;  %v372_v44 = vpop.f32.mrf.mxu0 }
 0x11c   :  { %4089 = vmatmul.msk.f32.gmra.mxu1 %vm37_vm0, %v5057_v40 }
 0x11d   :  { %4123 = vmatmul.msk.f32.gmra.mxu2 %vm37_vm0, %v5075_v30 }
 0x11e   :  { %v1096_v12 = vpop.f32.mrf.mxu3  ;;  %4168 = vmatmul.msk.f32.vlgmr.msrb.gmra.mxu0 %vm37_vm0, %v4650_v24 }
 0x11f   :  { %v5085_v4 = vadd.f32 %v1096_v12, %v902_v28  ;;  %v5101_v28 = vld [vmem:[#allocation2 + $0x138] sm:$0xff] }
 0x120   :  { %v821_v27 = vpop.f32.mrf.mxu2  ;;  %6282 = vst [vmem:[#allocation45_spill] sm:$0xff] %v5101_v28 }
 0x121   :  { %6278 = vst [vmem:[#allocation41_spill] sm:$0xff] %v5085_v4  ;;  %v903_v31 = vadd.f32 %v821_v27, %v576_v8  ;;  %v578_v15 = vpop.f32.mrf.mxu1  ;;  %v5103_v4 = vld [vmem:[#allocation2 + $0x12a] sm:$0xff] }
 0x122   :  { %v579_v32 = vadd.f32 %v578_v15, %v366_v48  ;;  %6283 = vst [vmem:[#allocation46_spill] sm:$0xff] %v5103_v4 }
 0x123   :  { %4157 = vmatmul.msk.f32.gmra.mxu3 %vm37_vm0, %v5087_v52  ;;  %v375_v40 = vpop.f32.mrf.mxu0 }
 0x124   :  { %4090 = vmatmul.msk.f32.gmra.mxu1 %vm37_vm0, %v5073_v36 }
 0x125   :  { %4124 = vmatmul.msk.f32.gmra.mxu2 %vm37_vm0, %v5089_v25  ;;  %v123_v25 = vld [vmem:[%s6206_s0 + $0xf0] sm:$0xff] }
 0x126   :  { %v1099_v24 = vpop.f32.mrf.mxu3  ;;  %4169 = vmatmul.msk.f32.gmra.mxu0 %vm37_vm0, %v4659_v29  ;;  %156 = vst.msk [vmem:[#allocation2 + $0x181] sm:$0xff] %vm37_vm0, %v123_v25  ;;  %v124_v25 = vld [vmem:[%s6206_s0 + $0xf8] sm:$0xff] }
 0x127   :  { %v5099_v33 = vadd.f32 %v1099_v24, %v903_v31  ;;  %v5115_v31 = vld [vmem:[#allocation2 + $0x140] sm:$0xff]  ;;  %157 = vst.msk [vmem:[#allocation2 + $0x189] sm:$0xff] %vm37_vm0, %v124_v25 }
 0x128   :  { %v824_v12 = vpop.f32.mrf.mxu2 }
 0x129   :  { %6281 = vst [vmem:[#allocation44_spill] sm:$0xff] %v5099_v33  ;;  %v904_v8 = vadd.f32 %v824_v12, %v579_v32  ;;  %v581_v27 = vpop.f32.mrf.mxu1  ;;  %v5117_v33 = vld [vmem:[#allocation2 + $0x13a] sm:$0xff] }
 0x12a   :  { %v582_v48 = vadd.f32 %v581_v27, %v369_v23  ;;  %6285 = vst [vmem:[#allocation48_spill] sm:$0xff] %v5117_v33 }
 0x12b   :  { %4158 = vmatmul.msk.f32.gmra.mxu3 %vm37_vm0, %v5101_v28  ;;  %v378_v30 = vpop.f32.mrf.mxu0 }
 0x12c   :  { %4091 = vmatmul.msk.f32.gmra.mxu1 %vm37_vm0, %v5087_v52  ;;  %v5135_v52 = vld [vmem:[#allocation2 + $0x142] sm:$0xff] }
 0x12d   :  { %4125 = vmatmul.msk.f32.gmra.mxu2 %vm37_vm0, %v5103_v4  ;;  %6288 = vst [vmem:[#allocation51_spill] sm:$0xff] %v5135_v52 }
 0x12e   :  { %v1102_v29 = vpop.f32.mrf.mxu3  ;;  %4170 = vmatmul.msk.f32.gmra.mxu0 %vm37_vm0, %v4670_v34 }
 0x12f   :  { %v5113_v15 = vadd.f32 %v1102_v29, %v904_v8  ;;  %v5133_v29 = vld [vmem:[#allocation2 + $0x150] sm:$0xff] }
 0x130   :  { %v827_v24 = vpop.f32.mrf.mxu2  ;;  %6287 = vst [vmem:[#allocation50_spill] sm:$0xff] %v5133_v29 }
 0x131   :  { %6284 = vst [vmem:[#allocation47_spill] sm:$0xff] %v5113_v15  ;;  %v905_v32 = vadd.f32 %v827_v24, %v582_v48  ;;  %v584_v12 = vpop.f32.mrf.mxu1 }
 0x132   :  { %v585_v8 = vadd.f32 %v584_v12, %v372_v44 }
 0x133   :  { %4159 = vmatmul.msk.f32.gmra.mxu3 %vm37_vm0, %v5115_v31  ;;  %v381_v4 = vpop.f32.mrf.mxu0 }
 0x134   :  { %4092 = vmatmul.msk.f32.gmra.mxu1 %vm37_vm0, %v5101_v28  ;;  %v5153_v28 = vld [vmem:[#allocation2 + $0x152] sm:$0xff] }
 0x135   :  { %4126 = vmatmul.msk.f32.gmra.mxu2 %vm37_vm0, %v5117_v33  ;;  %6291 = vst [vmem:[#allocation54_spill] sm:$0xff] %v5153_v28 }
 0x136   :  { %v1105_v23 = vpop.f32.mrf.mxu3  ;;  %4171 = vmatmul.msk.f32.gmra.mxu0 %vm37_vm0, %v4683_v38 }
 0x137   :  { %v5131_v27 = vadd.f32 %v1105_v23, %v905_v32  ;;  %v5151_v23 = vld [vmem:[#allocation2 + $0x158] sm:$0xff] }
 0x138   :  { %v830_v48 = vpop.f32.mrf.mxu2  ;;  %6290 = vst [vmem:[#allocation53_spill] sm:$0xff] %v5151_v23 }
 0x139   :  { %6286 = vst [vmem:[#allocation49_spill] sm:$0xff] %v5131_v27  ;;  %v906_v24 = vadd.f32 %v830_v48, %v585_v8  ;;  %v587_v15 = vpop.f32.mrf.mxu1 }
 0x13a   :  { %v588_v32 = vadd.f32 %v587_v15, %v375_v40 }
 0x13b   :  { %4160 = vmatmul.msk.f32.gmra.mxu3 %vm37_vm0, %v5133_v29  ;;  %v384_v33 = vpop.f32.mrf.mxu0 }
 0x13c   :  { %4093 = vmatmul.msk.f32.gmra.mxu1 %vm37_vm0, %v5115_v31 }
 0x13d   :  { %4127 = vmatmul.msk.f32.gmra.mxu2 %vm37_vm0, %v5135_v52  ;;  %v5167_v52 = vld [vmem:[#allocation2 + $0x15a] sm:$0xff] }
 0x13e   :  { %v1108_v44 = vpop.f32.mrf.mxu3  ;;  %4172 = vmatmul.msk.f32.gmra.mxu0 %vm37_vm0, %v4700_v42  ;;  %6294 = vst [vmem:[#allocation57_spill] sm:$0xff] %v5167_v52 }
 0x13f   :  { %v5149_v12 = vadd.f32 %v1108_v44, %v906_v24  ;;  %v5165_v44 = vld [vmem:[#allocation2 + $0x168] sm:$0xff] }
 0x140   :  { %v833_v8 = vpop.f32.mrf.mxu2  ;;  %6293 = vst [vmem:[#allocation56_spill] sm:$0xff] %v5165_v44 }
 0x141   :  { %6289 = vst [vmem:[#allocation52_spill] sm:$0xff] %v5149_v12  ;;  %v907_v48 = vadd.f32 %v833_v8, %v588_v32  ;;  %v590_v27 = vpop.f32.mrf.mxu1 }
 0x142   :  { %v591_v15 = vadd.f32 %v590_v27, %v378_v30 }
 0x143   :  { %4161 = vmatmul.msk.f32.gmra.mxu3 %vm37_vm0, %v5151_v23  ;;  %v387_v25 = vpop.f32.mrf.mxu0 }
 0x144   :  { %4094 = vmatmul.msk.f32.gmra.mxu1 %vm37_vm0, %v5133_v29 }
 0x145   :  { %4128 = vmatmul.msk.f32.gmra.mxu2 %vm37_vm0, %v5153_v28  ;;  %v5181_v28 = vld [vmem:[#allocation2 + $0x16a] sm:$0xff] }
 0x146   :  { %v1111_v40 = vpop.f32.mrf.mxu3  ;;  %4173 = vmatmul.msk.f32.gmra.mxu0 %vm37_vm0, %v4717_v46 }
 0x147   :  { %v5163_v24 = vadd.f32 %v1111_v40, %v907_v48  ;;  %v5179_v40 = vld [vmem:[#allocation2 + $0x170] sm:$0xff] }
 0x148   :  { %v836_v32 = vpop.f32.mrf.mxu2 }
 0x149   :  { %6292 = vst [vmem:[#allocation55_spill] sm:$0xff] %v5163_v24  ;;  %v908_v8 = vadd.f32 %v836_v32, %v591_v15  ;;  %v593_v12 = vpop.f32.mrf.mxu1 }
 0x14a   :  { %v594_v27 = vadd.f32 %v593_v12, %v381_v4 }
 0x14b   :  { %4162 = vmatmul.msk.f32.gmra.mxu3 %vm37_vm0, %v5165_v44  ;;  %v390_v29 = vpop.f32.mrf.mxu0 }
 0x14c   :  { %4095 = vmatmul.msk.f32.gmra.mxu1 %vm37_vm0, %v5151_v23 }
 0x14d   :  { %4129 = vmatmul.msk.f32.gmra.mxu2 %vm37_vm0, %v5167_v52  ;;  %v5195_v52 = vld [vmem:[#allocation2 + $0x172] sm:$0xff] }
 0x14e   :  { %v1114_v30 = vpop.f32.mrf.mxu3  ;;  %4174 = vmatmul.msk.f32.gmra.mxu0 %vm37_vm0, %v4735_v50  ;;  %6298 = vst [vmem:[#allocation61_spill] sm:$0xff] %v5195_v52 }
 0x14f   :  { %v5177_v48 = vadd.f32 %v1114_v30, %v908_v8  ;;  %v5193_v30 = vld [vmem:[#allocation2 + $0x180] sm:$0xff] }
 0x150   :  { %v839_v15 = vpop.f32.mrf.mxu2  ;;  %6297 = vst [vmem:[#allocation60_spill] sm:$0xff] %v5193_v30 }
 0x151   :  { %6295 = vst [vmem:[#allocation58_spill] sm:$0xff] %v5177_v48  ;;  %v909_v32 = vadd.f32 %v839_v15, %v594_v27  ;;  %v596_v24 = vpop.f32.mrf.mxu1 }
 0x152   :  { %v597_v12 = vadd.f32 %v596_v24, %v384_v33 }
 0x153   :  { %4163 = vmatmul.msk.f32.gmra.mxu3 %vm37_vm0, %v5179_v40  ;;  %v393_v23 = vpop.f32.mrf.mxu0 }
 0x154   :  { %4096 = vmatmul.msk.f32.gmra.mxu1 %vm37_vm0, %v5165_v44 }
 0x155   :  { %4130 = vmatmul.msk.f32.gmra.mxu2 %vm37_vm0, %v5181_v28 }
 0x156   :  { %v1117_v4 = vpop.f32.mrf.mxu3  ;;  %4175 = vmatmul.msk.f32.gmra.mxu0 %vm37_vm0, %v4753_v54 }
 0x157   :  { %v5191_v8 = vadd.f32 %v1117_v4, %v909_v32  ;;  %v5207_v4 = vld [vmem:[#allocation2 + $0x188] sm:$0xff] }
 0x158   :  { %v842_v27 = vpop.f32.mrf.mxu2 }
 0x159   :  { %6296 = vst [vmem:[#allocation59_spill] sm:$0xff] %v5191_v8  ;;  %v910_v15 = vadd.f32 %v842_v27, %v597_v12  ;;  %v599_v48 = vpop.f32.mrf.mxu1 }
 0x15a   :  { %v600_v24 = vadd.f32 %v599_v48, %v387_v25 }
 0x15b   :  { %4164 = vmatmul.msk.f32.gmra.mxu3 %vm37_vm0, %v5193_v30  ;;  %v396_v44 = vpop.f32.mrf.mxu0 }
 0x15c   :  { %4097 = vmatmul.msk.f32.gmra.mxu1 %vm37_vm0, %v5179_v40 }
 0x15d   :  { %4131 = vmatmul.msk.f32.gmra.mxu2 %vm37_vm0, %v5195_v52 }
 0x15e   :  { %v1120_v33 = vpop.f32.mrf.mxu3  ;;  %4176 = vmatmul.msk.f32.gmra.mxu0 %vm37_vm0, %v4771_v58 }
 0x15f   :  { %v5205_v32 = vadd.f32 %v1120_v33, %v910_v15 }
 0x160   :  { %v845_v12 = vpop.f32.mrf.mxu2 }
 0x161   :  { %v911_v27 = vadd.f32 %v845_v12, %v600_v24  ;;  %v602_v8 = vpop.f32.mrf.mxu1 }
 0x162   :  { %v603_v25 = vadd.f32 %v602_v8, %v390_v29 }
 0x163   :  { %4165 = vmatmul.msk.f32.gmra.mxu3 %vm37_vm0, %v5207_v4  ;;  %v399_v30 = vpop.f32.mrf.mxu0 }
 0x164   :  { %4202 = vmatmul.msk.f32.vlgmr.msra.gmra.mxu1 %vm37_vm0, %v4679_v37 }
 0x165   :  { %4236 = vmatmul.msk.f32.vlgmr.msra.gmra.mxu2 %vm37_vm0, %v4690_v39 }
 0x166   :  { %v1123_v52 = vpop.f32.mrf.mxu3  ;;  %4177 = vmatmul.msk.f32.gmra.mxu0 %vm37_vm0, %v4789_v62 }
 0x167   :  { %v5217_v48 = vadd.f32 %v1123_v52, %v911_v27 }
 0x168   :  { %v848_v15 = vpop.f32.mrf.mxu2 }
 0x169   :  { %v912_v33 = vadd.f32 %v848_v15, %v603_v25  ;;  %v605_v24 = vpop.f32.mrf.mxu1 }
 0x16a   :  { %v606_v39 = vadd.f32 %v605_v24, %v393_v23 }
 0x16b   :  { %4270 = vmatmul.msk.f32.vlgmr.msra.gmra.mxu3 %vm37_vm0, %v4670_v34  ;;  %v402_v12 = vpop.f32.mrf.mxu0 }
 0x16c   :  { %4203 = vmatmul.msk.f32.gmra.mxu1 %vm37_vm0, %v4695_v41 }
 0x16d   :  { %4237 = vmatmul.msk.f32.gmra.mxu2 %vm37_vm0, %v4707_v43 }
 0x16e   :  { %v1126_v37 = vpop.f32.mrf.mxu3  ;;  %4178 = vmatmul.msk.f32.gmra.mxu0 %vm37_vm0, %v4807_v2 }
 0x16f   :  { %v5227_v52 = vadd.f32 %v1126_v37, %v912_v33 }
 0x170   :  { %v851_v29 = vpop.f32.mrf.mxu2 }
 0x171   :  { %6299 = vst [vmem:[#allocation62_spill] sm:$0xff] %v5227_v52  ;;  %v913_v8 = vadd.f32 %v851_v29, %v606_v39  ;;  %v608_v27 = vpop.f32.mrf.mxu1 }
 0x172   :  { %v609_v43 = vadd.f32 %v608_v27, %v396_v44 }
 0x173   :  { %4271 = vmatmul.msk.f32.gmra.mxu3 %vm37_vm0, %v4683_v38  ;;  %v405_v34 = vpop.f32.mrf.mxu0 }
 0x174   :  { %4204 = vmatmul.msk.f32.gmra.mxu1 %vm37_vm0, %v4712_v45 }
 0x175   :  { %4238 = vmatmul.msk.f32.gmra.mxu2 %vm37_vm0, %v4725_v47 }
 0x176   :  { %v1129_v41 = vpop.f32.mrf.mxu3  ;;  %4179 = vmatmul.msk.f32.gmra.mxu0 %vm37_vm0, %v4825_v6 }
 0x177   :  { %v5237_v23 = vadd.f32 %v1129_v41, %v913_v8 }
 0x178   :  { %v854_v25 = vpop.f32.mrf.mxu2 }
 0x179   :  { %6300 = vst [vmem:[#allocation63_spill] sm:$0xff] %v5237_v23  ;;  %v914_v15 = vadd.f32 %v854_v25, %v609_v43  ;;  %v611_v33 = vpop.f32.mrf.mxu1  ;;  %v3482_v23 = vld [vmem:[#allocation4 + $0x18] sm:$0xff] }
 0x17a   :  { %v612_v47 = vadd.f32 %v611_v33, %v399_v30 }
 0x17b   :  { %4272 = vmatmul.msk.f32.gmra.mxu3 %vm37_vm0, %v4700_v42  ;;  %v408_v38 = vpop.f32.mrf.mxu0 }
 0x17c   :  { %4205 = vmatmul.msk.f32.gmra.mxu1 %vm37_vm0, %v4730_v49 }
 0x17d   :  { %4239 = vmatmul.msk.f32.gmra.mxu2 %vm37_vm0, %v4743_v51 }
 0x17e   :  { %v1132_v45 = vpop.f32.mrf.mxu3  ;;  %4180 = vmatmul.msk.f32.gmra.mxu0 %vm37_vm0, %v4843_v10 }
 0x17f   :  { %v5247_v44 = vadd.f32 %v1132_v45, %v914_v15 }
 0x180   :  { %v857_v24 = vpop.f32.mrf.mxu2 }
 0x181   :  { %6301 = vst [vmem:[#allocation64_spill] sm:$0xff] %v5247_v44  ;;  %v915_v37 = vadd.f32 %v857_v24, %v612_v47  ;;  %v614_v39 = vpop.f32.mrf.mxu1 }
 0x182   :  { %v615_v51 = vadd.f32 %v614_v39, %v402_v12 }
 0x183   :  { %4273 = vmatmul.msk.f32.gmra.mxu3 %vm37_vm0, %v4717_v46  ;;  %v411_v42 = vpop.f32.mrf.mxu0 }
 0x184   :  { %4206 = vmatmul.msk.f32.gmra.mxu1 %vm37_vm0, %v4748_v53 }
 0x185   :  { %4240 = vmatmul.msk.f32.gmra.mxu2 %vm37_vm0, %v4761_v55 }
 0x186   :  { %v1135_v49 = vpop.f32.mrf.mxu3  ;;  %4181 = vmatmul.msk.f32.gmra.mxu0 %vm37_vm0, %v4861_v14 }
 0x187   :  { %v5257_v30 = vadd.f32 %v1135_v49, %v915_v37 }
 0x188   :  { %v860_v29 = vpop.f32.mrf.mxu2 }
 0x189   :  { %6302 = vst [vmem:[#allocation65_spill] sm:$0xff] %v5257_v30  ;;  %v916_v8 = vadd.f32 %v860_v29, %v615_v51  ;;  %v617_v27 = vpop.f32.mrf.mxu1  ;;  %v3495_v30 = vld [vmem:[#allocation4 + $0x80] sm:$0xff] }
 0x18a   :  { %v618_v55 = vadd.f32 %v617_v27, %v405_v34 }
 0x18b   :  { %4274 = vmatmul.msk.f32.gmra.mxu3 %vm37_vm0, %v4735_v50  ;;  %v414_v46 = vpop.f32.mrf.mxu0 }
 0x18c   :  { %4207 = vmatmul.msk.f32.gmra.mxu1 %vm37_vm0, %v4766_v57 }
 0x18d   :  { %4241 = vmatmul.msk.f32.gmra.mxu2 %vm37_vm0, %v4779_v59 }
 0x18e   :  { %v1138_v53 = vpop.f32.mrf.mxu3  ;;  %4182 = vmatmul.msk.f32.gmra.mxu0 %vm37_vm0, %v4879_v19 }
 0x18f   :  { %v5267_v12 = vadd.f32 %v1138_v53, %v916_v8 }
 0x190   :  { %v863_v41 = vpop.f32.mrf.mxu2 }
 0x191   :  { %6303 = vst [vmem:[#allocation66_spill] sm:$0xff] %v5267_v12  ;;  %v917_v43 = vadd.f32 %v863_v41, %v618_v55  ;;  %v620_v25 = vpop.f32.mrf.mxu1 }
 0x192   :  { %v621_v59 = vadd.f32 %v620_v25, %v408_v38 }
 0x193   :  { %4275 = vmatmul.msk.f32.gmra.mxu3 %vm37_vm0, %v4753_v54  ;;  %v417_v50 = vpop.f32.mrf.mxu0 }
 0x194   :  { %4208 = vmatmul.msk.f32.gmra.mxu1 %vm37_vm0, %v4784_v61 }
 0x195   :  { %4242 = vmatmul.msk.f32.gmra.mxu2 %vm37_vm0, %v4797_v63 }
 0x196   :  { %v1141_v57 = vpop.f32.mrf.mxu3  ;;  %4183 = vmatmul.msk.f32.gmra.mxu0 %vm37_vm0, %v4899_v26 }
 0x197   :  { %v5277_v34 = vadd.f32 %v1141_v57, %v917_v43 }
 0x198   :  { %v866_v15 = vpop.f32.mrf.mxu2 }
 0x199   :  { %6304 = vst [vmem:[#allocation67_spill] sm:$0xff] %v5277_v34  ;;  %v918_v33 = vadd.f32 %v866_v15, %v621_v59  ;;  %v623_v45 = vpop.f32.mrf.mxu1  ;;  %v3500_v34 = vld [vmem:[#allocation4 + $0xa8] sm:$0xff] }
 0x19a   :  { %v624_v63 = vadd.f32 %v623_v45, %v411_v42  ;;  %v6314_v45 = vld [vmem:[#allocation32_spill] sm:$0xff] }
 0x19b   :  { %4276 = vmatmul.msk.f32.gmra.mxu3 %vm37_vm0, %v4771_v58  ;;  %v5281_v54 = vpop.f32.mrf.mxu0 }
 0x19c   :  { %4209 = vmatmul.msk.f32.gmra.mxu1 %vm37_vm0, %v4802_v1 }
 0x19d   :  { %4243 = vmatmul.msk.f32.gmra.mxu2 %vm37_vm0, %v4815_v3 }
 0x19e   :  { %v1144_v61 = vpop.f32.mrf.mxu3  ;;  %4184 = vmatmul.msk.f32.gmra.mxu0 %vm37_vm0, %v4921_v35 }
 0x19f   :  { %v5289_v38 = vadd.f32 %v1144_v61, %v918_v33 }
 0x1a0   :  { %v869_v47 = vpop.f32.mrf.mxu2 }
 0x1a1   :  { %6305 = vst [vmem:[#allocation68_spill] sm:$0xff] %v5289_v38  ;;  %v919_v24 = vadd.f32 %v869_v47, %v624_v63  ;;  %v626_v37 = vpop.f32.mrf.mxu1  ;;  %v6316_v47 = vld [vmem:[#allocation11_spill] sm:$0xff]  ;;  %v3519_v38 = vld [vmem:[#allocation4 + $0x140] sm:$0xff] }
 0x1a2   :  { %v627_v3 = vadd.f32 %v626_v37, %v414_v46 }
 0x1a3   :  { %4277 = vmatmul.msk.f32.gmra.mxu3 %vm37_vm0, %v4789_v62  ;;  %v5293_v58 = vpop.f32.mrf.mxu0 }
 0x1a4   :  { %4210 = vmatmul.msk.f32.gmra.mxu1 %vm37_vm0, %v4820_v5 }
 0x1a5   :  { %4244 = vmatmul.msk.f32.gmra.mxu2 %vm37_vm0, %v4833_v7 }
 0x1a6   :  { %v1147_v1 = vpop.f32.mrf.mxu3  ;;  %4185 = vmatmul.msk.f32.gmra.mxu0 %vm37_vm0, %v4943_v0 }
 0x1a7   :  { %v5301_v39 = vadd.f32 %v1147_v1, %v919_v24 }
 0x1a8   :  { %v872_v42 = vpop.f32.mrf.mxu2 }
 0x1a9   :  { %6306 = vst [vmem:[#allocation69_spill] sm:$0xff] %v5301_v39  ;;  %v920_v49 = vadd.f32 %v872_v42, %v627_v3  ;;  %v629_v51 = vpop.f32.mrf.mxu1  ;;  %v6317_v3 = vld [vmem:[#allocation14_spill] sm:$0xff]  ;;  %v6318_v42 = vld [vmem:[#allocation16_spill] sm:$0xff] }
 0x1aa   :  { %v630_v7 = vadd.f32 %v629_v51, %v417_v50  ;;  %v6311_v50 = vld [vmem:[#allocation13_spill] sm:$0xff] }
 0x1ab   :  { %4278 = vmatmul.msk.f32.gmra.mxu3 %vm37_vm0, %v4807_v2  ;;  %v5305_v62 = vpop.f32.mrf.mxu0 }
 0x1ac   :  { %4211 = vmatmul.msk.f32.gmra.mxu1 %vm37_vm0, %v4838_v9 }
 0x1ad   :  { %4245 = vmatmul.msk.f32.gmra.mxu2 %vm37_vm0, %v4851_v11 }
 0x1ae   :  { %v1150_v5 = vpop.f32.mrf.mxu3  ;;  %4186 = vmatmul.msk.f32.gmra.mxu0 %vm37_vm0, %v4963_v56 }
 0x1af   :  { %v5313_v29 = vadd.f32 %v1150_v5, %v920_v49 }
 0x1b0   :  { %v875_v8 = vpop.f32.mrf.mxu2 }
 0x1b1   :  { %6307 = vst [vmem:[#allocation70_spill] sm:$0xff] %v5313_v29  ;;  %v921_v27 = vadd.f32 %v875_v8, %v630_v7  ;;  %v632_v46 = vpop.f32.mrf.mxu1  ;;  %v6320_v7 = vld [vmem:[#allocation17_spill] sm:$0xff]  ;;  %v3521_v29 = vld [vmem:[#allocation4 + $0x150] sm:$0xff] }
 0x1b2   :  { %v633_v55 = vadd.f32 %v632_v46, %v4887_v20 }
 0x1b3   :  { %4279 = vmatmul.msk.f32.gmra.mxu3 %vm37_vm0, %v4825_v6  ;;  %v5317_v2 = vpop.f32.mrf.mxu0 }
 0x1b4   :  { %4212 = vmatmul.msk.f32.gmra.mxu1 %vm37_vm0, %v4856_v13 }
 0x1b5   :  { %4246 = vmatmul.msk.f32.gmra.mxu2 %vm37_vm0, %v4869_v16  ;;  %v6309_v16 = vld [vmem:[#allocation28_spill] sm:$0xff] }
 0x1b6   :  { %v1153_v9 = vpop.f32.mrf.mxu3  ;;  %4187 = vmatmul.msk.f32.gmra.mxu0 %vm37_vm0, %v4983_v22 }
 0x1b7   :  { %v5325_v11 = vadd.f32 %v1153_v9, %v921_v27  ;;  %v6321_v9 = vld [vmem:[#allocation18_spill] sm:$0xff] }
 0x1b8   :  { %v878_v53 = vpop.f32.mrf.mxu2 }
 0x1b9   :  { %6308 = vst [vmem:[#allocation71_spill] sm:$0xff] %v5325_v11  ;;  %v635_v41 = vpop.f32.mrf.mxu1  ;;  %v922_v6 = vadd.f32 %v878_v53, %v633_v55  ;;  %v6322_v53 = vld [vmem:[#allocation20_spill] sm:$0xff] }
 0x1ba   :  { %v636_v57 = vadd.f32 %v635_v41, %v6311_v50  ;;  %v3505_v11 = vld [vmem:[#allocation4 + $0xd0] sm:$0xff] }
 0x1bb   :  { %4280 = vmatmul.msk.f32.gmra.mxu3 %vm37_vm0, %v4843_v10  ;;  %v5330_v43 = vpop.f32.mrf.mxu0 }
 0x1bc   :  { %4213 = vmatmul.msk.f32.gmra.mxu1 %vm37_vm0, %v4874_v18  ;;  %v6312_v18 = vld [vmem:[#allocation10_spill] sm:$0xff] }
 0x1bd   :  { %4247 = vmatmul.msk.f32.gmra.mxu2 %vm37_vm0, %v4889_v21  ;;  %v6313_v21 = vld [vmem:[#allocation12_spill] sm:$0xff] }
 0x1be   :  { %v1156_v13 = vpop.f32.mrf.mxu3  ;;  %4188 = vmatmul.msk.f32.gmra.mxu0 %vm37_vm0, %v6309_v16 }
 0x1bf   :  { %v5338_v25 = vadd.f32 %v1156_v13, %v922_v6  ;;  %v6324_v13 = vld [vmem:[#allocation15_spill] sm:$0xff] }
 0x1c0   :  { %v881_v20 = vpop.f32.mrf.mxu2 }
 0x1c1   :  { %6310 = vst [vmem:[#allocation28_spill] sm:$0xff] %v5338_v25  ;;  %v638_v59 = vpop.f32.mrf.mxu1  ;;  %v923_v10 = vadd.f32 %v881_v20, %v636_v57  ;;  %v2335_v25 = vld [vmem:[#allocation2 + $0xf2] sm:$0xff] }
 0x1c2   :  { %v639_v24 = vadd.f32 %v638_v59, %v6316_v47  ;;  %v5384_v59 = vld [vmem:[#allocation2 + $0x139] sm:$0xff] }
 0x1c3   :  { %4281 = vmatmul.msk.f32.gmra.mxu3 %vm37_vm0, %v4861_v14  ;;  %v5343_v15 = vpop.f32.mrf.mxu0  ;;  %v6328_v47 = vld [vmem:[#allocation19_spill] sm:$0xff] }
 0x1c4   :  { %4214 = vmatmul.msk.f32.gmra.mxu1 %vm37_vm0, %v6312_v18  ;;  %v6326_v18 = vld [vmem:[#allocation23_spill] sm:$0xff] }
 0x1c5   :  { %4248 = vmatmul.msk.f32.gmra.mxu2 %vm37_vm0, %v6313_v21 }
 0x1c6   :  { %v1159_v33 = vpop.f32.mrf.mxu3  ;;  %4189 = vmatmul.msk.f32.gmra.mxu0 %vm37_vm0, %v6314_v45 }
 0x1c7   :  { %v5351_v61 = vadd.f32 %v1159_v33, %v923_v10  ;;  %v6325_v10 = vld [vmem:[#allocation21_spill] sm:$0xff] }
 0x1c8   :  { %v884_v63 = vpop.f32.mrf.mxu2 }
 0x1c9   :  { %6315 = vst [vmem:[#allocation13_spill] sm:$0xff] %v5351_v61  ;;  %v641_v37 = vpop.f32.mrf.mxu1  ;;  %v924_v14 = vadd.f32 %v884_v63, %v639_v24  ;;  %v2333_v61 = vld [vmem:[#allocation2 + $0xda] sm:$0xff] }
 0x1ca   :  { %v642_v8 = vadd.f32 %v641_v37, %v6320_v7  ;;  %v6331_v7 = vld [vmem:[#allocation26_spill] sm:$0xff] }
 0x1cb   :  { %4282 = vmatmul.msk.f32.gmra.mxu3 %vm37_vm0, %v4879_v19  ;;  %v5356_v1 = vpop.f32.mrf.mxu0 }
 0x1cc   :  { %4215 = vmatmul.msk.f32.gmra.mxu1 %vm37_vm0, %v6317_v3  ;;  %v5399_v3 = vld [vmem:[#allocation2 + $0x141] sm:$0xff] }
 0x1cd   :  { %4249 = vmatmul.msk.f32.gmra.mxu2 %vm37_vm0, %v6318_v42  ;;  %v6329_v42 = vld [vmem:[#allocation24_spill] sm:$0xff] }
 0x1ce   :  { %v1162_v49 = vpop.f32.mrf.mxu3  ;;  %4190 = vmatmul.msk.f32.gmra.mxu0 %vm37_vm0, %v5047_v17 }
 0x1cf   :  { %v5364_v51 = vadd.f32 %v1162_v49, %v924_v14  ;;  %v6330_v49 = vld [vmem:[#allocation22_spill] sm:$0xff] }
 0x1d0   :  { %v887_v5 = vpop.f32.mrf.mxu2 }
 0x1d1   :  { %6319 = vst [vmem:[#allocation10_spill] sm:$0xff] %v5364_v51  ;;  %v644_v27 = vpop.f32.mrf.mxu1  ;;  %v925_v19 = vadd.f32 %v887_v5, %v642_v8  ;;  %v1452_v5 = vadd.f32 %v5281_v54, %v6330_v49  ;;  %v6333_v54 = vld [vmem:[#allocation27_spill] sm:$0xff]  ;;  %v3490_v51 = vld [vmem:[#allocation4 + $0x58] sm:$0xff] }
 0x1d2   :  { %v645_v20 = vadd.f32 %v644_v27, %v6324_v13  ;;  %v6334_v13 = vld [vmem:[#allocation25_spill] sm:$0xff] }
 0x1d3   :  { %4283 = vmatmul.msk.f32.gmra.mxu3 %vm37_vm0, %v4899_v26  ;;  %v5369_v46 = vpop.f32.mrf.mxu0 }
 0x1d4   :  { %4216 = vmatmul.msk.f32.gmra.mxu1 %vm37_vm0, %v6321_v9 }
 0x1d5   :  { %4250 = vmatmul.msk.f32.gmra.mxu2 %vm37_vm0, %v6322_v53 }
 0x1d6   :  { %v1165_v55 = vpop.f32.mrf.mxu3  ;;  %4191 = vmatmul.msk.f32.gmra.mxu0 %vm37_vm0, %v5063_v60 }
 0x1d7   :  { %v5377_v41 = vadd.f32 %v1165_v55, %v925_v19 }
 0x1d8   :  { %v890_v6 = vpop.f32.mrf.mxu2 }
 0x1d9   :  { %6323 = vst [vmem:[#allocation12_spill] sm:$0xff] %v5377_v41  ;;  %v647_v50 = vpop.f32.mrf.mxu1  ;;  %v926_v26 = vadd.f32 %v890_v6, %v645_v20  ;;  %v5415_v6 = vld [vmem:[#allocation2 + $0x151] sm:$0xff]  ;;  %v1453_v20 = vadd.f32 %v5293_v58, %v6334_v13  ;;  %v6341_v13 = vld [vmem:[#allocation37_spill] sm:$0xff] }
 0x1da   :  { %v6336_v58 = vld [vmem:[#allocation31_spill] sm:$0xff]  ;;  %v3522_v41 = vld [vmem:[#allocation4 + $0x158] sm:$0xff] }
 0x1db   :  { %4284 = vmatmul.msk.f32.gmra.mxu3 %vm37_vm0, %v4921_v35  ;;  %v5382_v57 = vpop.f32.mrf.mxu0  ;;  %v648_v35 = vadd.f32 %v647_v50, %v6328_v47  ;;  %v6335_v50 = vld [vmem:[#allocation30_spill] sm:$0xff] }
 0x1dc   :  { %4217 = vmatmul.msk.f32.gmra.mxu1 %vm37_vm0, %v6325_v10 }
 0x1dd   :  { %4251 = vmatmul.msk.f32.gmra.mxu2 %vm37_vm0, %v6326_v18 }
 0x1de   :  { %v1168_v21 = vpop.f32.mrf.mxu3  ;;  %4192 = vmatmul.msk.f32.gmra.mxu0 %vm37_vm0, %v5384_v59 }
 0x1df   :  { %v5392_v33 = vadd.f32 %v1168_v21, %v926_v26 }
 0x1e0   :  { %v893_v63 = vpop.f32.mrf.mxu2 }
 0x1e1   :  { %6327 = vst [vmem:[#allocation32_spill] sm:$0xff] %v5392_v33  ;;  %v1634_v24 = vpop.f32.mrf.mxu1  ;;  %v927_v37 = vadd.f32 %v893_v63, %v648_v35  ;;  %v5431_v35 = vld [vmem:[#allocation2 + $0x159] sm:$0xff] }
 0x1e3   :  { %4285 = vmatmul.msk.f32.gmra.mxu3 %vm37_vm0, %v4943_v0  ;;  %v5397_v14 = vpop.f32.mrf.mxu0  ;;  %v1730_v0 = vadd.f32 %v1634_v24, %v1452_v5  ;;  %v6337_v24 = vld [vmem:[#allocation29_spill] sm:$0xff] }
 0x1e4   :  { %4218 = vmatmul.msk.f32.gmra.mxu1 %vm37_vm0, %v6329_v42  ;;  %v6338_v42 = vld [vmem:[#allocation34_spill] sm:$0xff] }
 0x1e5   :  { %4252 = vmatmul.msk.f32.gmra.mxu2 %vm37_vm0, %v6331_v7 }
 0x1e6   :  { %v1171_v8 = vpop.f32.mrf.mxu3  ;;  %4193 = vmatmul.msk.f32.gmra.mxu0 %vm37_vm0, %v5399_v3 }
 0x1e7   :  { %v5409_v27 = vadd.f32 %v1171_v8, %v927_v37  ;;  %v1454_v37 = vadd.f32 %v5305_v62, %v6337_v24  ;;  %v6339_v62 = vld [vmem:[#allocation35_spill] sm:$0xff] }
 0x1e8   :  { %v1913_v19 = vpop.f32.mrf.mxu2 }
 0x1e9   :  { %6332 = vst [vmem:[#allocation11_spill] sm:$0xff] %v5409_v27  ;;  %v2009_v9 = vadd.f32 %v1913_v19, %v1730_v0  ;;  %v1637_v53 = vpop.f32.mrf.mxu1 }
 0x1ea   :  { %v1731_v10 = vadd.f32 %v1637_v53, %v1453_v20  ;;  %v6340_v53 = vld [vmem:[#allocation33_spill] sm:$0xff] }
 0x1eb   :  { %4286 = vmatmul.msk.f32.gmra.mxu3 %vm37_vm0, %v4963_v56  ;;  %v5413_v55 = vpop.f32.mrf.mxu0 }
 0x1ec   :  { %4219 = vmatmul.msk.f32.gmra.mxu1 %vm37_vm0, %v6333_v54  ;;  %v1455_v54 = vadd.f32 %v5317_v2, %v6340_v53  ;;  %v6342_v2 = vld [vmem:[#allocation38_spill] sm:$0xff] }
 0x1ed   :  { %4253 = vmatmul.msk.f32.gmra.mxu2 %vm37_vm0, %v6335_v50  ;;  %v6346_v53 = vld [vmem:[#allocation42_spill] sm:$0xff] }
 0x1ee   :  { %v2191_v26 = vpop.f32.mrf.mxu3  ;;  %4194 = vmatmul.msk.f32.gmra.mxu0 %vm37_vm0, %v5415_v6 }
 0x1ef   :  { %v5425_v18 = vadd.f32 %v2191_v26, %v2009_v9  ;;  %v5447_v9 = vld [vmem:[#allocation2 + $0x169] sm:$0xff] }
 0x1f0   :  { %v1916_v56 = vpop.f32.mrf.mxu2 }
 0x1f1   :  { %v2010_v21 = vadd.f32 %v1916_v56, %v1731_v10  ;;  %v1640_v63 = vpop.f32.mrf.mxu1 }
 0x1f2   :  { %v1732_v5 = vadd.f32 %v1640_v63, %v1454_v37  ;;  %v5463_v63 = vld [vmem:[#allocation2 + $0x171] sm:$0xff] }
 0x1f3   :  { %4287 = vmatmul.msk.f32.gmra.mxu3 %vm37_vm0, %v4983_v22  ;;  %v5429_v47 = vpop.f32.mrf.mxu0 }
 0x1f4   :  { %4220 = vmatmul.msk.f32.gmra.mxu1 %vm37_vm0, %v6336_v58  ;;  %v6343_v58 = vld [vmem:[#allocation36_spill] sm:$0xff] }
 0x1f5   :  { %4254 = vmatmul.msk.f32.gmra.mxu2 %vm37_vm0, %v6338_v42  ;;  %v1456_v24 = vadd.f32 %v5330_v43, %v6343_v58  ;;  %v6344_v43 = vld [vmem:[#allocation40_spill] sm:$0xff] }
 0x1f6   :  { %v2194_v49 = vpop.f32.mrf.mxu3  ;;  %4195 = vmatmul.msk.f32.gmra.mxu0 %vm37_vm0, %v5431_v35 }
 0x1f7   :  { %v5441_v7 = vadd.f32 %v2194_v49, %v2010_v21 }
 0x1f8   :  { %v1919_v22 = vpop.f32.mrf.mxu2 }
 0x1f9   :  { %v2011_v8 = vadd.f32 %v1919_v22, %v1732_v5  ;;  %v1643_v0 = vpop.f32.mrf.mxu1 }
 0x1fa   :  { %v1733_v50 = vadd.f32 %v1643_v0, %v1455_v54  ;;  %v5479_v0 = vld [vmem:[#allocation2 + $0x181] sm:$0xff] }
 0x1fb   :  { %4288 = vmatmul.msk.f32.gmra.mxu3 %vm37_vm0, %v6309_v16  ;;  %v5445_v19 = vpop.f32.mrf.mxu0 }
 0x1fc   :  { %4221 = vmatmul.msk.f32.gmra.mxu1 %vm37_vm0, %v6339_v62 }
 0x1fd   :  { %4255 = vmatmul.msk.f32.gmra.mxu2 %vm37_vm0, %v6341_v13 }
 0x1fe   :  { %v2197_v20 = vpop.f32.mrf.mxu3  ;;  %4196 = vmatmul.msk.f32.gmra.mxu0 %vm37_vm0, %v5447_v9 }
 0x1ff   :  { %v5457_v26 = vadd.f32 %v2197_v20, %v2011_v8 }
 0x200   :  { %v1922_v16 = vpop.f32.mrf.mxu2 }
 0x201   :  { %v2012_v10 = vadd.f32 %v1922_v16, %v1733_v50  ;;  %v1646_v56 = vpop.f32.mrf.mxu1 }
 0x202   :  { %v1734_v42 = vadd.f32 %v1646_v56, %v1456_v24  ;;  %v5495_v56 = vld [vmem:[#allocation2 + $0x189] sm:$0xff] }
 0x203   :  { %4289 = vmatmul.msk.f32.gmra.mxu3 %vm37_vm0, %v6314_v45  ;;  %v5461_v21 = vpop.f32.mrf.mxu0  ;;  %v6350_v24 = vld [vmem:[#allocation45_spill] sm:$0xff] }
 0x204   :  { %4222 = vmatmul.msk.f32.gmra.mxu1 %vm37_vm0, %v6342_v2  ;;  %v6349_v2 = vld [vmem:[#allocation41_spill] sm:$0xff] }
 0x205   :  { %4256 = vmatmul.msk.f32.gmra.mxu2 %vm37_vm0, %v5073_v36  ;;  %v6345_v36 = vld [vmem:[#allocation39_spill] sm:$0xff]  ;;  %v1458_v58 = vadd.f32 %v5356_v1, %v6349_v2  ;;  %v6352_v1 = vld [vmem:[#allocation46_spill] sm:$0xff]  ;;  %v6355_v2 = vld [vmem:[#allocation48_spill] sm:$0xff] }
 0x206   :  { %v2200_v37 = vpop.f32.mrf.mxu3  ;;  %4197 = vmatmul.msk.f32.gmra.mxu0 %vm37_vm0, %v5463_v63  ;;  %v1457_v62 = vadd.f32 %v5343_v15, %v6345_v36  ;;  %v6348_v15 = vld [vmem:[#allocation43_spill] sm:$0xff] }
 0x207   :  { %v5473_v49 = vadd.f32 %v2200_v37, %v2012_v10 }
 0x208   :  { %v1925_v45 = vpop.f32.mrf.mxu2 }
 0x209   :  { %v2013_v5 = vadd.f32 %v1925_v45, %v1734_v42  ;;  %v1649_v22 = vpop.f32.mrf.mxu1 }
 0x20a   :  { %v1735_v13 = vadd.f32 %v1649_v22, %v1457_v62  ;;  %v6353_v62 = vld [vmem:[#allocation44_spill] sm:$0xff] }
 0x20b   :  { %4290 = vmatmul.msk.f32.gmra.mxu3 %vm37_vm0, %v5047_v17  ;;  %v5477_v8 = vpop.f32.mrf.mxu0 }
 0x20c   :  { %4223 = vmatmul.msk.f32.gmra.mxu1 %vm37_vm0, %v6344_v43  ;;  %v2319_v43 = vld [vmem:[#allocation2 + $0x32] sm:$0xff] }
 0x20d   :  { %4257 = vmatmul.msk.f32.gmra.mxu2 %vm37_vm0, %v6346_v53  ;;  %v1459_v53 = vadd.f32 %v5369_v46, %v6353_v62  ;;  %v6356_v46 = vld [vmem:[#allocation50_spill] sm:$0xff]  ;;  %v6364_v62 = vld [vmem:[#allocation57_spill] sm:$0xff] }
 0x20e   :  { %v2203_v54 = vpop.f32.mrf.mxu3  ;;  %4198 = vmatmul.msk.f32.gmra.mxu0 %vm37_vm0, %v5479_v0 }
 0x20f   :  { %v5489_v20 = vadd.f32 %v2203_v54, %v2013_v5 }
 0x210   :  { %v1928_v17 = vpop.f32.mrf.mxu2 }
 0x211   :  { %v2014_v50 = vadd.f32 %v1928_v17, %v1735_v13  ;;  %v1652_v16 = vpop.f32.mrf.mxu1 }
 0x212   :  { %v1736_v42 = vadd.f32 %v1652_v16, %v1458_v58 }
 0x213   :  { %4291 = vmatmul.msk.f32.gmra.mxu3 %vm37_vm0, %v5063_v60  ;;  %v5493_v10 = vpop.f32.mrf.mxu0 }
 0x214   :  { %6347 = vst [vmem:[#allocation14_spill] sm:$0xff] %v5493_v10  ;;  %4224 = vmatmul.msk.f32.gmra.mxu1 %vm37_vm0, %v6348_v15  ;;  %v2320_v15 = vld [vmem:[#allocation2 + $0x3a] sm:$0xff] }
 0x215   :  { %4258 = vmatmul.msk.f32.gmra.mxu2 %vm37_vm0, %v6350_v24 }
 0x216   :  { %v2206_v37 = vpop.f32.mrf.mxu3  ;;  %4199 = vmatmul.msk.f32.gmra.mxu0 %vm37_vm0, %v5495_v56 }
 0x217   :  { %v5505_v45 = vadd.f32 %v2206_v37, %v2014_v50  ;;  %v6358_v37 = vld [vmem:[#allocation51_spill] sm:$0xff] }
 0x218   :  { %v1931_v60 = vpop.f32.mrf.mxu2 }
 0x219   :  { %v2015_v5 = vadd.f32 %v1931_v60, %v1736_v42  ;;  %v1655_v36 = vpop.f32.mrf.mxu1  ;;  %v6359_v42 = vld [vmem:[#allocation53_spill] sm:$0xff] }
 0x21a   :  { %v1737_v13 = vadd.f32 %v1655_v36, %v1459_v53 }
 0x21b   :  { %4292 = vmatmul.msk.f32.gmra.mxu3 %vm37_vm0, %v5384_v59  ;;  %v5509_v22 = vpop.f32.mrf.mxu0 }
 0x21c   :  { %6351 = vst [vmem:[#allocation16_spill] sm:$0xff] %v5509_v22  ;;  %4225 = vmatmul.msk.f32.gmra.mxu1 %vm37_vm0, %v6352_v1  ;;  %v2323_v1 = vld [vmem:[#allocation2 + $0x62] sm:$0xff] }
 0x21d   :  { %4259 = vmatmul.msk.f32.gmra.mxu2 %vm37_vm0, %v5115_v31 }
 0x21e   :  { %v2209_v54 = vpop.f32.mrf.mxu3  ;;  %4304 = vmatmul.msk.f32.vlgmr.msra.gmra.mxu0 %vm37_vm0, %v2319_v43  ;;  %v6361_v43 = vld [vmem:[#allocation54_spill] sm:$0xff] }
 0x21f   :  { %v5518_v17 = vadd.f32 %v2209_v54, %v2015_v5  ;;  %v2322_v5 = vld [vmem:[#allocation2 + $0x52] sm:$0xff]  ;;  %v2324_v54 = vld [vmem:[#allocation2 + $0x6a] sm:$0xff] }
 0x220   :  { %v1934_v59 = vpop.f32.mrf.mxu2 }
 0x221   :  { %v2016_v50 = vadd.f32 %v1934_v59, %v1737_v13  ;;  %v6366_v13 = vld [vmem:[#allocation60_spill] sm:$0xff] }
 0x223   :  { %4293 = vmatmul.msk.f32.gmra.mxu3 %vm37_vm0, %v5399_v3  ;;  %v5522_v16 = vpop.f32.mrf.mxu0  ;;  %v2321_v3 = vld [vmem:[#allocation2 + $0x4a] sm:$0xff] }
 0x224   :  { %6354 = vst [vmem:[#allocation17_spill] sm:$0xff] %v5522_v16  ;;  %4226 = vmatmul.msk.f32.gmra.mxu1 %vm37_vm0, %v6355_v2  ;;  %v3525_v2 = vld [vmem:[#allocation4 + $0x170] sm:$0xff] }
 0x225   :  { %4260 = vmatmul.msk.f32.gmra.mxu2 %vm37_vm0, %v6356_v46  ;;  %v1793_v46 = vld [vmem:[#allocation2 + $0x198] sm:$0xff] }
 0x226   :  { %v2212_v31 = vpop.f32.mrf.mxu3  ;;  %4305 = vmatmul.msk.f32.gmra.mxu0 %vm37_vm0, %v2320_v15  ;;  %v1514_v15 = vld [vmem:[#allocation2 + $0x182] sm:$0xff] }
 0x227   :  { %v5529_v58 = vadd.f32 %v2212_v31, %v2016_v50  ;;  %v6368_v50 = vld [vmem:[#allocation61_spill] sm:$0xff] }
 0x228   :  { %v2326_v31 = vld [vmem:[#allocation2 + $0x82] sm:$0xff] }
 0x22b   :  { %4294 = vmatmul.msk.f32.gmra.mxu3 %vm37_vm0, %v5415_v6  ;;  %v5533_v24 = vpop.f32.mrf.mxu0  ;;  %v6362_v6 = vld [vmem:[#allocation56_spill] sm:$0xff] }
 0x22c   :  { %6357 = vst [vmem:[#allocation18_spill] sm:$0xff] %v5533_v24  ;;  %4227 = vmatmul.msk.f32.gmra.mxu1 %vm37_vm0, %v6358_v37  ;;  %v2071_v37 = vld [vmem:[#allocation2 + $0x199] sm:$0xff] }
 0x22d   :  { %4261 = vmatmul.msk.f32.gmra.mxu2 %vm37_vm0, %v6359_v42  ;;  %v5585_v42 = vpop.f32.mrf.mxu2 }
 0x22e   :  { %4306 = vmatmul.msk.f32.gmra.mxu0 %vm37_vm0, %v2321_v3  ;;  %v3493_v3 = vld [vmem:[#allocation4 + $0x70] sm:$0xff] }
 0x233   :  { %4295 = vmatmul.msk.f32.gmra.mxu3 %vm37_vm0, %v5431_v35  ;;  %v5542_v60 = vpop.f32.mrf.mxu0  ;;  %v3510_v35 = vld [vmem:[#allocation4 + $0xf8] sm:$0xff] }
 0x234   :  { %6360 = vst [vmem:[#allocation20_spill] sm:$0xff] %v5542_v60  ;;  %4228 = vmatmul.msk.f32.gmra.mxu1 %vm37_vm0, %v6361_v43  ;;  %3668 = vmatpush.msrb.mxu2 %v3510_v35  ;;  %v1794_v43 = vld [vmem:[#allocation2 + $0x1a0] sm:$0xff] }
 0x235   :  { %4262 = vmatmul.msk.f32.gmra.mxu2 %vm37_vm0, %v6362_v6  ;;  %v5587_v6 = vpop.f32.mrf.mxu3  ;;  %v2072_v35 = vld [vmem:[#allocation2 + $0x1a1] sm:$0xff] }
 0x236   :  { %4307 = vmatmul.msk.f32.gmra.mxu0 %vm37_vm0, %v2322_v5  ;;  %v1515_v5 = vld [vmem:[#allocation2 + $0x18a] sm:$0xff] }
 0x23b   :  { %4296 = vmatmul.msk.f32.gmra.mxu3 %vm37_vm0, %v5447_v9  ;;  %v5551_v36 = vpop.f32.mrf.mxu0  ;;  %v3526_v9 = vld [vmem:[#allocation4 + $0x178] sm:$0xff] }
 0x23c   :  { %6363 = vst [vmem:[#allocation15_spill] sm:$0xff] %v5551_v36  ;;  %4229 = vmatmul.msk.f32.gmra.mxu1 %vm37_vm0, %v6364_v62  ;;  %3709 = vmatpush.msrb.mxu3 %v3526_v9  ;;  %v3508_v62 = vld [vmem:[#allocation4 + $0xe8] sm:$0xff]  ;;  %v3499_v36 = vld [vmem:[#allocation4 + $0xa0] sm:$0xff] }
 0x23d   :  { %4263 = vmatmul.msk.f32.gmra.mxu2 %vm37_vm0, %v5179_v40  ;;  %v3494_v40 = vld [vmem:[#allocation4 + $0x78] sm:$0xff]  ;;  %v3524_v9 = vld [vmem:[#allocation4 + $0x168] sm:$0xff] }
 0x23e   :  { %4308 = vmatmul.msk.f32.gmra.mxu0 %vm37_vm0, %v2323_v1  ;;  %3627 = vmatpush.msrb.mxu1 %v3494_v40  ;;  %v2327_v1 = vld [vmem:[#allocation2 + $0x92] sm:$0xff] }
 0x23f   :  { %3710 = vmatpush.msrb.mxu3 %v3525_v2 }
 0x240   :  { %3628 = vmatpush.msrb.mxu1 %v3493_v3 }
 0x241   :  { %3711 = vmatpush.msrb.mxu3 %v3524_v9  ;;  %v3491_v9 = vld [vmem:[#allocation4 + $0x60] sm:$0xff] }
 0x243   :  { %4297 = vmatmul.msk.f32.gmra.mxu3 %vm37_vm0, %v5463_v63  ;;  %v5560_v53 = vpop.f32.mrf.mxu0  ;;  %v2325_v63 = vld [vmem:[#allocation2 + $0x7a] sm:$0xff] }
 0x244   :  { %6365 = vst [vmem:[#allocation21_spill] sm:$0xff] %v5560_v53  ;;  %4230 = vmatmul.msk.f32.gmra.mxu1 %vm37_vm0, %v5181_v28  ;;  %v3509_v28 = vld [vmem:[#allocation4 + $0xf0] sm:$0xff]  ;;  %v3520_v53 = vld [vmem:[#allocation4 + $0x148] sm:$0xff] }
 0x245   :  { %4264 = vmatmul.msk.f32.gmra.mxu2 %vm37_vm0, %v6366_v13  ;;  %v5597_v13 = vpop.f32.mrf.mxu2 }
 0x246   :  { %4309 = vmatmul.msk.f32.gmra.mxu0 %vm37_vm0, %v2324_v54  ;;  %3669 = vmatpush.msrb.mxu2 %v3509_v28  ;;  %v3492_v28 = vld [vmem:[#allocation4 + $0x68] sm:$0xff] }
 0x247   :  { %3629 = vmatpush.msrb.mxu1 %v3492_v28 }
 0x248   :  { %3670 = vmatpush.msrb.mxu2 %v3508_v62 }
 0x249   :  { %3630 = vmatpush.msrb.mxu1 %v3491_v9  ;;  %v2332_v9 = vld [vmem:[#allocation2 + $0xca] sm:$0xff] }
 0x24b   :  { %4298 = vmatmul.msk.f32.gmra.mxu3 %vm37_vm0, %v5479_v0  ;;  %v5569_v59 = vpop.f32.mrf.mxu0  ;;  %3631 = vmatpush.msrb.mxu1 %v3490_v51 }
 0x24c   :  { %6367 = vst [vmem:[#allocation23_spill] sm:$0xff] %v5569_v59  ;;  %4231 = vmatmul.msk.f32.gmra.mxu1 %vm37_vm0, %v6368_v50  ;;  %v5602_v50 = vpop.f32.mrf.mxu3  ;;  %v2336_v59 = vld [vmem:[#allocation2 + $0xfa] sm:$0xff] }
 0x24d   :  { %4265 = vmatmul.msk.f32.gmra.mxu2 %vm37_vm0, %v5207_v4  ;;  %v5583_v4 = vpop.f32.mrf.mxu1 }
 0x24e   :  { %4310 = vmatmul.msk.f32.gmra.mxu0 %vm37_vm0, %v2325_v63  ;;  %v2328_v63 = vld [vmem:[#allocation2 + $0x9a] sm:$0xff] }
 0x253   :  { %4299 = vmatmul.msk.f32.gmra.mxu3 %vm37_vm0, %v5495_v56  ;;  %v5578_v0 = vpop.f32.mrf.mxu0 }
 0x254   :  { %6369 = vst [vmem:[#allocation19_spill] sm:$0xff] %v5578_v0  ;;  %4232 = vmatmul.msk.f32.gmra.mxu1 %vm37_vm0, %v1514_v15  ;;  %v5612_v3 = vpop.f32.mrf.mxu3  ;;  %v3502_v0 = vld [vmem:[#allocation4 + $0xb8] sm:$0xff] }
 0x255   :  { %4266 = vmatmul.msk.f32.gmra.mxu2 %vm37_vm0, %v1793_v46  ;;  %v5595_v54 = vpop.f32.mrf.mxu1  ;;  %v2329_v46 = vld [vmem:[#allocation2 + $0xaa] sm:$0xff] }
 0x256   :  { %4311 = vmatmul.msk.f32.gmra.mxu0 %vm37_vm0, %v2326_v31  ;;  %v5609_v31 = vpop.f32.mrf.mxu2 }
 0x25b   :  { %4300 = vmatmul.msk.f32.gmra.mxu3 %vm37_vm0, %v2071_v37  ;;  %v5590_v56 = vpop.f32.mrf.mxu0  ;;  %v3507_v37 = vld [vmem:[#allocation4 + $0xe0] sm:$0xff] }
 0x25c   :  { %6370 = vst [vmem:[#allocation24_spill] sm:$0xff] %v5590_v56  ;;  %4233 = vmatmul.msk.f32.gmra.mxu1 %vm37_vm0, %v1515_v5  ;;  %3671 = vmatpush.msrb.mxu2 %v3507_v37  ;;  %v3523_v5 = vld [vmem:[#allocation4 + $0x160] sm:$0xff] }
 0x25d   :  { %4267 = vmatmul.msk.f32.gmra.mxu2 %vm37_vm0, %v1794_v43  ;;  %v5605_v15 = vpop.f32.mrf.mxu1  ;;  %3712 = vmatpush.msrb.mxu3 %v3523_v5  ;;  %v3506_v5 = vld [vmem:[#allocation4 + $0xd8] sm:$0xff]  ;;  %v3503_v56 = vld [vmem:[#allocation4 + $0xc0] sm:$0xff] }
 0x25e   :  { %4312 = vmatmul.msk.f32.gmra.mxu0 %vm37_vm0, %v2327_v1  ;;  %v2330_v1 = vld [vmem:[#allocation2 + $0xb2] sm:$0xff]  ;;  %3672 = vmatpush.msrb.mxu2 %v3506_v5 }
 0x25f   :  { %3713 = vmatpush.msrb.mxu3 %v3522_v41 }
 0x260   :  { %3673 = vmatpush.msrb.mxu2 %v3505_v11 }
 0x261   :  { %3714 = vmatpush.msrb.mxu3 %v3521_v29  ;;  %v3487_v29 = vld [vmem:[#allocation4 + $0x40] sm:$0xff] }
 0x263   :  { %4301 = vmatmul.msk.f32.gmra.mxu3 %vm37_vm0, %v2072_v35  ;;  %v5600_v40 = vpop.f32.mrf.mxu0  ;;  %v5619_v35 = vpop.f32.mrf.mxu2 }
 0x264   :  { %6371 = vst [vmem:[#allocation22_spill] sm:$0xff] %v5600_v40  ;;  %3715 = vmatpush.msrb.mxu3 %v3520_v53  ;;  %v3497_v53 = vld [vmem:[#allocation4 + $0x90] sm:$0xff] }
 0x265   :  { %v5616_v62 = vpop.f32.mrf.mxu1 }
 0x266   :  { %4313 = vmatmul.msk.f32.gmra.mxu0 %vm37_vm0, %v2328_v63  ;;  %v5621_v63 = vpop.f32.mrf.mxu3  ;;  %3716 = vmatpush.msrb.mxu3 %v3519_v38 }
 0x26b   :  { %v5607_v2 = vpop.f32.mrf.mxu0  ;;  %v5628_v27 = vpop.f32.mrf.mxu2 }
 0x26c   :  { %6372 = vst [vmem:[#allocation26_spill] sm:$0xff] %v5607_v2  ;;  %v3504_v2 = vld [vmem:[#allocation4 + $0xc8] sm:$0xff] }
 0x26d   :  { %v5626_v37 = vpop.f32.mrf.mxu1  ;;  %3674 = vmatpush.msrb.mxu2 %v3504_v2  ;;  %v3488_v2 = vld [vmem:[#allocation4 + $0x48] sm:$0xff] }
 0x26e   :  { %4314 = vmatmul.msk.f32.gmra.mxu0 %vm37_vm0, %v2329_v46  ;;  %v2331_v46 = vld [vmem:[#allocation2 + $0xc2] sm:$0xff] }
 0x26f   :  { %3675 = vmatpush.msrb.mxu2 %v3503_v56 }
 0x271   :  { %3676 = vmatpush.msrb.mxu2 %v3502_v0  ;;  %v3498_v0 = vld [vmem:[#allocation4 + $0x98] sm:$0xff] }
 0x273   :  { %v5614_v43 = vpop.f32.mrf.mxu0 }
 0x274   :  { %6373 = vst [vmem:[#allocation27_spill] sm:$0xff] %v5614_v43 }
 0x276   :  { %4315 = vmatmul.msk.f32.gmra.mxu0 %vm37_vm0, %v2330_v1  ;;  %v5630_v1 = vpop.f32.mrf.mxu3 }
 0x27b   :  { %v5623_v28 = vpop.f32.mrf.mxu0 }
 0x27c   :  { %6374 = vst [vmem:[#allocation25_spill] sm:$0xff] %v5623_v28  ;;  %v5635_v28 = vpop.f32.mrf.mxu1 }
 0x27e   :  { %4316 = vmatmul.msk.f32.gmra.mxu0 %vm37_vm0, %v2331_v46  ;;  %v5637_v46 = vpop.f32.mrf.mxu2  ;;  %v5641_v40 = vpop.f32.mrf.mxu3 }
 0x27f   :  { %6376 = vst [vmem:[#allocation31_spill] sm:$0xff] %v5637_v46 }
 0x280   :  { %6378 = vst [vmem:[#allocation34_spill] sm:$0xff] %v5641_v40 }
 0x283   :  { %v5632_v33 = vpop.f32.mrf.mxu0 }
 0x284   :  { %6375 = vst [vmem:[#allocation30_spill] sm:$0xff] %v5632_v33  ;;  %v5644_v41 = vpop.f32.mrf.mxu1  ;;  %v2334_v33 = vld [vmem:[#allocation2 + $0xe2] sm:$0xff] }
 0x286   :  { %4317 = vmatmul.msk.f32.gmra.mxu0 %vm37_vm0, %v2332_v9  ;;  %v5648_v9 = vpop.f32.mrf.mxu2  ;;  %v5651_v51 = vpop.f32.mrf.mxu3 }
 0x28b   :  { %v5639_v43 = vpop.f32.mrf.mxu0 }
 0x28c   :  { %6377 = vst [vmem:[#allocation29_spill] sm:$0xff] %v5639_v43 }
 0x28e   :  { %4318 = vmatmul.msk.f32.gmra.mxu0 %vm37_vm0, %v2333_v61  ;;  %v5653_v61 = vpop.f32.mrf.mxu1  ;;  %v5656_v11 = vpop.f32.mrf.mxu2 }
 0x28f   :  { %6380 = vst [vmem:[#allocation33_spill] sm:$0xff] %v5653_v61  ;;  %v5658_v39 = vpop.f32.mrf.mxu3 }
 0x290   :  { %6381 = vst [vmem:[#allocation37_spill] sm:$0xff] %v5656_v11 }
 0x291   :  { %6382 = vst [vmem:[#allocation38_spill] sm:$0xff] %v5658_v39 }
 0x293   :  { %v5646_v5 = vpop.f32.mrf.mxu0 }
 0x294   :  { %6379 = vst [vmem:[#allocation35_spill] sm:$0xff] %v5646_v5  ;;  %v3489_v5 = vld [vmem:[#allocation4 + $0x50] sm:$0xff] }
 0x295   :  { %3632 = vmatpush.msrb.mxu1 %v3489_v5  ;;  %v3518_v5 = vld [vmem:[#allocation4 + $0x138] sm:$0xff] }
 0x296   :  { %4319 = vmatmul.msk.f32.gmra.mxu0 %vm37_vm0, %v2334_v33  ;;  %v3501_v33 = vld [vmem:[#allocation4 + $0xb0] sm:$0xff]  ;;  %v5661_v12 = vpop.f32.mrf.mxu1  ;;  %3717 = vmatpush.msrb.mxu3 %v3518_v5  ;;  %v5669_v38 = vpop.f32.mrf.mxu2 }
 0x297   :  { %3677 = vmatpush.msrb.mxu2 %v3501_v33  ;;  %3633 = vmatpush.msrb.mxu1 %v3488_v2  ;;  %6383 = vst [vmem:[#allocation36_spill] sm:$0xff] %v5661_v12  ;;  %v3485_v33 = vld [vmem:[#allocation4 + $0x30] sm:$0xff]  ;;  %v5671_v5 = vpop.f32.mrf.mxu3 }
 0x298   :  { %v3517_v2 = vld [vmem:[#allocation4 + $0x130] sm:$0xff]  ;;  %6384 = vst [vmem:[#allocation40_spill] sm:$0xff] %v5669_v38 }
 0x299   :  { %3678 = vmatpush.msrb.mxu2 %v3500_v34  ;;  %3634 = vmatpush.msrb.mxu1 %v3487_v29  ;;  %v5667_v34 = vld [vmem:[%s6208_s2] ss:$0 sm:$0xff]  ;;  %v3496_v29 = vld [vmem:[#allocation4 + $0x88] sm:$0xff]  ;;  %6385 = vst [vmem:[#allocation39_spill] sm:$0xff] %v5671_v5 }
 0x29a   :  { %3718 = vmatpush.msrb.mxu3 %v3517_v2  ;;  %v3414_v2 = vld [vmem:[#allocation3 + $0x1] sm:$0xff]  ;;  %v3513_v5 = vld [vmem:[#allocation4 + $0x110] sm:$0xff] }
 0x29b   :  { %v2469_v43 = vpop.f32.mrf.mxu0  ;;  %3679 = vmatpush.msrb.mxu2 %v3499_v36  ;;  %v3484_v36 = vld [vmem:[#allocation4 + $0x28] sm:$0xff] }
 0x29c   :  { %v2565_v60 = vadd.f32 %v2469_v43, %v5425_v18  ;;  %v3483_v18 = vld [vmem:[#allocation4 + $0x20] sm:$0xff] }
 0x29d   :  { %3680 = vmatpush.msrb.mxu2 %v3498_v0  ;;  %v3515_v43 = vld [vmem:[#allocation4 + $0x120] sm:$0xff] }
 0x29e   :  { %4320 = vmatmul.msk.f32.gmra.mxu0 %vm37_vm0, %v2335_v25  ;;  %v3486_v25 = vld [vmem:[#allocation4 + $0x38] sm:$0xff]  ;;  %v2601_v16 = vadd.f32 %v5667_v34, %v2565_v60  ;;  %v5677_v60 = vpop.f32.mrf.mxu1 }
 0x29f   :  { %3635 = vmatpush.msrb.mxu1 %v3486_v25  ;;  %3681 = vmatpush.msrb.mxu2 %v3497_v53  ;;  %v2337_v25 = vld [vmem:[#allocation2 + $0x10a] sm:$0xff]  ;;  %6386 = vst [vmem:[#allocation42_spill] sm:$0xff] %v5677_v60  ;;  %v5683_v60 = vpop.f32.mrf.mxu3 }
 0x2a0   :  { %v3514_v53 = vld [vmem:[#allocation4 + $0x118] sm:$0xff]  ;;  %6388 = vst [vmem:[#allocation41_spill] sm:$0xff] %v5683_v60 }
 0x2a1   :  { %3636 = vmatpush.msrb.mxu1 %v3485_v33  ;;  %3682 = vmatpush.msrb.mxu2 %v3496_v29  ;;  %v2633_v29 = vmax.f32 %v2601_v16, 0.0 }
 0x2a3   :  { %v2472_v56 = vpop.f32.mrf.mxu0  ;;  %3637 = vmatpush.msrb.mxu1 %v3484_v36  ;;  %3683 = vmatpush.msrb.mxu2 %v3495_v30 }
 0x2a4   :  { %3684 = vmatmul.f32.vlgmr.msrb.gmra.mxu2 %v3414_v2  ;;  %v2566_v30 = vadd.f32 %v2472_v56, %v5441_v7  ;;  %v3511_v2 = vld [vmem:[#allocation4 + $0x100] sm:$0xff] }
 0x2a5   :  { %3638 = vmatpush.msrb.mxu1 %v3483_v18  ;;  %v4346_v56 = vld [vmem:[#allocation3] sm:$0xff] }
 0x2a6   :  { %4321 = vmatmul.msk.f32.gmra.mxu0 %vm37_vm0, %v2336_v59  ;;  %v3516_v59 = vld [vmem:[#allocation4 + $0x128] sm:$0xff] }
 0x2a7   :  { %3719 = vmatpush.msrb.mxu3 %v3516_v59  ;;  %3639 = vmatpush.msrb.mxu1 %v3482_v23  ;;  %v3481_v59 = vld [vmem:[#allocation4 + $0x10] sm:$0xff] }
 0x2a9   :  { %3720 = vmatpush.msrb.mxu3 %v3515_v43  ;;  %3640 = vmatpush.msrb.mxu1 %v3481_v59  ;;  %v5680_v43 = vpop.f32.mrf.mxu2 }
 0x2aa   :  { %6387 = vst [vmem:[#allocation43_spill] sm:$0xff] %v5680_v43 }
 0x2ab   :  { %v2475_v0 = vpop.f32.mrf.mxu0  ;;  %3721 = vmatpush.msrb.mxu3 %v3514_v53 }
 0x2ac   :  { %v2567_v33 = vadd.f32 %v2475_v0, %v5457_v26  ;;  %v3480_v26 = vld [vmem:[#allocation4 + $0x8] sm:$0xff] }
 0x2ad   :  { %3722 = vmatpush.msrb.mxu3 %v3513_v5  ;;  %v3512_v0 = vld [vmem:[#allocation4 + $0x108] sm:$0xff]  ;;  %3641 = vmatpush.msrb.mxu1 %v3480_v26 }
 0x2ae   :  { %v2603_v36 = vadd.f32 %v5667_v34, %v2567_v33  ;;  %4322 = vmatmul.msk.f32.gmra.mxu0 %vm37_vm0, %v2337_v25  ;;  %v2338_v25 = vld [vmem:[#allocation2 + $0x112] sm:$0xff] }
 0x2af   :  { %3723 = vmatpush.msrb.mxu3 %v3512_v0  ;;  %v3479_v33 = vld [vmem:[#allocation4] sm:$0xff] }
 0x2b0   :  { %v2635_v38 = vmax.f32 %v2603_v36, 0.0  ;;  %3642 = vmatpush.msrb.mxu1 %v3479_v33  ;;  %v3422_v5 = vld [vmem:[#allocation3 + $0x2] sm:$0xff] }
 0x2b1   :  { %3724 = vmatpush.msrb.mxu3 %v3511_v2  ;;  %3643 = vmatmul.f32.vlgmr.msrb.gmra.mxu1 %v4346_v56 }
 0x2b2   :  { %v2665_v18 = vmax.f32 %v2633_v29, %v2635_v38  ;;  %v2602_v38 = vadd.f32 %v5667_v34, %v2566_v30  ;;  %3725 = vmatmul.f32.vlgmr.msrb.gmra.mxu3 %v3422_v5 }
 0x2b3   :  { %v2478_v23 = vpop.f32.mrf.mxu0 }
 0x2b4   :  { %v2697_v16 = vrot.slane %v2665_v18, 2  ;;  %v2698_v53 = vrot.slane %v2665_v18, 4  ;;  %v2699_v36 = vrot.slane %v2665_v18, 6  ;;  %v2794_v59 = vsel %vm2793_vm3, %v2665_v18, -inf }
 0x2b5   :  { %v2795_v12 = vrot.slane %v2794_v59, 4  ;;  %v2568_v7 = vadd.f32 %v2478_v23, %v5473_v49  ;;  %v2634_v30 = vmax.f32 %v2602_v38, 0.0 }
 0x2b6   :  { %v2801_v29 = vsel %vm2793_vm3, %v2697_v16, -inf  ;;  %v2808_v26 = vsel %vm2793_vm3, %v2698_v53, -inf  ;;  %v2815_v0 = vsel %vm2793_vm3, %v2699_v36, -inf  ;;  %4323 = vmatmul.msk.f32.gmra.mxu0 %vm37_vm0, %v2338_v25  ;;  %v5692_v16 = vpop.f32.mrf.mxu1  ;;  %v2339_v25 = vld [vmem:[#allocation2 + $0x122] sm:$0xff] }
 0x2b7   :  { %v2796_v18 = vmax.f32 %v2794_v59, %v2795_v12  ;;  %v2802_v33 = vrot.slane %v2801_v29, 4  ;;  %v2809_v60 = vrot.slane %v2808_v26, 4  ;;  %v2816_v43 = vrot.slane %v2815_v0, 4  ;;  %6389 = vst [vmem:[#allocation45_spill] sm:$0xff] %v5692_v16  ;;  %v5694_v12 = vpop.f32.mrf.mxu2 }
 0x2b8   :  { %v2604_v49 = vadd.f32 %v5667_v34, %v2568_v7  ;;  %6390 = vst [vmem:[#allocation46_spill] sm:$0xff] %v5694_v12  ;;  %v2340_v12 = vld [vmem:[#allocation2 + $0x12a] sm:$0xff] }
 0x2b9   :  { %v2797_v23 = vrot.slane %v2796_v18, 2  ;;  %v2803_v2 = vmax.f32 %v2801_v29, %v2802_v33  ;;  %v2810_v56 = vmax.f32 %v2808_v26, %v2809_v60  ;;  %v2817_v24 = vmax.f32 %v2815_v0, %v2816_v43  ;;  %v5698_v43 = vpop.f32.mrf.mxu3 }
 0x2ba   :  { %v2636_v44 = vmax.f32 %v2604_v49, 0.0  ;;  %6391 = vst [vmem:[#allocation44_spill] sm:$0xff] %v5698_v43 }
 0x2bb   :  { %v2798_v53 = vmax.f32 %v2796_v18, %v2797_v23  ;;  %v2804_v22 = vrot.slane %v2803_v2, 2  ;;  %v2811_v36 = vrot.slane %v2810_v56, 2  ;;  %v2481_v52 = vpop.f32.mrf.mxu0  ;;  %v2818_v40 = vrot.slane %v2817_v24, 2 }
 0x2bc   :  { %v2666_v5 = vmax.f32 %v2634_v30, %v2636_v44 }
 0x2bd   :  { %v2805_v59 = vmax.f32 %v2803_v2, %v2804_v22  ;;  %v2812_v39 = vmax.f32 %v2810_v56, %v2811_v36  ;;  %v2799_v38 = vrot.slane %v2798_v53, 1  ;;  %v2819_v23 = vmax.f32 %v2817_v24, %v2818_v40 }
 0x2be   :  { %v2700_v7 = vrot.slane %v2666_v5, 2  ;;  %v2701_v11 = vrot.slane %v2666_v5, 4  ;;  %v2702_v29 = vrot.slane %v2666_v5, 6  ;;  %v2822_v60 = vsel %vm2793_vm3, %v2666_v5, -inf  ;;  %4324 = vmatmul.msk.f32.gmra.mxu0 %vm37_vm0, %v2339_v25 }
 0x2bf   :  { %v2806_v26 = vrot.slane %v2805_v59, 1  ;;  %v2813_v0 = vrot.slane %v2812_v39, 1  ;;  %v2823_v18 = vrot.slane %v2822_v60, 4  ;;  %v2800_v25 = vmax.f32 %v2798_v53, %v2799_v38  ;;  %v5707_v53 = vpop.f32.mrf.mxu2 }
 0x2c0   :  { %v2829_v44 = vsel %vm2793_vm3, %v2700_v7, -inf  ;;  %v2836_v33 = vsel %vm2793_vm3, %v2701_v11, -inf  ;;  %v2843_v22 = vsel %vm2793_vm3, %v2702_v29, -inf  ;;  %v5703_v7 = vpop.f32.mrf.mxu1  ;;  %v2820_v11 = vrot.slane %v2819_v23, 1 }
 0x2c1   :  { %v2807_v49 = vmax.f32 %v2805_v59, %v2806_v26  ;;  %v2830_v2 = vrot.slane %v2829_v44, 4  ;;  %v2824_v56 = vmax.f32 %v2822_v60, %v2823_v18  ;;  %v2837_v30 = vrot.slane %v2836_v33, 4 }
 0x2c2   :  { %v2844_v36 = vrot.slane %v2843_v22, 4  ;;  %v2814_v16 = vmax.f32 %v2812_v39, %v2813_v0  ;;  %v2569_v39 = vadd.f32 %v2481_v52, %v5489_v20  ;;  %v2341_v20 = vld [vmem:[#allocation2 + $0x13a] sm:$0xff] }
 0x2c3   :  { %v2831_v5 = vmax.f32 %v2829_v44, %v2830_v2  ;;  %v2484_v43 = vpop.f32.mrf.mxu0  ;;  %v2825_v61 = vrot.slane %v2824_v56, 2  ;;  %v2838_v46 = vmax.f32 %v2836_v33, %v2837_v30  ;;  %v3327_v29 = vsel %vm3326_vm4, %v2807_v49, %v2800_v25  ;;  %v5711_v33 = vpop.f32.mrf.mxu3 }
 0x2c4   :  { %v2845_v10 = vmax.f32 %v2843_v22, %v2844_v36  ;;  %v3329_v26 = vsel %vm3328_vm5, %v2814_v16, %v3327_v29  ;;  %v2821_v22 = vmax.f32 %v2819_v23, %v2820_v11 }
 0x2c5   :  { %v2832_v24 = vrot.slane %v2831_v5, 2  ;;  %v2826_v40 = vmax.f32 %v2824_v56, %v2825_v61  ;;  %v2839_v59 = vrot.slane %v2838_v46, 2 }
 0x2c6   :  { %v2846_v60 = vrot.slane %v2845_v10, 2  ;;  %4325 = vmatmul.msk.f32.gmra.mxu0 %vm37_vm0, %v2340_v12  ;;  %v3331_v12 = vsel %vm3330_vm6, %v2821_v22, %v3329_v26 }
 0x2c7   :  { %v2833_v38 = vmax.f32 %v2831_v5, %v2832_v24  ;;  %v2827_v0 = vrot.slane %v2826_v40, 1  ;;  %v2840_v18 = vmax.f32 %v2838_v46, %v2839_v59 }
 0x2c8   :  { %v2847_v44 = vmax.f32 %v2845_v10, %v2846_v60  ;;  %v2605_v10 = vadd.f32 %v5667_v34, %v2569_v39  ;;  %v5721_v29 = vpop.f32.mrf.mxu1  ;;  %v5724_v60 = vpop.f32.mrf.mxu2 }
 0x2c9   :  { %v2834_v49 = vrot.slane %v2833_v38, 1  ;;  %v2828_v61 = vmax.f32 %v2826_v40, %v2827_v0  ;;  %v2841_v2 = vrot.slane %v2840_v18, 1  ;;  %v2342_v0 = vld [vmem:[#allocation2 + $0x142] sm:$0xff] }
 0x2ca   :  { %v2848_v56 = vrot.slane %v2847_v44, 1  ;;  %v2637_v40 = vmax.f32 %v2605_v10, 0.0 }
 0x2cb   :  { %v2835_v30 = vmax.f32 %v2833_v38, %v2834_v49  ;;  %v2487_v52 = vpop.f32.mrf.mxu0  ;;  %v2842_v16 = vmax.f32 %v2840_v18, %v2841_v2  ;;  %v3333_v46 = vsel %vm3332_vm7, %v2828_v61, %v3331_v12  ;;  %v5727_v39 = vpop.f32.mrf.mxu3 }
 0x2cc   :  { %v2571_v23 = vadd.f32 %v2487_v52, %v5518_v17  ;;  %v2849_v36 = vmax.f32 %v2847_v44, %v2848_v56  ;;  %v2570_v17 = vadd.f32 %v2484_v43, %v5505_v45  ;;  %6392 = vst [vmem:[#allocation48_spill] sm:$0xff] %v5727_v39 }
 0x2cd   :  { %v3335_v25 = vsel %vm3334_vm8, %v2835_v30, %v3333_v46 }
 0x2ce   :  { %v3337_v5 = vsel %vm3336_vm9, %v2842_v16, %v3335_v25  ;;  %v2607_v11 = vadd.f32 %v5667_v34, %v2571_v23  ;;  %4326 = vmatmul.msk.f32.gmra.mxu0 %vm37_vm0, %v2341_v20  ;;  %v2606_v56 = vadd.f32 %v5667_v34, %v2570_v17 }
 0x2cf   :  { %v3339_v24 = vsel %vm3338_vm10, %v2849_v36, %v3337_v5 }
 0x2d0   :  { %3398 = vst [vmem:[#allocation3 + $0x11] sm:$0xff] %v3339_v24  ;;  %v2639_v59 = vmax.f32 %v2607_v11, 0.0  ;;  %3687 = vmatmul.f32.gmra.mxu2 %v3339_v24  ;;  %v2638_v24 = vmax.f32 %v2606_v56, 0.0 }
 0x2d2   :  { %v2667_v38 = vmax.f32 %v2637_v40, %v2639_v59  ;;  %v5739_v59 = vpop.f32.mrf.mxu2 }
 0x2d3   :  { %v2490_v26 = vpop.f32.mrf.mxu0  ;;  %6394 = vst [vmem:[#allocation51_spill] sm:$0xff] %v5739_v59 }
 0x2d4   :  { %v2703_v18 = vrot.slane %v2667_v38, 2  ;;  %v2704_v44 = vrot.slane %v2667_v38, 4  ;;  %v2705_v22 = vrot.slane %v2667_v38, 6  ;;  %v2850_v49 = vsel %vm2793_vm3, %v2667_v38, -inf }
 0x2d5   :  { %v2851_v61 = vrot.slane %v2850_v49, 4  ;;  %v2572_v2 = vadd.f32 %v2490_v26, %v5529_v58  ;;  %v5737_v58 = vpop.f32.mrf.mxu1 }
 0x2d6   :  { %v2857_v12 = vsel %vm2793_vm3, %v2703_v18, -inf  ;;  %v2864_v30 = vsel %vm2793_vm3, %v2704_v44, -inf  ;;  %v2871_v45 = vsel %vm2793_vm3, %v2705_v22, -inf  ;;  %4327 = vmatmul.msk.f32.gmra.mxu0 %vm37_vm0, %v2342_v0  ;;  %6393 = vst [vmem:[#allocation50_spill] sm:$0xff] %v5737_v58  ;;  %v2343_v18 = vld [vmem:[#allocation2 + $0x152] sm:$0xff] }
 0x2d7   :  { %v2852_v43 = vmax.f32 %v2850_v49, %v2851_v61  ;;  %v2858_v52 = vrot.slane %v2857_v12, 4  ;;  %v2865_v20 = vrot.slane %v2864_v30, 4  ;;  %v2872_v16 = vrot.slane %v2871_v45, 4  ;;  %v3407_v46 = vld [vmem:[#allocation3 + $0x10] sm:$0xff]  ;;  %v6395_v44 = vld [vmem:[#allocation47_spill] sm:$0xff] }
 0x2d8   :  { %v3423_v10 = vld [vmem:[#allocation3 + $0x12] sm:$0xff]  ;;  %v2608_v23 = vadd.f32 %v5667_v34, %v2572_v2  ;;  %3646 = vmatmul.f32.gmra.mxu1 %v3407_v46  ;;  %v1460_v22 = vadd.f32 %v5382_v57, %v6395_v44  ;;  %v5745_v46 = vpop.f32.mrf.mxu3 }
 0x2d9   :  { %3728 = vmatmul.f32.gmra.mxu3 %v3423_v10  ;;  %v2853_v36 = vrot.slane %v2852_v43, 2  ;;  %v2859_v25 = vmax.f32 %v2857_v12, %v2858_v52  ;;  %v2866_v5 = vmax.f32 %v2864_v30, %v2865_v20  ;;  %v2873_v11 = vmax.f32 %v2871_v45, %v2872_v16  ;;  %v6396_v61 = vld [vmem:[#allocation52_spill] sm:$0xff]  ;;  %6397 = vst [vmem:[#allocation53_spill] sm:$0xff] %v5745_v46 }
 0x2da   :  { %v2640_v40 = vmax.f32 %v2608_v23, 0.0  ;;  %v1462_v2 = vadd.f32 %v5413_v55, %v6396_v61  ;;  %v1738_v16 = vadd.f32 %v5583_v4, %v1460_v22 }
 0x2db   :  { %v2854_v17 = vmax.f32 %v2852_v43, %v2853_v36  ;;  %v2860_v38 = vrot.slane %v2859_v25, 2  ;;  %v2867_v26 = vrot.slane %v2866_v5, 2  ;;  %v2493_v0 = vpop.f32.mrf.mxu0  ;;  %v2874_v56 = vrot.slane %v2873_v11, 2 }
 0x2dc   :  { %v2668_v49 = vmax.f32 %v2638_v24, %v2640_v40  ;;  %v1740_v4 = vadd.f32 %v5605_v15, %v1462_v2 }
 0x2dd   :  { %v2861_v12 = vmax.f32 %v2859_v25, %v2860_v38  ;;  %v2868_v30 = vmax.f32 %v2866_v5, %v2867_v26  ;;  %v2855_v10 = vrot.slane %v2854_v17, 1  ;;  %v2017_v5 = vadd.f32 %v5585_v42, %v1738_v16  ;;  %v5755_v22 = vpop.f32.mrf.mxu1 }
 0x2de   :  { %v2706_v45 = vrot.slane %v2668_v49, 2  ;;  %v2707_v52 = vrot.slane %v2668_v49, 4  ;;  %v2708_v20 = vrot.slane %v2668_v49, 6  ;;  %v2878_v43 = vsel %vm2793_vm3, %v2668_v49, -inf  ;;  %4328 = vmatmul.msk.f32.gmra.mxu0 %vm37_vm0, %v2343_v18 }
 0x2df   :  { %v2862_v57 = vrot.slane %v2861_v12, 1  ;;  %v2869_v23 = vrot.slane %v2868_v30, 1  ;;  %v2879_v36 = vrot.slane %v2878_v43, 4  ;;  %v2875_v38 = vmax.f32 %v2873_v11, %v2874_v56 }
 0x2e0   :  { %v2885_v55 = vsel %vm2793_vm3, %v2706_v45, -inf  ;;  %v2892_v24 = vsel %vm2793_vm3, %v2707_v52, -inf  ;;  %v2899_v25 = vsel %vm2793_vm3, %v2708_v20, -inf  ;;  %v2856_v61 = vmax.f32 %v2854_v17, %v2855_v10  ;;  %v2344_v45 = vld [vmem:[#allocation2 + $0x15a] sm:$0xff]  ;;  %v6398_v10 = vld [vmem:[#allocation49_spill] sm:$0xff] }
 0x2e1   :  { %v2863_v40 = vmax.f32 %v2861_v12, %v2862_v57  ;;  %v2886_v26 = vrot.slane %v2885_v55, 4  ;;  %v2880_v44 = vmax.f32 %v2878_v43, %v2879_v36  ;;  %v2893_v49 = vrot.slane %v2892_v24, 4  ;;  %v5758_v12 = vpop.f32.mrf.mxu2  ;;  %v5765_v57 = vpop.f32.mrf.mxu3 }
 0x2e2   :  { %v2900_v18 = vrot.slane %v2899_v25, 4  ;;  %v2870_v58 = vmax.f32 %v2868_v30, %v2869_v23  ;;  %v2295_v42 = vadd.f32 %v5587_v6, %v2017_v5  ;;  %v2876_v11 = vrot.slane %v2875_v38, 1 }
 0x2e3   :  { %v2887_v46 = vmax.f32 %v2885_v55, %v2886_v26  ;;  %v2496_v59 = vpop.f32.mrf.mxu0  ;;  %v2881_v52 = vrot.slane %v2880_v44, 2  ;;  %v2894_v39 = vmax.f32 %v2892_v24, %v2893_v49  ;;  %v3340_v56 = vsel %vm3326_vm4, %v2863_v40, %v2856_v61 }
 0x2e4   :  { %v2901_v20 = vmax.f32 %v2899_v25, %v2900_v18  ;;  %v2019_v15 = vadd.f32 %v5609_v31, %v1740_v4  ;;  %v1461_v30 = vadd.f32 %v5397_v14, %v6398_v10  ;;  %v2573_v6 = vadd.f32 %v2493_v0, %v2295_v42  ;;  %v6399_v4 = vld [vmem:[#allocation55_spill] sm:$0xff] }
 0x2e5   :  { %v2888_v43 = vrot.slane %v2887_v46, 2  ;;  %v2882_v2 = vmax.f32 %v2880_v44, %v2881_v52  ;;  %v2895_v16 = vrot.slane %v2894_v39, 2  ;;  %v3341_v36 = vsel %vm3328_vm5, %v2870_v58, %v3340_v56 }
 0x2e6   :  { %v2902_v17 = vrot.slane %v2901_v20, 2  ;;  %4329 = vmatmul.msk.f32.gmra.mxu0 %vm37_vm0, %v2344_v45  ;;  %v1739_v5 = vadd.f32 %v5595_v54, %v1461_v30  ;;  %v2877_v31 = vmax.f32 %v2875_v38, %v2876_v11  ;;  %v2297_v26 = vadd.f32 %v5612_v3, %v2019_v15 }
 0x2e7   :  { %v2889_v23 = vmax.f32 %v2887_v46, %v2888_v43  ;;  %v2883_v55 = vrot.slane %v2882_v2, 1  ;;  %v2896_v24 = vmax.f32 %v2894_v39, %v2895_v16  ;;  %v1463_v14 = vadd.f32 %v5429_v47, %v6399_v4  ;;  %v2345_v39 = vld [vmem:[#allocation2 + $0x16a] sm:$0xff] }
 0x2e8   :  { %v2903_v25 = vmax.f32 %v2901_v20, %v2902_v17  ;;  %v2018_v46 = vadd.f32 %v5597_v13, %v1739_v5  ;;  %v3342_v0 = vsel %vm3330_vm6, %v2877_v31, %v3341_v36  ;;  %v2609_v38 = vadd.f32 %v5667_v34, %v2573_v6  ;;  %v5777_v20 = vpop.f32.mrf.mxu1  ;;  %v2346_v36 = vld [vmem:[#allocation2 + $0x172] sm:$0xff] }
 0x2e9   :  { %v2890_v40 = vrot.slane %v2889_v23, 1  ;;  %v2884_v44 = vmax.f32 %v2882_v2, %v2883_v55  ;;  %v2897_v49 = vrot.slane %v2896_v24, 1  ;;  %v1741_v3 = vadd.f32 %v5616_v62, %v1463_v14  ;;  %v5784_v43 = vpop.f32.mrf.mxu2  ;;  %v5788_v17 = vpop.f32.mrf.mxu3 }
 0x2ea   :  { %v2904_v18 = vrot.slane %v2903_v25, 1  ;;  %v2296_v2 = vadd.f32 %v5602_v50, %v2018_v46  ;;  %v2641_v62 = vmax.f32 %v2609_v38, 0.0 }
 0x2eb   :  { %v2891_v58 = vmax.f32 %v2889_v23, %v2890_v40  ;;  %v2499_v61 = vpop.f32.mrf.mxu0  ;;  %v2898_v45 = vmax.f32 %v2896_v24, %v2897_v49  ;;  %v3343_v54 = vsel %vm3332_vm7, %v2884_v44, %v3342_v0  ;;  %v2020_v56 = vadd.f32 %v5619_v35, %v1741_v3 }
 0x2ec   :  { %v2575_v52 = vadd.f32 %v2499_v61, %v2297_v26  ;;  %v2905_v42 = vmax.f32 %v2903_v25, %v2904_v18  ;;  %v2574_v10 = vadd.f32 %v2496_v59, %v2296_v2 }
 0x2ed   :  { %v3344_v47 = vsel %vm3334_vm8, %v2891_v58, %v3343_v54  ;;  %v2298_v23 = vadd.f32 %v5621_v63, %v2020_v56  ;;  %v2347_v56 = vld [vmem:[#allocation2 + $0x182] sm:$0xff] }
 0x2ee   :  { %v3345_v13 = vsel %vm3336_vm9, %v2898_v45, %v3344_v47  ;;  %v2611_v11 = vadd.f32 %v5667_v34, %v2575_v52  ;;  %4330 = vmatmul.msk.f32.gmra.mxu0 %vm37_vm0, %v2345_v39  ;;  %v2610_v50 = vadd.f32 %v5667_v34, %v2574_v10 }
 0x2ef   :  { %v3346_v15 = vsel %vm3338_vm10, %v2905_v42, %v3345_v13 }
 0x2f0   :  { %3399 = vst [vmem:[#allocation3 + $0x21] sm:$0xff] %v3346_v15  ;;  %v2643_v16 = vmax.f32 %v2611_v11, 0.0  ;;  %3690 = vmatmul.f32.gmra.mxu2 %v3346_v15  ;;  %v5797_v63 = vpop.f32.mrf.mxu1  ;;  %v2642_v38 = vmax.f32 %v2610_v50, 0.0  ;;  %v6400_v15 = vld [vmem:[#allocation58_spill] sm:$0xff] }
 0x2f1   :  { %v5800_v58 = vpop.f32.mrf.mxu2  ;;  %v5802_v3 = vpop.f32.mrf.mxu3  ;;  %v1464_v2 = vadd.f32 %v5445_v19, %v6400_v15 }
 0x2f2   :  { %v2669_v30 = vmax.f32 %v2641_v62, %v2643_v16  ;;  %v1466_v16 = vadd.f32 %v5477_v8, %v5205_v32 }
 0x2f3   :  { %v2502_v6 = vpop.f32.mrf.mxu0 }
 0x2f4   :  { %v2709_v55 = vrot.slane %v2669_v30, 2  ;;  %v2710_v35 = vrot.slane %v2669_v30, 4  ;;  %v2711_v24 = vrot.slane %v2669_v30, 6  ;;  %v2906_v25 = vsel %vm2793_vm3, %v2669_v30, -inf }
 0x2f5   :  { %v2907_v5 = vrot.slane %v2906_v25, 4  ;;  %v2576_v31 = vadd.f32 %v2502_v6, %v2298_v23 }
 0x2f6   :  { %v2913_v40 = vsel %vm2793_vm3, %v2709_v55, -inf  ;;  %v2920_v26 = vsel %vm2793_vm3, %v2710_v35, -inf  ;;  %v2927_v59 = vsel %vm2793_vm3, %v2711_v24, -inf  ;;  %4331 = vmatmul.msk.f32.gmra.mxu0 %vm37_vm0, %v2346_v36  ;;  %v1742_v24 = vadd.f32 %v5626_v37, %v1464_v2 }
 0x2f7   :  { %v2908_v44 = vmax.f32 %v2906_v25, %v2907_v5  ;;  %v2914_v49 = vrot.slane %v2913_v40, 4  ;;  %v2921_v18 = vrot.slane %v2920_v26, 4  ;;  %v2928_v4 = vrot.slane %v2927_v59, 4  ;;  %v3408_v14 = vld [vmem:[#allocation3 + $0x20] sm:$0xff] }
 0x2f8   :  { %v3424_v46 = vld [vmem:[#allocation3 + $0x22] sm:$0xff]  ;;  %v2612_v0 = vadd.f32 %v5667_v34, %v2576_v31  ;;  %3649 = vmatmul.f32.gmra.mxu1 %v3408_v14  ;;  %v1744_v14 = vadd.f32 %v5644_v41, %v1466_v16 }
 0x2f9   :  { %3731 = vmatmul.f32.gmra.mxu3 %v3424_v46  ;;  %v2909_v61 = vrot.slane %v2908_v44, 2  ;;  %v2915_v39 = vmax.f32 %v2913_v40, %v2914_v49  ;;  %v2922_v45 = vmax.f32 %v2920_v26, %v2921_v18  ;;  %v2929_v54 = vmax.f32 %v2927_v59, %v2928_v4  ;;  %v5815_v26 = vpop.f32.mrf.mxu1  ;;  %v5818_v46 = vpop.f32.mrf.mxu2 }
 0x2fa   :  { %v2644_v52 = vmax.f32 %v2612_v0, 0.0  ;;  %v2021_v40 = vadd.f32 %v5628_v27, %v1742_v24  ;;  %v2023_v41 = vadd.f32 %v5648_v9, %v1744_v14  ;;  %v6404_v14 = vld [vmem:[#allocation33_spill] sm:$0xff] }
 0x2fb   :  { %v2910_v42 = vmax.f32 %v2908_v44, %v2909_v61  ;;  %v2916_v47 = vrot.slane %v2915_v39, 2  ;;  %v2923_v13 = vrot.slane %v2922_v45, 2  ;;  %v2505_v11 = vpop.f32.mrf.mxu0  ;;  %v2930_v23 = vrot.slane %v2929_v54, 2 }
 0x2fc   :  { %v2670_v62 = vmax.f32 %v2642_v38, %v2644_v52  ;;  %v2301_v9 = vadd.f32 %v5651_v51, %v2023_v41 }
 0x2fd   :  { %v2917_v10 = vmax.f32 %v2915_v39, %v2916_v47  ;;  %v2924_v30 = vmax.f32 %v2922_v45, %v2923_v13  ;;  %v2911_v25 = vrot.slane %v2910_v42, 1  ;;  %v2931_v44 = vmax.f32 %v2929_v54, %v2930_v23  ;;  %v2348_v45 = vld [vmem:[#allocation2 + $0x18a] sm:$0xff] }
 0x2fe   :  { %v2712_v6 = vrot.slane %v2670_v62, 2  ;;  %v2713_v36 = vrot.slane %v2670_v62, 4  ;;  %v2714_v55 = vrot.slane %v2670_v62, 6  ;;  %v2934_v35 = vsel %vm2793_vm3, %v2670_v62, -inf  ;;  %4332 = vmatmul.msk.f32.gmra.mxu0 %vm37_vm0, %v2347_v56  ;;  %v5821_v56 = vpop.f32.mrf.mxu3 }
 0x2ff   :  { %v2918_v5 = vrot.slane %v2917_v10, 1  ;;  %v2925_v31 = vrot.slane %v2924_v30, 1  ;;  %v2935_v19 = vrot.slane %v2934_v35, 4  ;;  %v2912_v0 = vmax.f32 %v2910_v42, %v2911_v25 }
 0x300   :  { %v2941_v50 = vsel %vm2793_vm3, %v2712_v6, -inf  ;;  %v2948_v32 = vsel %vm2793_vm3, %v2713_v36, -inf  ;;  %v2955_v8 = vsel %vm2793_vm3, %v2714_v55, -inf  ;;  %v2299_v13 = vadd.f32 %v5630_v1, %v2021_v40 }
 0x301   :  { %v2919_v59 = vmax.f32 %v2917_v10, %v2918_v5  ;;  %v2942_v49 = vrot.slane %v2941_v50, 4  ;;  %v2936_v18 = vmax.f32 %v2934_v35, %v2935_v19  ;;  %v2949_v4 = vrot.slane %v2948_v32, 4  ;;  %v6401_v10 = vld [vmem:[#allocation59_spill] sm:$0xff] }
 0x302   :  { %v2956_v37 = vrot.slane %v2955_v8, 4  ;;  %v2926_v38 = vmax.f32 %v2924_v30, %v2925_v31  ;;  %v2932_v54 = vrot.slane %v2931_v44, 1  ;;  %v1465_v30 = vadd.f32 %v5461_v21, %v6401_v10  ;;  %v6403_v21 = vld [vmem:[#allocation31_spill] sm:$0xff]  ;;  %v6407_v10 = vld [vmem:[#allocation38_spill] sm:$0xff] }
 0x303   :  { %v2943_v61 = vmax.f32 %v2941_v50, %v2942_v49  ;;  %v2508_v39 = vpop.f32.mrf.mxu0  ;;  %v2937_v52 = vrot.slane %v2936_v18, 2  ;;  %v2950_v47 = vmax.f32 %v2948_v32, %v2949_v4  ;;  %v3347_v15 = vsel %vm3326_vm4, %v2919_v59, %v2912_v0  ;;  %v6402_v32 = vld [vmem:[#allocation14_spill] sm:$0xff]  ;;  %v2349_v4 = vld [vmem:[#allocation2 + $0x19a] sm:$0xff] }
 0x304   :  { %v2957_v27 = vmax.f32 %v2955_v8, %v2956_v37  ;;  %v2577_v6 = vadd.f32 %v2505_v11, %v2299_v13  ;;  %v3348_v1 = vsel %vm3328_vm5, %v2926_v38, %v3347_v15  ;;  %v1743_v24 = vadd.f32 %v5635_v28, %v1465_v30  ;;  %v5834_v11 = vpop.f32.mrf.mxu1  ;;  %v6406_v15 = vld [vmem:[#allocation34_spill] sm:$0xff] }
 0x305   :  { %v2944_v2 = vrot.slane %v2943_v61, 2  ;;  %v2938_v62 = vmax.f32 %v2936_v18, %v2937_v52  ;;  %v2951_v16 = vrot.slane %v2950_v47, 2  ;;  %v2933_v25 = vmax.f32 %v2931_v44, %v2932_v54 }
 0x306   :  { %v2958_v42 = vrot.slane %v2957_v27, 2  ;;  %4333 = vmatmul.msk.f32.gmra.mxu0 %vm37_vm0, %v2348_v45  ;;  %v1467_v8 = vadd.f32 %v6402_v32, %v5217_v48  ;;  %v2022_v40 = vadd.f32 %v6403_v21, %v1743_v24  ;;  %v2613_v51 = vadd.f32 %v5667_v34, %v2577_v6  ;;  %v5847_v13 = vpop.f32.mrf.mxu3  ;;  %v2350_v6 = vld [vmem:[#allocation2 + $0x1a2] sm:$0xff] }
 0x307   :  { %v2945_v23 = vmax.f32 %v2943_v61, %v2944_v2  ;;  %v2939_v36 = vrot.slane %v2938_v62, 1  ;;  %v2952_v55 = vmax.f32 %v2950_v47, %v2951_v16  ;;  %v3349_v59 = vsel %vm3330_vm6, %v2933_v25, %v3348_v1  ;;  %v5840_v61 = vpop.f32.mrf.mxu2  ;;  %v6405_v47 = vld [vmem:[#allocation37_spill] sm:$0xff] }
 0x308   :  { %v2959_v35 = vmax.f32 %v2957_v27, %v2958_v42  ;;  %v1745_v0 = vadd.f32 %v6404_v14, %v1467_v8  ;;  %v2300_v2 = vadd.f32 %v6406_v15, %v2022_v40  ;;  %v2645_v41 = vmax.f32 %v2613_v51, 0.0 }
 0x309   :  { %v2946_v5 = vrot.slane %v2945_v23, 1  ;;  %v2940_v31 = vmax.f32 %v2938_v62, %v2939_v36  ;;  %v2953_v19 = vrot.slane %v2952_v55, 1 }
 0x30a   :  { %v2960_v50 = vrot.slane %v2959_v35, 1  ;;  %v2024_v27 = vadd.f32 %v6405_v47, %v1745_v0  ;;  %v2578_v16 = vadd.f32 %v2508_v39, %v2300_v2  ;;  %v6408_v47 = vld [vmem:[#allocation62_spill] sm:$0xff]  ;;  %v6410_v2 = vld [vmem:[#allocation64_spill] sm:$0xff] }
 0x30b   :  { %v2947_v49 = vmax.f32 %v2945_v23, %v2946_v5  ;;  %v2511_v18 = vpop.f32.mrf.mxu0  ;;  %v2954_v28 = vmax.f32 %v2952_v55, %v2953_v19  ;;  %v3350_v44 = vsel %vm3332_vm7, %v2940_v31, %v3349_v59 }
 0x30c   :  { %v2579_v37 = vadd.f32 %v2511_v18, %v2301_v9  ;;  %v2961_v48 = vmax.f32 %v2959_v35, %v2960_v50  ;;  %v2302_v30 = vadd.f32 %v6407_v10, %v2024_v27  ;;  %v5853_v24 = vpop.f32.mrf.mxu1  ;;  %v2614_v9 = vadd.f32 %v5667_v34, %v2578_v16  ;;  %v6409_v27 = vld [vmem:[#allocation16_spill] sm:$0xff] }
 0x30d   :  { %v3351_v45 = vsel %vm3334_vm8, %v2947_v49, %v3350_v44 }
 0x30e   :  { %v3352_v38 = vsel %vm3336_vm9, %v2954_v28, %v3351_v45  ;;  %v2615_v52 = vadd.f32 %v5667_v34, %v2579_v37  ;;  %4334 = vmatmul.msk.f32.gmra.mxu0 %vm37_vm0, %v2349_v4  ;;  %v5863_v4 = vpop.f32.mrf.mxu3  ;;  %v2646_v14 = vmax.f32 %v2614_v9, 0.0 }
 0x30f   :  { %v3353_v54 = vsel %vm3338_vm10, %v2961_v48, %v3352_v38  ;;  %v5860_v50 = vpop.f32.mrf.mxu2 }
 0x310   :  { %3400 = vst [vmem:[#allocation3 + $0x31] sm:$0xff] %v3353_v54  ;;  %v2647_v62 = vmax.f32 %v2615_v52, 0.0  ;;  %3693 = vmatmul.f32.gmra.mxu2 %v3353_v54  ;;  %v1468_v54 = vadd.f32 %v6409_v27, %v6408_v47 }
 0x312   :  { %v2671_v42 = vmax.f32 %v2645_v41, %v2647_v62 }
 0x313   :  { %v2514_v23 = vpop.f32.mrf.mxu0 }
 0x314   :  { %v2715_v1 = vrot.slane %v2671_v42, 2  ;;  %v2716_v36 = vrot.slane %v2671_v42, 4  ;;  %v2717_v55 = vrot.slane %v2671_v42, 6  ;;  %v2962_v35 = vsel %vm2793_vm3, %v2671_v42, -inf }
 0x315   :  { %v2963_v25 = vrot.slane %v2962_v35, 4  ;;  %v2580_v5 = vadd.f32 %v2514_v23, %v2302_v30 }
 0x316   :  { %v2969_v31 = vsel %vm2793_vm3, %v2715_v1, -inf  ;;  %v2976_v39 = vsel %vm2793_vm3, %v2716_v36, -inf  ;;  %v2983_v19 = vsel %vm2793_vm3, %v2717_v55, -inf  ;;  %4335 = vmatmul.msk.f32.gmra.mxu0 %vm37_vm0, %v2350_v6  ;;  %v6412_v1 = vld [vmem:[#allocation36_spill] sm:$0xff]  ;;  %v5871_v55 = vpop.f32.mrf.mxu1 }
 0x317   :  { %v2964_v32 = vmax.f32 %v2962_v35, %v2963_v25  ;;  %v2970_v8 = vrot.slane %v2969_v31, 4  ;;  %v2977_v21 = vrot.slane %v2976_v39, 4  ;;  %v2984_v40 = vrot.slane %v2983_v19, 4  ;;  %v3409_v59 = vld [vmem:[#allocation3 + $0x30] sm:$0xff] }
 0x318   :  { %v3425_v49 = vld [vmem:[#allocation3 + $0x32] sm:$0xff]  ;;  %v2616_v18 = vadd.f32 %v5667_v34, %v2580_v5  ;;  %3652 = vmatmul.f32.gmra.mxu1 %v3409_v59  ;;  %v6411_v34 = vld [vmem:[#allocation18_spill] sm:$0xff]  ;;  %v1746_v36 = vadd.f32 %v6412_v1, %v1468_v54 }
 0x319   :  { %3734 = vmatmul.f32.gmra.mxu3 %v3425_v49  ;;  %v2965_v28 = vrot.slane %v2964_v32, 2  ;;  %v2971_v44 = vmax.f32 %v2969_v31, %v2970_v8  ;;  %v2978_v51 = vmax.f32 %v2976_v39, %v2977_v21  ;;  %v2985_v37 = vmax.f32 %v2983_v19, %v2984_v40  ;;  %v5877_v21 = vpop.f32.mrf.mxu2 }
 0x31a   :  { %v2648_v0 = vmax.f32 %v2616_v18, 0.0  ;;  %v1470_v41 = vadd.f32 %v6411_v34, %v6410_v2  ;;  %v6415_v34 = vld [vmem:[#allocation39_spill] sm:$0xff] }
 0x31b   :  { %v2966_v48 = vmax.f32 %v2964_v32, %v2965_v28  ;;  %v2972_v45 = vrot.slane %v2971_v44, 2  ;;  %v2979_v38 = vrot.slane %v2978_v51, 2  ;;  %v2517_v52 = vpop.f32.mrf.mxu0  ;;  %v2986_v42 = vrot.slane %v2985_v37, 2  ;;  %v6413_v32 = vld [vmem:[#allocation40_spill] sm:$0xff] }
 0x31c   :  { %v2672_v15 = vmax.f32 %v2646_v14, %v2648_v0  ;;  %v2025_v8 = vadd.f32 %v6413_v32, %v1746_v36  ;;  %v5880_v0 = vpop.f32.mrf.mxu3  ;;  %v6417_v36 = vld [vmem:[#allocation63_spill] sm:$0xff] }
 0x31d   :  { %v2973_v62 = vmax.f32 %v2971_v44, %v2972_v45  ;;  %v2980_v16 = vmax.f32 %v2978_v51, %v2979_v38  ;;  %v2967_v35 = vrot.slane %v2966_v48, 1  ;;  %v2987_v59 = vmax.f32 %v2985_v37, %v2986_v42  ;;  %v6414_v51 = vld [vmem:[#allocation45_spill] sm:$0xff]  ;;  %v6416_v42 = vld [vmem:[#allocation46_spill] sm:$0xff] }
 0x31e   :  { %v2718_v10 = vrot.slane %v2672_v15, 2  ;;  %v2719_v30 = vrot.slane %v2672_v15, 4  ;;  %v2720_v23 = vrot.slane %v2672_v15, 6  ;;  %v2990_v6 = vsel %vm2793_vm3, %v2672_v15, -inf }
 0x31f   :  { %v2974_v25 = vrot.slane %v2973_v62, 1  ;;  %v2981_v5 = vrot.slane %v2980_v16, 1  ;;  %v2991_v9 = vrot.slane %v2990_v6, 4  ;;  %v1748_v14 = vadd.f32 %v6414_v51, %v1470_v41 }
 0x320   :  { %v2997_v31 = vsel %vm2793_vm3, %v2718_v10, -inf  ;;  %v3004_v39 = vsel %vm2793_vm3, %v2719_v30, -inf  ;;  %v3011_v19 = vsel %vm2793_vm3, %v2720_v23, -inf  ;;  %v2968_v45 = vmax.f32 %v2966_v48, %v2967_v35 }
 0x321   :  { %v2975_v40 = vmax.f32 %v2973_v62, %v2974_v25  ;;  %v2998_v49 = vrot.slane %v2997_v31, 4  ;;  %v2992_v18 = vmax.f32 %v2990_v6, %v2991_v9  ;;  %v3005_v28 = vrot.slane %v3004_v39, 4  ;;  %v6418_v25 = vld [vmem:[#allocation17_spill] sm:$0xff] }
 0x322   :  { %v3012_v44 = vrot.slane %v3011_v19, 4  ;;  %v2982_v27 = vmax.f32 %v2980_v16, %v2981_v5  ;;  %v2303_v10 = vadd.f32 %v6415_v34, %v2025_v8  ;;  %v2988_v30 = vrot.slane %v2987_v59, 1  ;;  %v5889_v8 = vpop.f32.mrf.mxu1 }
 0x323   :  { %v2999_v38 = vmax.f32 %v2997_v31, %v2998_v49  ;;  %v2520_v47 = vpop.f32.mrf.mxu0  ;;  %v2993_v54 = vrot.slane %v2992_v18, 2  ;;  %v3006_v15 = vmax.f32 %v3004_v39, %v3005_v28  ;;  %v3354_v37 = vsel %vm3326_vm4, %v2975_v40, %v2968_v45  ;;  %v6420_v28 = vld [vmem:[#allocation44_spill] sm:$0xff]  ;;  %v6421_v45 = vld [vmem:[#allocation65_spill] sm:$0xff] }
 0x324   :  { %v3013_v2 = vmax.f32 %v3011_v19, %v3012_v44  ;;  %v2027_v23 = vadd.f32 %v6416_v42, %v1748_v14  ;;  %v1469_v48 = vadd.f32 %v6418_v25, %v6417_v36  ;;  %v2581_v9 = vadd.f32 %v2517_v52, %v2303_v10  ;;  %v6419_v19 = vld [vmem:[#allocation42_spill] sm:$0xff]  ;;  %v6423_v52 = vld [vmem:[#allocation43_spill] sm:$0xff] }
 0x325   :  { %v3000_v62 = vrot.slane %v2999_v38, 2  ;;  %v2994_v6 = vmax.f32 %v2992_v18, %v2993_v54  ;;  %v3007_v1 = vrot.slane %v3006_v15, 2  ;;  %v3355_v16 = vsel %vm3328_vm5, %v2982_v27, %v3354_v37  ;;  %v6422_v54 = vld [vmem:[#allocation20_spill] sm:$0xff]  ;;  %v5895_v27 = vpop.f32.mrf.mxu2 }
 0x326   :  { %v3014_v41 = vrot.slane %v3013_v2, 2  ;;  %v1747_v32 = vadd.f32 %v6419_v19, %v1469_v48  ;;  %v2989_v40 = vmax.f32 %v2987_v59, %v2988_v30  ;;  %v2305_v18 = vadd.f32 %v6420_v28, %v2027_v23  ;;  %v5902_v30 = vld [vmem:[%s6208_s2] ss:$0 sm:$0xff] }
 0x327   :  { %v3001_v35 = vmax.f32 %v2999_v38, %v3000_v62  ;;  %v2995_v5 = vrot.slane %v2994_v6, 1  ;;  %v3008_v31 = vmax.f32 %v3006_v15, %v3007_v1  ;;  %v1471_v38 = vadd.f32 %v6422_v54, %v6421_v45 }
 0x328   :  { %v3015_v39 = vmax.f32 %v3013_v2, %v3014_v41  ;;  %v2026_v34 = vadd.f32 %v6423_v52, %v1747_v32  ;;  %v3356_v15 = vsel %vm3330_vm6, %v2989_v40, %v3355_v16  ;;  %v2617_v62 = vadd.f32 %v5902_v30, %v2581_v9  ;;  %v6424_v16 = vld [vmem:[#allocation41_spill] sm:$0xff] }
 0x329   :  { %v3002_v49 = vrot.slane %v3001_v35, 1  ;;  %v2996_v44 = vmax.f32 %v2994_v6, %v2995_v5  ;;  %v3009_v51 = vrot.slane %v3008_v31, 1  ;;  %v1749_v23 = vadd.f32 %v5703_v7, %v1471_v38  ;;  %v5906_v6 = vpop.f32.mrf.mxu3 }
 0x32a   :  { %v3016_v14 = vrot.slane %v3015_v39, 1  ;;  %v2304_v5 = vadd.f32 %v6424_v16, %v2026_v34  ;;  %v2649_v9 = vmax.f32 %v2617_v62, 0.0  ;;  %v5915_v32 = vpop.f32.mrf.mxu1 }
 0x32b   :  { %v3003_v2 = vmax.f32 %v3001_v35, %v3002_v49  ;;  %v2523_v10 = vpop.f32.mrf.mxu0  ;;  %v3010_v37 = vmax.f32 %v3008_v31, %v3009_v51  ;;  %v3357_v59 = vsel %vm3332_vm7, %v2996_v44, %v3356_v15  ;;  %v2028_v48 = vadd.f32 %v5707_v53, %v1749_v23 }
 0x32c   :  { %v2583_v42 = vadd.f32 %v2523_v10, %v2305_v18  ;;  %v3017_v1 = vmax.f32 %v3015_v39, %v3016_v14  ;;  %v2582_v7 = vadd.f32 %v2520_v47, %v2304_v5  ;;  %v6425_v5 = vld [vmem:[#allocation66_spill] sm:$0xff] }
 0x32d   :  { %v3358_v41 = vsel %vm3334_vm8, %v3003_v2, %v3357_v59  ;;  %v2306_v39 = vadd.f32 %v5711_v33, %v2028_v48  ;;  %v5918_v44 = vpop.f32.mrf.mxu2 }
 0x32e   :  { %v3359_v36 = vsel %vm3336_vm9, %v3010_v37, %v3358_v41  ;;  %v2619_v25 = vadd.f32 %v5902_v30, %v2583_v42  ;;  %v2618_v45 = vadd.f32 %v5902_v30, %v2582_v7 }
 0x32f   :  { %v3360_v35 = vsel %vm3338_vm10, %v3017_v1, %v3359_v36 }
 0x330   :  { %3401 = vst [vmem:[#allocation3 + $0x41] sm:$0xff] %v3360_v35  ;;  %v2651_v31 = vmax.f32 %v2619_v25, 0.0  ;;  %3696 = vmatmul.f32.gmra.mxu2 %v3360_v35  ;;  %v2650_v41 = vmax.f32 %v2618_v45, 0.0  ;;  %v6427_v45 = vld [vmem:[#allocation68_spill] sm:$0xff] }
 0x331   :  { %v5924_v38 = vpop.f32.mrf.mxu3 }
 0x332   :  { %v2673_v19 = vmax.f32 %v2649_v9, %v2651_v31  ;;  %v6426_v9 = vld [vmem:[#allocation15_spill] sm:$0xff] }
 0x333   :  { %v2526_v40 = vpop.f32.mrf.mxu0  ;;  %v1472_v31 = vadd.f32 %v6426_v9, %v6425_v5 }
 0x334   :  { %v2721_v49 = vrot.slane %v2673_v19, 2  ;;  %v2722_v28 = vrot.slane %v2673_v19, 4  ;;  %v2723_v18 = vrot.slane %v2673_v19, 6  ;;  %v3018_v53 = vsel %vm2793_vm3, %v2673_v19, -inf  ;;  %v5929_v19 = vpop.f32.mrf.mxu1 }
 0x335   :  { %v3019_v51 = vrot.slane %v3018_v53, 4  ;;  %v2584_v14 = vadd.f32 %v2526_v40, %v2306_v39 }
 0x336   :  { %v3025_v54 = vsel %vm2793_vm3, %v2721_v49, -inf  ;;  %v3032_v47 = vsel %vm2793_vm3, %v2722_v28, -inf  ;;  %v3039_v33 = vsel %vm2793_vm3, %v2723_v18, -inf }
 0x337   :  { %v3020_v52 = vmax.f32 %v3018_v53, %v3019_v51  ;;  %v3026_v34 = vrot.slane %v3025_v54, 4  ;;  %v3033_v15 = vrot.slane %v3032_v47, 4  ;;  %v3040_v2 = vrot.slane %v3039_v33, 4  ;;  %v3410_v10 = vld [vmem:[#allocation3 + $0x40] sm:$0xff] }
 0x338   :  { %v3426_v37 = vld [vmem:[#allocation3 + $0x42] sm:$0xff]  ;;  %v2620_v59 = vadd.f32 %v5902_v30, %v2584_v14  ;;  %3655 = vmatmul.f32.gmra.mxu1 %v3410_v10 }
 0x339   :  { %3737 = vmatmul.f32.gmra.mxu3 %v3426_v37  ;;  %v3021_v62 = vrot.slane %v3020_v52, 2  ;;  %v3027_v42 = vmax.f32 %v3025_v54, %v3026_v34  ;;  %v3034_v23 = vmax.f32 %v3032_v47, %v3033_v15  ;;  %v3041_v1 = vmax.f32 %v3039_v33, %v3040_v2  ;;  %v6428_v54 = vld [vmem:[#allocation23_spill] sm:$0xff] }
 0x33a   :  { %v2652_v36 = vmax.f32 %v2620_v59, 0.0  ;;  %v1474_v47 = vadd.f32 %v6428_v54, %v6427_v45  ;;  %v1750_v33 = vadd.f32 %v5721_v29, %v1472_v31 }
 0x33b   :  { %v3022_v25 = vmax.f32 %v3020_v52, %v3021_v62  ;;  %v3028_v48 = vrot.slane %v3027_v42, 2  ;;  %v3035_v35 = vrot.slane %v3034_v23, 2  ;;  %v2529_v16 = vpop.f32.mrf.mxu0  ;;  %v3042_v28 = vrot.slane %v3041_v1, 2  ;;  %v5935_v52 = vpop.f32.mrf.mxu2 }
 0x33c   :  { %v2674_v7 = vmax.f32 %v2650_v41, %v2652_v36  ;;  %6429 = vst [vmem:[#allocation54_spill] sm:$0xff] %v5935_v52  ;;  %v2029_v62 = vadd.f32 %v5724_v60, %v1750_v33  ;;  %v1752_v9 = vadd.f32 %v5755_v22, %v1474_v47  ;;  %v5948_v60 = vld [vmem:[%s6210_s4] ss:$0 sm:$0xff]  ;;  %v3644_v22 = vpop.f32.mrf.mxu1 }
 0x33d   :  { %v3023_v39 = vrot.slane %v3022_v25, 1  ;;  %v3029_v40 = vmax.f32 %v3027_v42, %v3028_v48  ;;  %v3036_v49 = vmax.f32 %v3034_v23, %v3035_v35  ;;  %v5941_v42 = vpop.f32.mrf.mxu3  ;;  %v3043_v41 = vmax.f32 %v3041_v1, %v3042_v28  ;;  %v6431_v1 = vld [vmem:[#allocation48_spill] sm:$0xff] }
 0x33e   :  { %v2724_v18 = vrot.slane %v2674_v7, 2  ;;  %v2725_v53 = vrot.slane %v2674_v7, 4  ;;  %v2726_v51 = vrot.slane %v2674_v7, 6  ;;  %v3046_v14 = vsel %vm2793_vm3, %v2674_v7, -inf  ;;  %6430 = vst [vmem:[#allocation56_spill] sm:$0xff] %v5941_v42 }
 0x33f   :  { %v3030_v34 = vrot.slane %v3029_v40, 1  ;;  %v3037_v15 = vrot.slane %v3036_v49, 1  ;;  %v3047_v2 = vrot.slane %v3046_v14, 4  ;;  %v3024_v48 = vmax.f32 %v3022_v25, %v3023_v39 }
 0x340   :  { %v3053_v10 = vsel %vm2793_vm3, %v2724_v18, -inf  ;;  %v3060_v37 = vsel %vm2793_vm3, %v2725_v53, -inf  ;;  %v3067_v59 = vsel %vm2793_vm3, %v2726_v51, -inf  ;;  %v2307_v25 = vadd.f32 %v6431_v1, %v2029_v62 }
 0x341   :  { %v3031_v23 = vmax.f32 %v3029_v40, %v3030_v34  ;;  %v3054_v36 = vrot.slane %v3053_v10, 4  ;;  %v3048_v29 = vmax.f32 %v3046_v14, %v3047_v2  ;;  %v3061_v35 = vrot.slane %v3060_v37, 4  ;;  %v6432_v34 = vld [vmem:[#allocation67_spill] sm:$0xff] }
 0x342   :  { %v3068_v5 = vrot.slane %v3067_v59, 4  ;;  %v3038_v31 = vmax.f32 %v3036_v49, %v3037_v15  ;;  %v2031_v39 = vadd.f32 %v5758_v12, %v1752_v9  ;;  %v3044_v40 = vrot.slane %v3043_v41, 1  ;;  %v6433_v15 = vld [vmem:[#allocation21_spill] sm:$0xff] }
 0x343   :  { %v3055_v7 = vmax.f32 %v3053_v10, %v3054_v36  ;;  %v2532_v18 = vpop.f32.mrf.mxu0  ;;  %v3361_v53 = vsel %vm3326_vm4, %v3031_v23, %v3024_v48  ;;  %v3049_v45 = vrot.slane %v3048_v29, 2  ;;  %v3062_v51 = vmax.f32 %v3060_v37, %v3061_v35  ;;  %v3685_v23 = vpop.f32.mrf.mxu2  ;;  %v6434_v35 = vld [vmem:[#allocation50_spill] sm:$0xff] }
 0x344   :  { %v3069_v54 = vmax.f32 %v3067_v59, %v3068_v5  ;;  %v3645_v33 = vadd.f32 %v5948_v60, %v3644_v22  ;;  %v1473_v2 = vadd.f32 %v6433_v15, %v6432_v34  ;;  %v3362_v10 = vsel %vm3328_vm5, %v3038_v31, %v3361_v53  ;;  %v6435_v31 = vld [vmem:[#allocation69_spill] sm:$0xff]  ;;  %v6437_v53 = vld [vmem:[#allocation51_spill] sm:$0xff] }
 0x345   :  { %v3056_v28 = vrot.slane %v3055_v7, 2  ;;  %v3050_v49 = vmax.f32 %v3048_v29, %v3049_v45  ;;  %v3063_v14 = vrot.slane %v3062_v51, 2  ;;  %v2585_v59 = vadd.f32 %v2529_v16, %v2307_v25  ;;  %v3726_v1 = vpop.f32.mrf.mxu3 }
 0x346   :  { %v3070_v47 = vrot.slane %v3069_v54, 2  ;;  %v3686_v12 = vadd.f32 %v3685_v23, %v3645_v33  ;;  %v1751_v5 = vadd.f32 %v6434_v35, %v1473_v2  ;;  %v2309_v29 = vadd.f32 %v5765_v57, %v2031_v39  ;;  %v6438_v2 = vld [vmem:[#allocation53_spill] sm:$0xff]  ;;  %v3541_v35 = vld [vmem:[#allocation4 + $0x1f0] sm:$0xff] }
 0x347   :  { %v3057_v37 = vmax.f32 %v3055_v7, %v3056_v28  ;;  %v3051_v36 = vrot.slane %v3050_v49, 1  ;;  %v3064_v62 = vmax.f32 %v3062_v51, %v3063_v14  ;;  %v3045_v9 = vmax.f32 %v3043_v41, %v3044_v40  ;;  %v6436_v7 = vld [vmem:[#allocation19_spill] sm:$0xff] }
 0x348   :  { %v3071_v48 = vmax.f32 %v3069_v54, %v3070_v47  ;;  %v5958_v34 = vadd.f32 %v3726_v1, %v3686_v12  ;;  %v1475_v16 = vadd.f32 %v6436_v7, %v6435_v31  ;;  %v2030_v25 = vadd.f32 %v6437_v53, %v1751_v5  ;;  %v3573_v12 = vld [vmem:[#allocation4 + $0x2f0] sm:$0xff]  ;;  %v3540_v1 = vld [vmem:[#allocation4 + $0x1e8] sm:$0xff] }
 0x349   :  { %v3058_v45 = vrot.slane %v3057_v37, 1  ;;  %v3052_v22 = vmax.f32 %v3050_v49, %v3051_v36  ;;  %v3065_v42 = vrot.slane %v3064_v62, 1  ;;  %v3363_v51 = vsel %vm3330_vm6, %v3045_v9, %v3362_v10  ;;  %v3572_v9 = vld [vmem:[#allocation4 + $0x2e8] sm:$0xff] }
 0x34a   :  { %v3072_v52 = vrot.slane %v3071_v48, 1  ;;  %v2621_v41 = vadd.f32 %v5902_v30, %v2585_v59  ;;  %v1753_v40 = vadd.f32 %v5777_v20, %v1475_v16  ;;  %v2308_v23 = vadd.f32 %v6438_v2, %v2030_v25  ;;  %v3558_v59 = vld [vmem:[#allocation4 + $0x278] sm:$0xff]  ;;  %v3555_v16 = vld [vmem:[#allocation4 + $0x260] sm:$0xff] }
 0x34b   :  { %v3059_v54 = vmax.f32 %v3057_v37, %v3058_v45  ;;  %v2535_v28 = vpop.f32.mrf.mxu0  ;;  %v3066_v14 = vmax.f32 %v3064_v62, %v3065_v42  ;;  %v3364_v57 = vsel %vm3332_vm7, %v3052_v22, %v3363_v51  ;;  %v3574_v62 = vld [vmem:[#allocation4 + $0x2f8] sm:$0xff]  ;;  %3791 = vmatpush.msra.mxu2 %v3558_v59 }
 0x34c   :  { %v2587_v39 = vadd.f32 %v2535_v28, %v2309_v29  ;;  %v3073_v49 = vmax.f32 %v3071_v48, %v3072_v52  ;;  %v2032_v10 = vadd.f32 %v5784_v43, %v1753_v40  ;;  %v2653_v37 = vmax.f32 %v2621_v41, 0.0  ;;  %v3542_v20 = vld [vmem:[#allocation4 + $0x1f8] sm:$0xff]  ;;  %3832 = vmatpush.msra.mxu3 %v3574_v62  ;;  %v3557_v48 = vld [vmem:[#allocation4 + $0x270] sm:$0xff]  ;;  %v3556_v29 = vld [vmem:[#allocation4 + $0x268] sm:$0xff] }
 0x34d   :  { %v3365_v47 = vsel %vm3334_vm8, %v3059_v54, %v3364_v57  ;;  %v2586_v52 = vadd.f32 %v2532_v18, %v2308_v23  ;;  %3750 = vmatpush.msra.mxu1 %v3542_v20  ;;  %3792 = vmatpush.msra.mxu2 %v3557_v48 }
 0x34e   :  { %v3366_v33 = vsel %vm3336_vm9, %v3066_v14, %v3365_v47  ;;  %v2623_v15 = vadd.f32 %v5902_v30, %v2587_v39  ;;  %v2310_v43 = vadd.f32 %v5788_v17, %v2032_v10  ;;  %3833 = vmatpush.msra.mxu3 %v3573_v12 }
 0x34f   :  { %v3367_v42 = vsel %vm3338_vm10, %v3073_v49, %v3366_v33  ;;  %3751 = vmatpush.msra.mxu1 %v3541_v35  ;;  %v2622_v53 = vadd.f32 %v5902_v30, %v2586_v52  ;;  %3793 = vmatpush.msra.mxu2 %v3556_v29  ;;  %v6440_v29 = vld [vmem:[#allocation24_spill] sm:$0xff] }
 0x350   :  { %3402 = vst [vmem:[#allocation3 + $0x51] sm:$0xff] %v3367_v42  ;;  %v2655_v36 = vmax.f32 %v2623_v15, 0.0  ;;  %3699 = vmatmul.f32.gmra.mxu2 %v3367_v42  ;;  %3834 = vmatpush.msra.mxu3 %v3572_v9 }
 0x351   :  { %3752 = vmatpush.msra.mxu1 %v3540_v1  ;;  %3794 = vmatpush.msra.mxu2 %v3555_v16  ;;  %v2654_v59 = vmax.f32 %v2622_v53, 0.0  ;;  %v6441_v1 = vld [vmem:[#allocation28_spill] sm:$0xff] }
 0x352   :  { %v2675_v5 = vmax.f32 %v2653_v37, %v2655_v36 }
 0x353   :  { %v2538_v45 = vpop.f32.mrf.mxu0  ;;  %v3688_v15 = vpop.f32.mrf.mxu2 }
 0x354   :  { %v2727_v22 = vrot.slane %v2675_v5, 2  ;;  %v2728_v31 = vrot.slane %v2675_v5, 4  ;;  %v2729_v7 = vrot.slane %v2675_v5, 6  ;;  %v3074_v18 = vsel %vm2793_vm3, %v2675_v5, -inf  ;;  %v6439_v5 = vld [vmem:[#allocation70_spill] sm:$0xff] }
 0x355   :  { %v3075_v25 = vrot.slane %v3074_v18, 4  ;;  %v2588_v51 = vadd.f32 %v2538_v45, %v2310_v43  ;;  %v3647_v54 = vpop.f32.mrf.mxu1  ;;  %v1476_v9 = vadd.f32 %v6440_v29, %v6439_v5 }
 0x356   :  { %v3081_v17 = vsel %vm2793_vm3, %v2727_v22, -inf  ;;  %v3088_v28 = vsel %vm2793_vm3, %v2728_v31, -inf  ;;  %v3095_v14 = vsel %vm2793_vm3, %v2729_v7, -inf  ;;  %v3648_v57 = vadd.f32 %v5948_v60, %v3647_v54  ;;  %v6442_v22 = vld [vmem:[#allocation26_spill] sm:$0xff] }
 0x357   :  { %v3076_v41 = vmax.f32 %v3074_v18, %v3075_v25  ;;  %v3082_v39 = vrot.slane %v3081_v17, 4  ;;  %v3089_v40 = vrot.slane %v3088_v28, 4  ;;  %v3096_v49 = vrot.slane %v3095_v14, 4  ;;  %v5980_v47 = vld [vmem:[#allocation3 + $0x50] sm:$0xff] }
 0x358   :  { %v5982_v33 = vld [vmem:[#allocation3 + $0x52] sm:$0xff]  ;;  %v2624_v2 = vadd.f32 %v5902_v30, %v2588_v51  ;;  %3658 = vmatmul.f32.gmra.mxu1 %v5980_v47  ;;  %v3689_v23 = vadd.f32 %v3688_v15, %v3648_v57  ;;  %v1478_v31 = vadd.f32 %v6442_v22, %v6441_v1  ;;  %v3571_v22 = vld [vmem:[#allocation4 + $0x2e0] sm:$0xff] }
 0x359   :  { %3740 = vmatmul.f32.gmra.mxu3 %v5982_v33  ;;  %v3077_v10 = vrot.slane %v3076_v41, 2  ;;  %v3083_v42 = vmax.f32 %v3081_v17, %v3082_v39  ;;  %v3090_v37 = vmax.f32 %v3088_v28, %v3089_v40  ;;  %v3097_v36 = vmax.f32 %v3095_v14, %v3096_v49 }
 0x35a   :  { %v2656_v62 = vmax.f32 %v2624_v2, 0.0  ;;  %v1754_v17 = vadd.f32 %v5797_v63, %v1476_v9  ;;  %v1756_v63 = vadd.f32 %v5834_v11, %v1478_v31  ;;  %3835 = vmatpush.msra.mxu3 %v3571_v22  ;;  %v3550_v22 = vld [vmem:[#allocation4 + $0x238] sm:$0xff] }
 0x35b   :  { %v3078_v20 = vmax.f32 %v3076_v41, %v3077_v10  ;;  %v3084_v52 = vrot.slane %v3083_v42, 2  ;;  %v3091_v48 = vrot.slane %v3090_v37, 2  ;;  %v2541_v35 = vpop.f32.mrf.mxu0  ;;  %v3098_v16 = vrot.slane %v3097_v36, 2 }
 0x35c   :  { %v3729_v12 = vpop.f32.mrf.mxu3  ;;  %v2676_v43 = vmax.f32 %v2654_v59, %v2656_v62  ;;  %v2033_v15 = vadd.f32 %v5800_v58, %v1754_v17  ;;  %v6444_v17 = vld [vmem:[#allocation22_spill] sm:$0xff] }
 0x35d   :  { %v5989_v45 = vadd.f32 %v3729_v12, %v3689_v23  ;;  %v3085_v7 = vmax.f32 %v3083_v42, %v3084_v52  ;;  %v3092_v18 = vmax.f32 %v3090_v37, %v3091_v48  ;;  %v3079_v28 = vrot.slane %v3078_v20, 1 }
 0x35e   :  { %v2730_v25 = vrot.slane %v2676_v43, 2  ;;  %v2731_v53 = vrot.slane %v2676_v43, 4  ;;  %v2732_v51 = vrot.slane %v2676_v43, 6  ;;  %v3102_v54 = vsel %vm2793_vm3, %v2676_v43, -inf }
 0x35f   :  { %v3086_v14 = vrot.slane %v3085_v7, 1  ;;  %v3093_v57 = vrot.slane %v3092_v18, 1  ;;  %v3103_v41 = vrot.slane %v3102_v54, 4  ;;  %v3099_v23 = vmax.f32 %v3097_v36, %v3098_v16  ;;  %v3554_v16 = vld [vmem:[#allocation4 + $0x258] sm:$0xff] }
 0x360   :  { %v3109_v39 = vsel %vm2793_vm3, %v2730_v25, -inf  ;;  %v3116_v40 = vsel %vm2793_vm3, %v2731_v53, -inf  ;;  %v3123_v49 = vsel %vm2793_vm3, %v2732_v51, -inf  ;;  %v3080_v62 = vmax.f32 %v3078_v20, %v3079_v28  ;;  %v3538_v53 = vld [vmem:[#allocation4 + $0x1d8] sm:$0xff]  ;;  %v3553_v51 = vld [vmem:[#allocation4 + $0x250] sm:$0xff]  ;;  %3795 = vmatpush.msra.mxu2 %v3554_v16 }
 0x361   :  { %v3087_v2 = vmax.f32 %v3085_v7, %v3086_v14  ;;  %v3110_v10 = vrot.slane %v3109_v39, 4  ;;  %v3104_v42 = vmax.f32 %v3102_v54, %v3103_v41  ;;  %v3117_v37 = vrot.slane %v3116_v40, 4  ;;  %v3539_v7 = vld [vmem:[#allocation4 + $0x1e0] sm:$0xff]  ;;  %v6443_v54 = vld [vmem:[#allocation71_spill] sm:$0xff] }
 0x362   :  { %v3124_v59 = vrot.slane %v3123_v49, 4  ;;  %v3094_v12 = vmax.f32 %v3092_v18, %v3093_v57  ;;  %v2311_v43 = vadd.f32 %v5802_v3, %v2033_v15  ;;  %v3100_v1 = vrot.slane %v3099_v23, 1  ;;  %3753 = vmatpush.msra.mxu1 %v3539_v7  ;;  %v3570_v18 = vld [vmem:[#allocation4 + $0x2d8] sm:$0xff]  ;;  %3796 = vmatpush.msra.mxu2 %v3553_v51  ;;  %v3568_v51 = vld [vmem:[#allocation4 + $0x2c8] sm:$0xff] }
 0x363   :  { %v3111_v52 = vmax.f32 %v3109_v39, %v3110_v10  ;;  %v6000_v48 = vpop.f32.mrf.mxu0  ;;  %v3105_v5 = vrot.slane %v3104_v42, 2  ;;  %v3118_v29 = vmax.f32 %v3116_v40, %v3117_v37  ;;  %v3368_v58 = vsel %vm3326_vm4, %v3087_v2, %v3080_v62  ;;  %3836 = vmatpush.msra.mxu3 %v3570_v18  ;;  %v3552_v2 = vld [vmem:[#allocation4 + $0x248] sm:$0xff] }
 0x364   :  { %v3125_v9 = vmax.f32 %v3123_v49, %v3124_v59  ;;  %v2035_v25 = vadd.f32 %v5840_v61, %v1756_v63  ;;  %v1477_v3 = vadd.f32 %v6444_v17, %v6443_v54  ;;  %v2589_v14 = vadd.f32 %v2541_v35, %v2311_v43  ;;  %3754 = vmatpush.msra.mxu1 %v3538_v53  ;;  %v6445_v35 = vld [vmem:[#allocation13_spill] sm:$0xff]  ;;  %v6446_v63 = vld [vmem:[#allocation27_spill] sm:$0xff] }
 0x365   :  { %v3112_v36 = vrot.slane %v3111_v52, 2  ;;  %v3106_v11 = vmax.f32 %v3104_v42, %v3105_v5  ;;  %v3119_v20 = vrot.slane %v3118_v29, 2  ;;  %v3369_v57 = vsel %vm3328_vm5, %v3094_v12, %v3368_v58  ;;  %3797 = vmatpush.msra.mxu2 %v3552_v2  ;;  %v3536_v54 = vld [vmem:[#allocation4 + $0x1c8] sm:$0xff] }
 0x366   :  { %v3126_v31 = vrot.slane %v3125_v9, 2  ;;  %v1755_v61 = vadd.f32 %v5815_v26, %v1477_v3  ;;  %v3101_v49 = vmax.f32 %v3099_v23, %v3100_v1  ;;  %v2313_v10 = vadd.f32 %v5847_v13, %v2035_v25  ;;  %v3551_v26 = vld [vmem:[#allocation4 + $0x240] sm:$0xff] }
 0x367   :  { %v3113_v28 = vmax.f32 %v3111_v52, %v3112_v36  ;;  %v3107_v41 = vrot.slane %v3106_v11, 1  ;;  %v3120_v39 = vmax.f32 %v3118_v29, %v3119_v20  ;;  %v1479_v62 = vadd.f32 %v6446_v63, %v6445_v35  ;;  %3798 = vmatpush.msra.mxu2 %v3551_v26  ;;  %v3569_v20 = vld [vmem:[#allocation4 + $0x2d0] sm:$0xff]  ;;  %v3535_v3 = vld [vmem:[#allocation4 + $0x1c0] sm:$0xff] }
 0x368   :  { %v3127_v40 = vmax.f32 %v3125_v9, %v3126_v31  ;;  %v2034_v52 = vadd.f32 %v5818_v46, %v1755_v61  ;;  %v3370_v12 = vsel %vm3330_vm6, %v3101_v49, %v3369_v57  ;;  %v2625_v43 = vadd.f32 %v5902_v30, %v2589_v14  ;;  %v3537_v31 = vld [vmem:[#allocation4 + $0x1d0] sm:$0xff]  ;;  %3837 = vmatpush.msra.mxu3 %v3569_v20 }
 0x369   :  { %v3114_v15 = vrot.slane %v3113_v28, 1  ;;  %v3108_v42 = vmax.f32 %v3106_v11, %v3107_v41  ;;  %v3121_v37 = vrot.slane %v3120_v39, 1  ;;  %v1757_v1 = vadd.f32 %v5853_v24, %v1479_v62  ;;  %3799 = vmatpush.msra.mxu2 %v3550_v22  ;;  %v3549_v24 = vld [vmem:[#allocation4 + $0x230] sm:$0xff]  ;;  %3755 = vmatpush.msra.mxu1 %v3537_v31  ;;  %v3566_v41 = vld [vmem:[#allocation4 + $0x2b8] sm:$0xff]  ;;  %v3564_v22 = vld [vmem:[#allocation4 + $0x2a8] sm:$0xff] }
 0x36a   :  { %v3128_v59 = vrot.slane %v3127_v40, 1  ;;  %v2312_v16 = vadd.f32 %v5821_v56, %v2034_v52  ;;  %v2657_v18 = vmax.f32 %v2625_v43, 0.0  ;;  %3838 = vmatpush.msra.mxu3 %v3568_v51  ;;  %v3565_v52 = vld [vmem:[#allocation4 + $0x2b0] sm:$0xff]  ;;  %v3544_v31 = vld [vmem:[#allocation4 + $0x208] sm:$0xff] }
 0x36b   :  { %v3115_v5 = vmax.f32 %v3113_v28, %v3114_v15  ;;  %v2547_v29 = vpop.f32.mrf.mxu0  ;;  %v3122_v23 = vmax.f32 %v3120_v39, %v3121_v37  ;;  %v3371_v9 = vsel %vm3332_vm7, %v3108_v42, %v3370_v12  ;;  %v2036_v25 = vadd.f32 %v5860_v50, %v1757_v1  ;;  %v3567_v50 = vld [vmem:[#allocation4 + $0x2c0] sm:$0xff]  ;;  %3800 = vmatpush.msra.mxu2 %v3549_v24  ;;  %v3548_v28 = vld [vmem:[#allocation4 + $0x228] sm:$0xff]  ;;  %v3533_v12 = vld [vmem:[#allocation4 + $0x1b0] sm:$0xff] }
 0x36c   :  { %v2591_v13 = vadd.f32 %v2547_v29, %v2313_v10  ;;  %v3129_v58 = vmax.f32 %v3127_v40, %v3128_v59  ;;  %v2590_v56 = vadd.f32 %v6000_v48, %v2312_v16  ;;  %3756 = vmatpush.msra.mxu1 %v3536_v54  ;;  %v3547_v39 = vld [vmem:[#allocation4 + $0x220] sm:$0xff]  ;;  %3839 = vmatpush.msra.mxu3 %v3567_v50  ;;  %v3534_v48 = vld [vmem:[#allocation4 + $0x1b8] sm:$0xff]  ;;  %v3545_v1 = vld [vmem:[#allocation4 + $0x210] sm:$0xff] }
 0x36d   :  { %v3372_v36 = vsel %vm3334_vm8, %v3115_v5, %v3371_v9  ;;  %v2314_v14 = vadd.f32 %v5863_v4, %v2036_v25  ;;  %3801 = vmatpush.msra.mxu2 %v3548_v28  ;;  %v3546_v4 = vld [vmem:[#allocation4 + $0x218] sm:$0xff]  ;;  %v3543_v28 = vld [vmem:[#allocation4 + $0x200] sm:$0xff] }
 0x36e   :  { %v3373_v46 = vsel %vm3336_vm9, %v3122_v23, %v3372_v36  ;;  %v2627_v7 = vadd.f32 %v5902_v30, %v2591_v13  ;;  %v2626_v2 = vadd.f32 %v5902_v30, %v2590_v56  ;;  %3757 = vmatpush.msra.mxu1 %v3535_v3  ;;  %3840 = vmatpush.msra.mxu3 %v3566_v41  ;;  %v3531_v3 = vld [vmem:[#allocation4 + $0x1a0] sm:$0xff] }
 0x36f   :  { %v6023_v11 = vsel %vm3338_vm10, %v3129_v58, %v3373_v46  ;;  %3802 = vmatpush.msra.mxu2 %v3547_v39  ;;  %v3532_v46 = vld [vmem:[#allocation4 + $0x1a8] sm:$0xff] }
 0x370   :  { %3403 = vst [vmem:[#allocation3 + $0x61] sm:$0xff] %v6023_v11  ;;  %v2659_v53 = vmax.f32 %v2627_v7, 0.0  ;;  %3702 = vmatmul.f32.gmra.mxu2 %v6023_v11  ;;  %3758 = vmatpush.msra.mxu1 %v3534_v48  ;;  %v2658_v24 = vmax.f32 %v2626_v2, 0.0 }
 0x371   :  { %3803 = vmatpush.msra.mxu2 %v3546_v4  ;;  %3841 = vmatpush.msra.mxu3 %v3565_v52 }
 0x372   :  { %v2677_v17 = vmax.f32 %v2657_v18, %v2659_v53  ;;  %3759 = vmatpush.msra.mxu1 %v3533_v12 }
 0x373   :  { %v2550_v57 = vpop.f32.mrf.mxu0  ;;  %v3691_v13 = vpop.f32.mrf.mxu2  ;;  %3804 = vmatpush.msra.mxu2 %v3545_v1  ;;  %3842 = vmatpush.msra.mxu3 %v3564_v22 }
 0x374   :  { %v2733_v40 = vrot.slane %v2677_v17, 2  ;;  %v2734_v61 = vrot.slane %v2677_v17, 4  ;;  %v2735_v49 = vrot.slane %v2677_v17, 6  ;;  %v3130_v15 = vsel %vm2793_vm3, %v2677_v17, -inf  ;;  %3760 = vmatpush.msra.mxu1 %v3532_v46  ;;  %v3563_v17 = vld [vmem:[#allocation4 + $0x2a0] sm:$0xff] }
 0x375   :  { %v3131_v10 = vrot.slane %v3130_v15, 4  ;;  %v2592_v42 = vadd.f32 %v2550_v57, %v2314_v14  ;;  %v3650_v37 = vpop.f32.mrf.mxu1  ;;  %v6447_v14 = vld [vmem:[#allocation10_spill] sm:$0xff]  ;;  %v6448_v57 = vld [vmem:[#allocation25_spill] sm:$0xff]  ;;  %3805 = vmatpush.msra.mxu2 %v3544_v31  ;;  %3843 = vmatpush.msra.mxu3 %v3563_v17 }
 0x376   :  { %v3137_v59 = vsel %vm2793_vm3, %v2733_v40, -inf  ;;  %v3144_v35 = vsel %vm2793_vm3, %v2734_v61, -inf  ;;  %v3151_v63 = vsel %vm2793_vm3, %v2735_v49, -inf  ;;  %v3651_v62 = vadd.f32 %v5948_v60, %v3650_v37  ;;  %v6449_v61 = vld [vmem:[#allocation32_spill] sm:$0xff]  ;;  %v6450_v49 = vld [vmem:[#allocation29_spill] sm:$0xff]  ;;  %3761 = vmatpush.msra.mxu1 %v3531_v3  ;;  %v3559_v17 = vld [vmem:[#allocation4 + $0x280] sm:$0xff] }
 0x377   :  { %v3132_v5 = vmax.f32 %v3130_v15, %v3131_v10  ;;  %v3138_v29 = vrot.slane %v3137_v59, 4  ;;  %v3145_v26 = vrot.slane %v3144_v35, 4  ;;  %v3152_v23 = vrot.slane %v3151_v63, 4  ;;  %v6035_v9 = vld [vmem:[#allocation3 + $0x60] sm:$0xff]  ;;  %v3530_v37 = vld [vmem:[#allocation4 + $0x198] sm:$0xff]  ;;  %3806 = vmatpush.msra.mxu2 %v3543_v28 }
 0x378   :  { %v6037_v43 = vld [vmem:[#allocation3 + $0x62] sm:$0xff]  ;;  %v2628_v58 = vadd.f32 %v5902_v30, %v2592_v42  ;;  %3661 = vmatmul.f32.gmra.mxu1 %v6035_v9  ;;  %v3692_v36 = vadd.f32 %v3691_v13, %v3651_v62  ;;  %v1480_v41 = vadd.f32 %v6448_v57, %v6447_v14  ;;  %v1482_v15 = vadd.f32 %v6450_v49, %v6449_v61  ;;  %v3562_v42 = vld [vmem:[#allocation4 + $0x298] sm:$0xff] }
 0x379   :  { %3743 = vmatmul.f32.gmra.mxu3 %v6037_v43  ;;  %v3133_v7 = vrot.slane %v3132_v5, 2  ;;  %v3139_v16 = vmax.f32 %v3137_v59, %v3138_v29  ;;  %v3146_v25 = vmax.f32 %v3144_v35, %v3145_v26  ;;  %v3153_v20 = vmax.f32 %v3151_v63, %v3152_v23  ;;  %3762 = vmatpush.msra.mxu1 %v3530_v37  ;;  %v3561_v29 = vld [vmem:[#allocation4 + $0x290] sm:$0xff]  ;;  %v3527_v3 = vld [vmem:[#allocation4 + $0x180] sm:$0xff] }
 0x37a   :  { %v2660_v18 = vmax.f32 %v2628_v58, 0.0  ;;  %v1758_v62 = vadd.f32 %v5871_v55, %v1480_v41  ;;  %3844 = vmatpush.msra.mxu3 %v3562_v42  ;;  %v3529_v26 = vld [vmem:[#allocation4 + $0x190] sm:$0xff]  ;;  %v3560_v55 = vld [vmem:[#allocation4 + $0x288] sm:$0xff] }
 0x37b   :  { %v3134_v53 = vmax.f32 %v3132_v5, %v3133_v7  ;;  %v3140_v51 = vrot.slane %v3139_v16, 2  ;;  %v3147_v54 = vrot.slane %v3146_v25, 2  ;;  %v6042_v50 = vpop.f32.mrf.mxu0  ;;  %v3154_v10 = vrot.slane %v3153_v20, 2  ;;  %3763 = vmatpush.msra.mxu1 %v3529_v26  ;;  %v6453_v26 = vld [vmem:[#allocation11_spill] sm:$0xff] }
 0x37c   :  { %v3732_v56 = vpop.f32.mrf.mxu3  ;;  %v2678_v39 = vmax.f32 %v2658_v24, %v2660_v18  ;;  %3845 = vmatpush.msra.mxu3 %v3561_v29  ;;  %v1760_v18 = vadd.f32 %v5915_v32, %v1482_v15 }
 0x37d   :  { %v6046_v40 = vadd.f32 %v3732_v56, %v3692_v36  ;;  %v3141_v48 = vmax.f32 %v3139_v16, %v3140_v51  ;;  %v3148_v2 = vmax.f32 %v3146_v25, %v3147_v54  ;;  %v3135_v52 = vrot.slane %v3134_v53, 1  ;;  %v3528_v16 = vld [vmem:[#allocation4 + $0x188] sm:$0xff] }
 0x37e   :  { %v2736_v4 = vrot.slane %v2678_v39, 2  ;;  %v2737_v59 = vrot.slane %v2678_v39, 4  ;;  %v2738_v35 = vrot.slane %v2678_v39, 6  ;;  %v3158_v63 = vsel %vm2793_vm3, %v2678_v39, -inf  ;;  %3846 = vmatpush.msra.mxu3 %v3560_v55  ;;  %3764 = vmatpush.msra.mxu1 %v3528_v16 }
 0x37f   :  { %v3142_v12 = vrot.slane %v3141_v48, 1  ;;  %v3149_v5 = vrot.slane %v3148_v2, 1  ;;  %v3159_v23 = vrot.slane %v3158_v63, 4  ;;  %v2037_v36 = vadd.f32 %v5877_v21, %v1758_v62 }
 0x380   :  { %v3165_v13 = vsel %vm2793_vm3, %v2736_v4, -inf  ;;  %v3172_v1 = vsel %vm2793_vm3, %v2737_v59, -inf  ;;  %v3179_v58 = vsel %vm2793_vm3, %v2738_v35, -inf  ;;  %v3155_v46 = vmax.f32 %v3153_v20, %v3154_v10  ;;  %3847 = vmatpush.msra.mxu3 %v3559_v17  ;;  %3765 = vmatpush.msra.mxu1 %v3527_v3  ;;  %v6452_v10 = vld [vmem:[#allocation30_spill] sm:$0xff]  ;;  %v3622_v3 = vld [vmem:[#allocation4 + $0x478] sm:$0xff] }
 0x381   :  { %v3143_v22 = vmax.f32 %v3141_v48, %v3142_v12  ;;  %v3166_v7 = vrot.slane %v3165_v13, 4  ;;  %v3160_v25 = vmax.f32 %v3158_v63, %v3159_v23  ;;  %v3173_v31 = vrot.slane %v3172_v1, 4  ;;  %v6451_v48 = vld [vmem:[#allocation12_spill] sm:$0xff]  ;;  %v6454_v23 = vld [vmem:[#allocation35_spill] sm:$0xff] }
 0x382   :  { %v3180_v24 = vrot.slane %v3179_v58, 4  ;;  %v3136_v51 = vmax.f32 %v3134_v53, %v3135_v52  ;;  %v3150_v21 = vmax.f32 %v3148_v2, %v3149_v5  ;;  %v2315_v57 = vadd.f32 %v5880_v0, %v2037_v36  ;;  %3955 = vmatpush.msrb.mxu3 %v3622_v3  ;;  %v3616_v3 = vld [vmem:[#allocation4 + $0x448] sm:$0xff] }
 0x383   :  { %v3167_v54 = vmax.f32 %v3165_v13, %v3166_v7  ;;  %v2556_v56 = vpop.f32.mrf.mxu0  ;;  %v3161_v28 = vrot.slane %v3160_v25, 2  ;;  %v3174_v20 = vmax.f32 %v3172_v1, %v3173_v31  ;;  %v3156_v41 = vrot.slane %v3155_v46, 1 }
 0x384   :  { %v3181_v14 = vmax.f32 %v3179_v58, %v3180_v24  ;;  %v3375_v39 = vsel %vm3326_vm4, %v3143_v22, %v3136_v51  ;;  %v2039_v32 = vadd.f32 %v5918_v44, %v1760_v18  ;;  %v1481_v42 = vadd.f32 %v6452_v10, %v6451_v48  ;;  %v6455_v24 = vld [vmem:[#allocation54_spill] sm:$0xff] }
 0x385   :  { %v3168_v61 = vrot.slane %v3167_v54, 2  ;;  %v3162_v53 = vmax.f32 %v3160_v25, %v3161_v28  ;;  %v3175_v49 = vrot.slane %v3174_v20, 2  ;;  %v2593_v37 = vadd.f32 %v6042_v50, %v2315_v57 }
 0x386   :  { %v3182_v15 = vrot.slane %v3181_v14, 2  ;;  %v3376_v4 = vsel %vm3328_vm5, %v3150_v21, %v3375_v39  ;;  %v1759_v63 = vadd.f32 %v5889_v8, %v1481_v42  ;;  %v3157_v62 = vmax.f32 %v3155_v46, %v3156_v41  ;;  %v3590_v21 = vld [vmem:[#allocation4 + $0x378] sm:$0xff]  ;;  %v3604_v41 = vld [vmem:[#allocation4 + $0x3e8] sm:$0xff]  ;;  %v3603_v42 = vld [vmem:[#allocation4 + $0x3e0] sm:$0xff] }
 0x387   :  { %v3169_v2 = vmax.f32 %v3167_v54, %v3168_v61  ;;  %v3163_v0 = vrot.slane %v3162_v53, 1  ;;  %v3176_v59 = vmax.f32 %v3174_v20, %v3175_v49  ;;  %v2317_v44 = vadd.f32 %v5924_v38, %v2039_v32  ;;  %v3605_v20 = vld [vmem:[#allocation4 + $0x3f0] sm:$0xff]  ;;  %3873 = vmatpush.msrb.mxu1 %v3590_v21  ;;  %v3620_v39 = vld [vmem:[#allocation4 + $0x468] sm:$0xff] }
 0x388   :  { %v3183_v35 = vmax.f32 %v3181_v14, %v3182_v15  ;;  %v1483_v13 = vadd.f32 %v6454_v23, %v6453_v26  ;;  %v2038_v1 = vadd.f32 %v5895_v27, %v1759_v63  ;;  %v3377_v50 = vsel %vm3330_vm6, %v3157_v62, %v3376_v4  ;;  %v3621_v14 = vld [vmem:[#allocation4 + $0x470] sm:$0xff]  ;;  %v3588_v49 = vld [vmem:[#allocation4 + $0x368] sm:$0xff] }
 0x389   :  { %v3170_v52 = vrot.slane %v3169_v2, 1  ;;  %v3164_v12 = vmax.f32 %v3162_v53, %v3163_v0  ;;  %v3177_v5 = vrot.slane %v3176_v59, 1  ;;  %v2629_v8 = vadd.f32 %v5902_v30, %v2593_v37  ;;  %v6456_v61 = vld [vmem:[#allocation56_spill] sm:$0xff]  ;;  %3956 = vmatpush.msrb.mxu3 %v3621_v14 }
 0x38a   :  { %v3184_v29 = vrot.slane %v3183_v35, 1  ;;  %v1761_v38 = vadd.f32 %v5929_v19, %v1483_v13  ;;  %v2316_v27 = vadd.f32 %v5906_v6, %v2038_v1  ;;  %v3606_v19 = vld [vmem:[#allocation4 + $0x3f8] sm:$0xff]  ;;  %v3589_v6 = vld [vmem:[#allocation4 + $0x370] sm:$0xff] }
 0x38b   :  { %v3171_v58 = vmax.f32 %v3169_v2, %v3170_v52  ;;  %v2559_v36 = vpop.f32.mrf.mxu0  ;;  %v3178_v22 = vmax.f32 %v3176_v59, %v3177_v5  ;;  %v3378_v7 = vsel %vm3332_vm7, %v3164_v12, %v3377_v50  ;;  %v2661_v54 = vmax.f32 %v2629_v8, 0.0  ;;  %3914 = vmatpush.msrb.mxu2 %v3606_v19  ;;  %3874 = vmatpush.msrb.mxu1 %v3589_v6  ;;  %v3619_v2 = vld [vmem:[#allocation4 + $0x460] sm:$0xff]  ;;  %v3602_v12 = vld [vmem:[#allocation4 + $0x3d8] sm:$0xff]  ;;  %v3600_v19 = vld [vmem:[#allocation4 + $0x3c8] sm:$0xff] }
 0x38c   :  { %v2595_v46 = vadd.f32 %v2559_v36, %v2317_v44  ;;  %v3185_v55 = vmax.f32 %v3183_v35, %v3184_v29  ;;  %v2040_v18 = vadd.f32 %v6455_v24, %v1761_v38  ;;  %v2594_v28 = vadd.f32 %v2556_v56, %v2316_v27  ;;  %3957 = vmatpush.msrb.mxu3 %v3620_v39  ;;  %v3587_v44 = vld [vmem:[#allocation4 + $0x360] sm:$0xff] }
 0x38d   :  { %v3379_v16 = vsel %vm3334_vm8, %v3171_v58, %v3378_v7  ;;  %3915 = vmatpush.msrb.mxu2 %v3605_v20  ;;  %3875 = vmatpush.msrb.mxu1 %v3588_v49  ;;  %v3618_v58 = vld [vmem:[#allocation4 + $0x458] sm:$0xff]  ;;  %v3584_v20 = vld [vmem:[#allocation4 + $0x348] sm:$0xff] }
 0x38e   :  { %v3380_v25 = vsel %vm3336_vm9, %v3178_v22, %v3379_v16  ;;  %v2631_v31 = vadd.f32 %v5902_v30, %v2595_v46  ;;  %v2318_v32 = vadd.f32 %v6456_v61, %v2040_v18  ;;  %v2630_v37 = vadd.f32 %v5902_v30, %v2594_v28  ;;  %3958 = vmatpush.msrb.mxu3 %v3619_v2  ;;  %v3438_v22 = vld [vmem:[#allocation3 + $0x11] sm:$0xff] }
 0x38f   :  { %v6079_v51 = vsel %vm3338_vm10, %v3185_v55, %v3380_v25  ;;  %3916 = vmatpush.msrb.mxu2 %v3604_v41  ;;  %v3586_v7 = vld [vmem:[#allocation4 + $0x358] sm:$0xff]  ;;  %3876 = vmatpush.msrb.mxu1 %v3587_v44  ;;  %v3601_v16 = vld [vmem:[#allocation4 + $0x3d0] sm:$0xff] }
 0x390   :  { %3404 = vst [vmem:[#allocation3 + $0x71] sm:$0xff] %v6079_v51  ;;  %v2663_v17 = vmax.f32 %v2631_v31, 0.0  ;;  %3705 = vmatmul.f32.gmra.mxu2 %v6079_v51  ;;  %v3617_v25 = vld [vmem:[#allocation4 + $0x450] sm:$0xff]  ;;  %v2662_v31 = vmax.f32 %v2630_v37, 0.0  ;;  %3959 = vmatpush.msrb.mxu3 %v3618_v58  ;;  %v3598_v44 = vld [vmem:[#allocation4 + $0x3b8] sm:$0xff] }
 0x391   :  { %3917 = vmatpush.msrb.mxu2 %v3603_v42  ;;  %3877 = vmatpush.msrb.mxu1 %v3586_v7  ;;  %v3599_v42 = vld [vmem:[#allocation4 + $0x3c0] sm:$0xff] }
 0x392   :  { %v2679_v57 = vmax.f32 %v2661_v54, %v2663_v17  ;;  %3960 = vmatpush.msrb.mxu3 %v3617_v25 }
 0x393   :  { %v2562_v53 = vpop.f32.mrf.mxu0  ;;  %v3694_v50 = vpop.f32.mrf.mxu2  ;;  %3918 = vmatpush.msrb.mxu2 %v3602_v12  ;;  %v3614_v12 = vld [vmem:[#allocation4 + $0x438] sm:$0xff] }
 0x394   :  { %v2739_v15 = vrot.slane %v2679_v57, 2  ;;  %v2740_v48 = vrot.slane %v2679_v57, 4  ;;  %v2741_v10 = vrot.slane %v2679_v57, 6  ;;  %v3186_v56 = vsel %vm2793_vm3, %v2679_v57, -inf  ;;  %3961 = vmatpush.msrb.mxu3 %v3616_v3 }
 0x395   :  { %v3187_v4 = vrot.slane %v3186_v56, 4  ;;  %v2596_v0 = vadd.f32 %v2562_v53, %v2318_v32  ;;  %v3653_v59 = vpop.f32.mrf.mxu1  ;;  %3919 = vmatpush.msrb.mxu2 %v3601_v16  ;;  %v3615_v53 = vld [vmem:[#allocation4 + $0x440] sm:$0xff] }
 0x396   :  { %v3193_v35 = vsel %vm2793_vm3, %v2739_v15, -inf  ;;  %v3200_v63 = vsel %vm2793_vm3, %v2740_v48, -inf  ;;  %v3207_v62 = vsel %vm2793_vm3, %v2741_v10, -inf  ;;  %v3654_v52 = vadd.f32 %v5948_v60, %v3653_v59  ;;  %v3430_v10 = vld [vmem:[#allocation3 + $0x10] sm:$0xff]  ;;  %v6103_v59 = vld [vmem:[#allocation3 + $0x21] sm:$0xff]  ;;  %3962 = vmatpush.msrb.mxu3 %v3615_v53 }
 0x397   :  { %v3188_v5 = vmax.f32 %v3186_v56, %v3187_v4  ;;  %v3194_v29 = vrot.slane %v3193_v35, 4  ;;  %v3201_v26 = vrot.slane %v3200_v63, 4  ;;  %v3208_v23 = vrot.slane %v3207_v62, 4  ;;  %v6090_v13 = vld [vmem:[#allocation3 + $0x70] sm:$0xff]  ;;  %3920 = vmatpush.msrb.mxu2 %v3600_v19 }
 0x398   :  { %v6092_v1 = vld [vmem:[#allocation3 + $0x72] sm:$0xff]  ;;  %v2632_v36 = vadd.f32 %v5902_v30, %v2596_v0  ;;  %3664 = vmatmul.f32.gmra.mxu1 %v6090_v13  ;;  %v3695_v60 = vadd.f32 %v3694_v50, %v3654_v52  ;;  %3807 = vmatmul.f32.vlgmr.msra.gmra.mxu2 %v3438_v22 }
 0x399   :  { %3746 = vmatmul.f32.gmra.mxu3 %v6092_v1  ;;  %v3189_v8 = vrot.slane %v3188_v5, 2  ;;  %v3195_v46 = vmax.f32 %v3193_v35, %v3194_v29  ;;  %v3202_v38 = vmax.f32 %v3200_v63, %v3201_v26  ;;  %v3209_v55 = vmax.f32 %v3207_v62, %v3208_v23  ;;  %v3585_v30 = vld [vmem:[#allocation4 + $0x350] sm:$0xff]  ;;  %v3583_v35 = vld [vmem:[#allocation4 + $0x340] sm:$0xff]  ;;  %3921 = vmatpush.msrb.mxu2 %v3599_v42 }
 0x39a   :  { %v2664_v27 = vmax.f32 %v2632_v36, 0.0  ;;  %3878 = vmatpush.msrb.mxu1 %v3585_v30  ;;  %v3446_v56 = vld [vmem:[#allocation3 + $0x12] sm:$0xff]  ;;  %3963 = vmatpush.msrb.mxu3 %v3614_v12 }
 0x39b   :  { %v3190_v24 = vmax.f32 %v3188_v5, %v3189_v8  ;;  %v3196_v18 = vrot.slane %v3195_v46, 2  ;;  %v3203_v54 = vrot.slane %v3202_v38, 2  ;;  %v3210_v57 = vrot.slane %v3209_v55, 2  ;;  %v3582_v5 = vld [vmem:[#allocation4 + $0x338] sm:$0xff]  ;;  %v3613_v50 = vld [vmem:[#allocation4 + $0x430] sm:$0xff]  ;;  %3922 = vmatpush.msrb.mxu2 %v3598_v44 }
 0x39c   :  { %v3735_v17 = vpop.f32.mrf.mxu3  ;;  %v2680_v21 = vmax.f32 %v2662_v31, %v2664_v27  ;;  %3879 = vmatpush.msrb.mxu1 %v3584_v20  ;;  %3964 = vmatpush.msrb.mxu3 %v3613_v50  ;;  %v3581_v20 = vld [vmem:[#allocation4 + $0x330] sm:$0xff]  ;;  %v3594_v44 = vld [vmem:[#allocation4 + $0x398] sm:$0xff] }
 0x39d   :  { %v6097_v28 = vadd.f32 %v3735_v17, %v3695_v60  ;;  %v3197_v14 = vmax.f32 %v3195_v46, %v3196_v18  ;;  %v3204_v6 = vmax.f32 %v3202_v38, %v3203_v54  ;;  %v3191_v49 = vrot.slane %v3190_v24, 1  ;;  %v3597_v60 = vld [vmem:[#allocation4 + $0x3b0] sm:$0xff]  ;;  %v6109_v18 = vld [vmem:[#allocation3 + $0x22] sm:$0xff]  ;;  %v3610_v12 = vld [vmem:[#allocation4 + $0x418] sm:$0xff] }
 0x39e   :  { %v2742_v41 = vrot.slane %v2680_v21, 2  ;;  %v2743_v39 = vrot.slane %v2680_v21, 4  ;;  %v2744_v61 = vrot.slane %v2680_v21, 6  ;;  %v3214_v32 = vsel %vm2793_vm3, %v2680_v21, -inf  ;;  %3880 = vmatpush.msrb.mxu1 %v3583_v35  ;;  %3923 = vmatpush.msrb.mxu2 %v3597_v60  ;;  %v6111_v54 = vld [vmem:[#allocation3 + $0x31] sm:$0xff]  ;;  %v4349_v60 = vld [vmem:[#allocation3 + $0x40] sm:$0xff] }
 0x39f   :  { %v3198_v15 = vrot.slane %v3197_v14, 1  ;;  %v3205_v48 = vrot.slane %v3204_v6, 1  ;;  %v3215_v2 = vrot.slane %v3214_v32, 4  ;;  %v3211_v62 = vmax.f32 %v3209_v55, %v3210_v57  ;;  %v6124_v35 = vld [vmem:[#allocation3 + $0x30] sm:$0xff] }
 0x3a0   :  { %v3221_v37 = vsel %vm2793_vm3, %v2742_v41, -inf  ;;  %v3228_v4 = vsel %vm2793_vm3, %v2743_v39, -inf  ;;  %v3235_v0 = vsel %vm2793_vm3, %v2744_v61, -inf  ;;  %3766 = vmatmul.f32.vlgmr.msra.gmra.mxu1 %v3430_v10  ;;  %3810 = vmatmul.f32.gmra.mxu2 %v6103_v59  ;;  %v3192_v58 = vmax.f32 %v3190_v24, %v3191_v49  ;;  %v6107_v24 = vld [vmem:[#allocation3 + $0x20] sm:$0xff]  ;;  %v3580_v39 = vld [vmem:[#allocation4 + $0x328] sm:$0xff] }
 0x3a1   :  { %3848 = vmatmul.f32.vlgmr.msra.gmra.mxu3 %v3446_v56  ;;  %v3199_v63 = vmax.f32 %v3197_v14, %v3198_v15  ;;  %v3222_v52 = vrot.slane %v3221_v37, 4  ;;  %v3216_v29 = vmax.f32 %v3214_v32, %v3215_v2  ;;  %v3229_v26 = vrot.slane %v3228_v4, 4  ;;  %3881 = vmatpush.msrb.mxu1 %v3582_v5  ;;  %v3596_v14 = vld [vmem:[#allocation4 + $0x3a8] sm:$0xff]  ;;  %v3595_v61 = vld [vmem:[#allocation4 + $0x3a0] sm:$0xff]  ;;  %v3578_v5 = vld [vmem:[#allocation4 + $0x318] sm:$0xff] }
 0x3a2   :  { %v3236_v23 = vrot.slane %v3235_v0, 4  ;;  %v3206_v22 = vmax.f32 %v3204_v6, %v3205_v48  ;;  %v3212_v38 = vrot.slane %v3211_v62, 1  ;;  %v3612_v6 = vld [vmem:[#allocation4 + $0x428] sm:$0xff]  ;;  %v3611_v32 = vld [vmem:[#allocation4 + $0x420] sm:$0xff]  ;;  %3924 = vmatpush.msrb.mxu2 %v3596_v14 }
 0x3a3   :  { %v3223_v36 = vmax.f32 %v3221_v37, %v3222_v52  ;;  %v3217_v7 = vrot.slane %v3216_v29, 2  ;;  %v3230_v8 = vmax.f32 %v3228_v4, %v3229_v26  ;;  %v3382_v55 = vsel %vm3326_vm4, %v3199_v63, %v3192_v58  ;;  %3882 = vmatpush.msrb.mxu1 %v3581_v20  ;;  %3965 = vmatpush.msrb.mxu3 %v3612_v6  ;;  %v6126_v63 = vld [vmem:[#allocation3 + $0x32] sm:$0xff]  ;;  %v3579_v52 = vld [vmem:[#allocation4 + $0x320] sm:$0xff] }
 0x3a4   :  { %v3237_v46 = vmax.f32 %v3235_v0, %v3236_v23  ;;  %v3383_v17 = vsel %vm3328_vm5, %v3206_v22, %v3382_v55  ;;  %v3213_v57 = vmax.f32 %v3211_v62, %v3212_v38  ;;  %3925 = vmatpush.msrb.mxu2 %v3595_v61  ;;  %v6128_v62 = vld [vmem:[#allocation3 + $0x41] sm:$0xff]  ;;  %v6137_v23 = vld [vmem:[%s6210_s4] ss:$0 sm:$0xff]  ;;  %v4351_v55 = vld [vmem:[#allocation3 + $0x51] sm:$0xff]  ;;  %s4411_s4 = smov [#allocation7]  }
 0x3a5   :  { %v3224_v16 = vrot.slane %v3223_v36, 2  ;;  %v3218_v25 = vmax.f32 %v3216_v29, %v3217_v7  ;;  %v3231_v31 = vrot.slane %v3230_v8, 2  ;;  %3883 = vmatpush.msrb.mxu1 %v3580_v39  ;;  %3966 = vmatpush.msrb.mxu3 %v3611_v32  ;;  %v3593_v29 = vld [vmem:[#allocation4 + $0x390] sm:$0xff]  ;;  %v4350_v22 = vld [vmem:[#allocation3 + $0x42] sm:$0xff]  ;;  %s4016_s14 = sshll.u32 %s4411_s4, 4  ;;  %s4017_s14 = int_to_ptr.vmem [resolvable:$true] %s4016_s14 }
 0x3a6   :  { %v3238_v27 = vrot.slane %v3237_v46, 2  ;;  %v3384_v48 = vsel %vm3330_vm6, %v3213_v57, %v3383_v17  ;;  %3926 = vmatpush.msrb.mxu2 %v3594_v44  ;;  %v3609_v58 = vld [vmem:[#allocation4 + $0x410] sm:$0xff]  ;;  %v3608_v38 = vld [vmem:[#allocation4 + $0x408] sm:$0xff]  ;;  %v3575_v17 = vld [vmem:[#allocation4 + $0x300] sm:$0xff] }
 0x3a7   :  { %v3225_v30 = vmax.f32 %v3223_v36, %v3224_v16  ;;  %v3219_v19 = vrot.slane %v3218_v25, 1  ;;  %v3232_v3 = vmax.f32 %v3230_v8, %v3231_v31  ;;  %3884 = vmatpush.msrb.mxu1 %v3579_v52  ;;  %3967 = vmatpush.msrb.mxu3 %v3610_v12  ;;  %v3577_v8 = vld [vmem:[#allocation4 + $0x310] sm:$0xff]  ;;  %v3457_v57 = vld [vmem:[#allocation3 + $0x40] sm:$0xff] }
 0x3a8   :  { %v3239_v21 = vmax.f32 %v3237_v46, %v3238_v27  ;;  %3769 = vmatmul.f32.gmra.mxu1 %v6107_v24  ;;  %3813 = vmatmul.f32.gmra.mxu2 %v6111_v54  ;;  %v3592_v46 = vld [vmem:[#allocation4 + $0x388] sm:$0xff]  ;;  %v4352_v32 = vld [vmem:[#allocation3 + $0x50] sm:$0xff] }
 0x3a9   :  { %3851 = vmatmul.f32.gmra.mxu3 %v6109_v18  ;;  %v3226_v41 = vrot.slane %v3225_v30, 1  ;;  %v3220_v53 = vmax.f32 %v3218_v25, %v3219_v19  ;;  %v3233_v49 = vrot.slane %v3232_v3, 1  ;;  %3885 = vmatpush.msrb.mxu1 %v3578_v5  ;;  %v3591_v25 = vld [vmem:[#allocation4 + $0x380] sm:$0xff]  ;;  %v3576_v27 = vld [vmem:[#allocation4 + $0x308] sm:$0xff] }
 0x3aa   :  { %v3240_v15 = vrot.slane %v3239_v21, 1  ;;  %3927 = vmatpush.msrb.mxu2 %v3593_v29  ;;  %3968 = vmatpush.msrb.mxu3 %v3609_v58 }
 0x3ab   :  { %v3227_v10 = vmax.f32 %v3225_v30, %v3226_v41  ;;  %v3234_v56 = vmax.f32 %v3232_v3, %v3233_v49  ;;  %v3385_v42 = vsel %vm3332_vm7, %v3220_v53, %v3384_v48  ;;  %3886 = vmatpush.msrb.mxu1 %v3577_v8  ;;  %v3607_v30 = vld [vmem:[#allocation4 + $0x400] sm:$0xff] }
 0x3ac   :  { %v3241_v2 = vmax.f32 %v3239_v21, %v3240_v15  ;;  %3928 = vmatpush.msrb.mxu2 %v3592_v46  ;;  %3969 = vmatpush.msrb.mxu3 %v3608_v38  ;;  %v3473_v41 = vld [vmem:[#allocation3 + $0x42] sm:$0xff]  ;;  %v3470_v15 = vld [vmem:[#allocation3 + $0x91] sm:$0xff] }
 0x3ad   :  { %v3386_v37 = vsel %vm3334_vm8, %v3227_v10, %v3385_v42  ;;  %3887 = vmatpush.msrb.mxu1 %v3576_v27  ;;  %v3478_v10 = vld [vmem:[#allocation3 + $0x92] sm:$0xff] }
 0x3ae   :  { %v3387_v4 = vsel %vm3336_vm9, %v3234_v56, %v3386_v37  ;;  %3929 = vmatpush.msrb.mxu2 %v3591_v25  ;;  %3970 = vmatpush.msrb.mxu3 %v3607_v30 }
 0x3af   :  { %v6122_v0 = vsel %vm3338_vm10, %v3241_v2, %v3387_v4  ;;  %3888 = vmatpush.msrb.mxu1 %v3575_v17 }
 0x3b0   :  { %3405 = vst [vmem:[#allocation3 + $0x81] sm:$0xff] %v6122_v0  ;;  %3772 = vmatmul.f32.gmra.mxu1 %v6124_v35  ;;  %3816 = vmatmul.f32.gmra.mxu2 %v6128_v62 }
 0x3b1   :  { %3854 = vmatmul.f32.gmra.mxu3 %v6126_v63 }
 0x3b3   :  { %v3697_v36 = vpop.f32.mrf.mxu2 }
 0x3b5   :  { %v3656_v26 = vpop.f32.mrf.mxu1 }
 0x3b6   :  { %v3657_v50 = vadd.f32 %v6137_v23, %v3656_v26 }
 0x3b7   :  { %v3453_v21 = vld [vmem:[#allocation3 + $0x82] sm:$0xff] }
 0x3b8   :  { %3775 = vmatmul.f32.gmra.mxu1 %v4349_v60  ;;  %v3698_v7 = vadd.f32 %v3697_v36, %v3657_v50  ;;  %3819 = vmatmul.f32.gmra.mxu2 %v4351_v55 }
 0x3b9   :  { %3857 = vmatmul.f32.gmra.mxu3 %v4350_v22 }
 0x3bc   :  { %v3738_v16 = vpop.f32.mrf.mxu3 }
 0x3bd   :  { %v6140_v31 = vadd.f32 %v3738_v16, %v3698_v7 }
 0x3c0   :  { %3778 = vmatmul.f32.gmra.mxu1 %v5980_v47  ;;  %3822 = vmatmul.f32.gmra.mxu2 %v6023_v11  ;;  %v3437_v47 = vld [vmem:[#allocation3 + $0x80] sm:$0xff] }
 0x3c1   :  { %3860 = vmatmul.f32.gmra.mxu3 %v5982_v33 }
 0x3c8   :  { %3781 = vmatmul.f32.gmra.mxu1 %v6035_v9  ;;  %3825 = vmatmul.f32.gmra.mxu2 %v6079_v51 }
 0x3c9   :  { %3863 = vmatmul.f32.gmra.mxu3 %v6037_v43 }
 0x3d0   :  { %3784 = vmatmul.f32.gmra.mxu1 %v6090_v13  ;;  %3828 = vmatmul.f32.gmra.mxu2 %v6122_v0 }
 0x3d1   :  { %3866 = vmatmul.f32.gmra.mxu3 %v6092_v1 }
 0x3d3   :  { %v3700_v33 = vpop.f32.mrf.mxu2 }
 0x3d5   :  { %v3659_v19 = vpop.f32.mrf.mxu1 }
 0x3d6   :  { %v3660_v3 = vadd.f32 %v6137_v23, %v3659_v19 }
 0x3d8   :  { %3787 = vmatmul.f32.gmra.mxu1 %v3437_v47  ;;  %v3701_v20 = vadd.f32 %v3700_v33, %v3660_v3  ;;  %3930 = vmatmul.f32.vlgmr.msrb.gmra.mxu2 %v6103_v59  ;;  %v3466_v59 = vld [vmem:[#allocation3 + $0x51] sm:$0xff] }
 0x3d9   :  { %3869 = vmatmul.f32.gmra.mxu3 %v3453_v21 }
 0x3dc   :  { %v3741_v14 = vpop.f32.mrf.mxu3 }
 0x3dd   :  { %v6153_v6 = vadd.f32 %v3741_v14, %v3701_v20 }
 0x3e0   :  { %3889 = vmatmul.f32.vlgmr.msrb.gmra.mxu1 %v6107_v24  ;;  %3933 = vmatmul.f32.gmra.mxu2 %v6111_v54 }
 0x3e1   :  { %3971 = vmatmul.f32.vlgmr.msrb.gmra.mxu3 %v6109_v18  ;;  %v4353_v18 = vld [vmem:[#allocation3 + $0x52] sm:$0xff] }
 0x3e8   :  { %3892 = vmatmul.f32.gmra.mxu1 %v6124_v35  ;;  %3936 = vmatmul.f32.gmra.mxu2 %v6128_v62 }
 0x3e9   :  { %3974 = vmatmul.f32.gmra.mxu3 %v6126_v63 }
 0x3f0   :  { %3895 = vmatmul.f32.gmra.mxu1 %v3457_v57  ;;  %3939 = vmatmul.f32.gmra.mxu2 %v3466_v59 }
 0x3f1   :  { %3977 = vmatmul.f32.gmra.mxu3 %v3473_v41 }
 0x3f3   :  { %v3703_v24 = vpop.f32.mrf.mxu2 }
 0x3f5   :  { %v3662_v39 = vpop.f32.mrf.mxu1 }
 0x3f6   :  { %v3663_v61 = vadd.f32 %v6137_v23, %v3662_v39 }
 0x3f8   :  { %3898 = vmatmul.f32.gmra.mxu1 %v4352_v32  ;;  %v3704_v54 = vadd.f32 %v3703_v24, %v3663_v61  ;;  %3942 = vmatmul.f32.gmra.mxu2 %v6023_v11 }
 0x3f9   :  { %3980 = vmatmul.f32.gmra.mxu3 %v4353_v18 }
 0x3fc   :  { %v3744_v53 = vpop.f32.mrf.mxu3 }
 0x3fd   :  { %v6163_v49 = vadd.f32 %v3744_v53, %v3704_v54 }
 0x400   :  { %3901 = vmatmul.f32.gmra.mxu1 %v6035_v9  ;;  %3945 = vmatmul.f32.gmra.mxu2 %v6079_v51  ;;  %v4354_v9 = vld [vmem:[#allocation3] sm:$0xff] }
 0x401   :  { %3983 = vmatmul.f32.gmra.mxu3 %v6037_v43 }
 0x408   :  { %3904 = vmatmul.f32.gmra.mxu1 %v6090_v13  ;;  %3948 = vmatmul.f32.gmra.mxu2 %v6122_v0 }
 0x409   :  { %3986 = vmatmul.f32.gmra.mxu3 %v6092_v1 }
 0x410   :  { %3907 = vmatmul.f32.gmra.mxu1 %v3437_v47  ;;  %3951 = vmatmul.f32.gmra.mxu2 %v3470_v15 }
 0x411   :  { %3989 = vmatmul.f32.gmra.mxu3 %v3453_v21 }
 0x413   :  { %v3706_v11 = vpop.f32.mrf.mxu2 }
 0x415   :  { %v3665_v48 = vpop.f32.mrf.mxu1 }
 0x416   :  { %v3666_v56 = vadd.f32 %v6137_v23, %v3665_v48 }
 0x418   :  { %3910 = vmatmul.f32.gmra.mxu1 %v4354_v9  ;;  %v3707_v43 = vadd.f32 %v3706_v11, %v3666_v56 }
 0x419   :  { %3992 = vmatmul.f32.gmra.mxu3 %v3478_v10 }
 0x41b   :  { %v3808_v13 = vpop.f32.mrf.mxu2 }
 0x41c   :  { %v3747_v51 = vpop.f32.mrf.mxu3 }
 0x41d   :  { %v6172_v42 = vadd.f32 %v3747_v51, %v3707_v43  ;;  %v3767_v1 = vpop.f32.mrf.mxu1 }
 0x41e   :  { %v3768_v46 = vadd.f32 %v3767_v1, %v5958_v34 }
 0x420   :  { %v3809_v38 = vadd.f32 %v3808_v13, %v3768_v46 }
 0x423   :  { %v3811_v37 = vpop.f32.mrf.mxu2 }
 0x424   :  { %v3849_v2 = vpop.f32.mrf.mxu3 }
 0x425   :  { %v3770_v4 = vpop.f32.mrf.mxu1  ;;  %v3850_v16 = vadd.f32 %v3849_v2, %v3809_v38 }
 0x426   :  { %v3771_v30 = vadd.f32 %v3770_v4, %v5989_v45 }
 0x428   :  { %v3812_v19 = vadd.f32 %v3811_v37, %v3771_v30 }
 0x42b   :  { %v3814_v35 = vpop.f32.mrf.mxu2 }
 0x42c   :  { %v3852_v0 = vpop.f32.mrf.mxu3 }
 0x42d   :  { %v3773_v63 = vpop.f32.mrf.mxu1  ;;  %v3853_v21 = vadd.f32 %v3852_v0, %v3812_v19 }
 0x42e   :  { %v3774_v57 = vadd.f32 %v3773_v63, %v6046_v40 }
 0x430   :  { %v3815_v59 = vadd.f32 %v3814_v35, %v3774_v57 }
 0x433   :  { %v3817_v52 = vpop.f32.mrf.mxu2 }
 0x434   :  { %v3855_v62 = vpop.f32.mrf.mxu3 }
 0x435   :  { %v3776_v44 = vpop.f32.mrf.mxu1  ;;  %v3856_v24 = vadd.f32 %v3855_v62, %v3815_v59 }
 0x436   :  { %v3777_v54 = vadd.f32 %v3776_v44, %v6097_v28 }
 0x438   :  { %v3818_v11 = vadd.f32 %v3817_v52, %v3777_v54 }
 0x43b   :  { %v3820_v5 = vpop.f32.mrf.mxu2 }
 0x43c   :  { %v3858_v12 = vpop.f32.mrf.mxu3 }
 0x43d   :  { %v3779_v29 = vpop.f32.mrf.mxu1  ;;  %v3859_v56 = vadd.f32 %v3858_v12, %v3818_v11 }
 0x43e   :  { %v3780_v51 = vadd.f32 %v3779_v29, %v6140_v31 }
 0x440   :  { %v3821_v2 = vadd.f32 %v3820_v5, %v3780_v51 }
 0x443   :  { %v3823_v23 = vpop.f32.mrf.mxu2 }
 0x444   :  { %v3861_v26 = vpop.f32.mrf.mxu3 }
 0x445   :  { %v3782_v50 = vpop.f32.mrf.mxu1  ;;  %v3862_v0 = vadd.f32 %v3861_v26, %v3821_v2 }
 0x446   :  { %v3783_v62 = vadd.f32 %v3782_v50, %v6153_v6 }
 0x448   :  { %v3824_v12 = vadd.f32 %v3823_v23, %v3783_v62 }
 0x44b   :  { %v6174_v36 = vpop.f32.mrf.mxu2 }
 0x44c   :  { %v3864_v58 = vpop.f32.mrf.mxu3 }
 0x44d   :  { %v6176_v60 = vpop.f32.mrf.mxu1 }
 0x44e   :  { %v3786_v5 = vadd.f32 %v6176_v60, %v6163_v49 }
 0x450   :  { %v3827_v30 = vadd.f32 %v6174_v36, %v3786_v5 }
 0x453   :  { %v6180_v7 = vpop.f32.mrf.mxu2 }
 0x454   :  { %v6178_v22 = vpop.f32.mrf.mxu3 }
 0x455   :  { %v6182_v8 = vpop.f32.mrf.mxu1  ;;  %v3868_v50 = vadd.f32 %v6178_v22, %v3827_v30 }
 0x45b   :  { %v3931_v25 = vpop.f32.mrf.mxu2 }
 0x45c   :  { %v6185_v55 = vpop.f32.mrf.mxu3 }
 0x45d   :  { %v3890_v27 = vpop.f32.mrf.mxu1 }
 0x45e   :  { %v3891_v17 = vadd.f32 %v3890_v27, %v3850_v16  ;;  %v3865_v16 = vadd.f32 %v3864_v58, %v3824_v12  ;;  %v3789_v58 = vadd.f32 %v6182_v8, %v6172_v42 }
 0x460   :  { %v3932_v3 = vadd.f32 %v3931_v25, %v3891_v17  ;;  %v3830_v49 = vadd.f32 %v6180_v7, %v3789_v58 }
 0x463   :  { %v3934_v20 = vpop.f32.mrf.mxu2 }
 0x464   :  { %v3972_v47 = vpop.f32.mrf.mxu3 }
 0x465   :  { %v3973_v33 = vadd.f32 %v3972_v47, %v3932_v3  ;;  %v3893_v14 = vpop.f32.mrf.mxu1 }
 0x466   :  { %v3894_v34 = vadd.f32 %v3893_v14, %v3853_v21 }
 0x467   :  { %v3996_v41 = vmax.f32 %v3973_v33, 0.0 }
 0x468   :  { %v3935_v39 = vadd.f32 %v3934_v20, %v3894_v34  ;;  %v3871_v20 = vadd.f32 %v6185_v55, %v3830_v49 }
 0x469   :  { %4004 = vst [vmem:[#allocation7] sm:$0xff] %v3996_v41 }
 0x46b   :  { %v3937_v18 = vpop.f32.mrf.mxu2 }
 0x46c   :  { %v3975_v61 = vpop.f32.mrf.mxu3 }
 0x46d   :  { %v3976_v32 = vadd.f32 %v3975_v61, %v3935_v39  ;;  %v3896_v45 = vpop.f32.mrf.mxu1 }
 0x46e   :  { %v3897_v15 = vadd.f32 %v3896_v45, %v3856_v24 }
 0x46f   :  { %v3997_v53 = vmax.f32 %v3976_v32, 0.0 }
 0x470   :  { %v3938_v48 = vadd.f32 %v3937_v18, %v3897_v15 }
 0x471   :  { %4005 = vst [vmem:[#allocation7 + $0x8] sm:$0xff] %v3997_v53 }
 0x473   :  { %v3940_v9 = vpop.f32.mrf.mxu2 }
 0x474   :  { %v3978_v10 = vpop.f32.mrf.mxu3 }
 0x475   :  { %v3979_v40 = vadd.f32 %v3978_v10, %v3938_v48  ;;  %v3899_v43 = vpop.f32.mrf.mxu1 }
 0x476   :  { %v3900_v1 = vadd.f32 %v3899_v43, %v3859_v56 }
 0x477   :  { %v3998_v13 = vmax.f32 %v3979_v40, 0.0 }
 0x478   :  { %v3941_v37 = vadd.f32 %v3940_v9, %v3900_v1 }
 0x479   :  { %4006 = vst [vmem:[#allocation7 + $0x10] sm:$0xff] %v3998_v13 }
 0x47b   :  { %v3943_v35 = vpop.f32.mrf.mxu2 }
 0x47c   :  { %v3981_v4 = vpop.f32.mrf.mxu3 }
 0x47d   :  { %v3982_v28 = vadd.f32 %v3981_v4, %v3941_v37  ;;  %v3902_v63 = vpop.f32.mrf.mxu1 }
 0x47e   :  { %v3903_v44 = vadd.f32 %v3902_v63, %v3862_v0 }
 0x47f   :  { %v3999_v52 = vmax.f32 %v3982_v28, 0.0 }
 0x480   :  { %v3944_v46 = vadd.f32 %v3943_v35, %v3903_v44 }
 0x481   :  { %4007 = vst [vmem:[#allocation7 + $0x18] sm:$0xff] %v3999_v52 }
 0x483   :  { %v3946_v25 = vpop.f32.mrf.mxu2 }
 0x484   :  { %v3984_v38 = vpop.f32.mrf.mxu3 }
 0x485   :  { %v3985_v31 = vadd.f32 %v3984_v38, %v3944_v46  ;;  %v3905_v29 = vpop.f32.mrf.mxu1 }
 0x486   :  { %v3906_v26 = vadd.f32 %v3905_v29, %v3865_v16 }
 0x487   :  { %v4000_v27 = vmax.f32 %v3985_v31, 0.0 }
 0x488   :  { %v3947_v17 = vadd.f32 %v3946_v25, %v3906_v26 }
 0x489   :  { %4008 = vst [vmem:[#allocation7 + $0x20] sm:$0xff] %v4000_v27 }
 0x48b   :  { %v3949_v21 = vpop.f32.mrf.mxu2 }
 0x48c   :  { %v3987_v6 = vpop.f32.mrf.mxu3 }
 0x48d   :  { %v3988_v19 = vadd.f32 %v3987_v6, %v3947_v17  ;;  %v3908_v23 = vpop.f32.mrf.mxu1 }
 0x48e   :  { %v3909_v47 = vadd.f32 %v3908_v23, %v3868_v50 }
 0x48f   :  { %v4001_v3 = vmax.f32 %v3988_v19, 0.0 }
 0x490   :  { %v3950_v60 = vadd.f32 %v3949_v21, %v3909_v47 }
 0x491   :  { %4009 = vst [vmem:[#allocation7 + $0x28] sm:$0xff] %v4001_v3 }
 0x493   :  { %v3952_v22 = vpop.f32.mrf.mxu2 }
 0x494   :  { %v3990_v33 = vpop.f32.mrf.mxu3 }
 0x495   :  { %v3991_v36 = vadd.f32 %v3990_v33, %v3950_v60  ;;  %v3911_v14 = vpop.f32.mrf.mxu1 }
 0x496   :  { %v3912_v41 = vadd.f32 %v3911_v14, %v3871_v20 }
 0x497   :  { %v4002_v57 = vmax.f32 %v3991_v36, 0.0 }
 0x498   :  { %v3953_v34 = vadd.f32 %v3952_v22, %v3912_v41 }
 0x499   :  { %4010 = vst [vmem:[#allocation7 + $0x30] sm:$0xff] %v4002_v57 }
 0x49c   :  { %v3993_v59 = vpop.f32.mrf.mxu3 }
 0x49d   :  { %v3994_v42 = vadd.f32 %v3993_v59, %v3953_v34 }
 0x49f   :  { %v4003_v7 = vmax.f32 %v3994_v42, 0.0 }
 0x4a1   :  { %4011 = vst [vmem:[#allocation7 + $0x38] sm:$0xff] %v4003_v7 }
 0x4a2   :  { %4024 = dma.vmem_to_hbm [thread:$0]  %s4017_s14, 1024, %s4019_s17, [#allocation6], %s4408_s23, %s4408_s23, %s4409_s24  }
 0x4a3   :  { %4405 = dma.done.wait [#allocation6], 1024  }
 0x4a4   :  { %4406 = vsyncadd [#allocation6], 4294966272 }
 0x4a5   :  { %4029 = vsyncpa [#allocation5], 1 }
 0x4a6   :  { %4030 = vsyncpa [#allocation6], 1 }

</bundles_post_ra>
